<compile_context>
chip_gen: v7x
topology: tpu7x:2x2x1
jax: 0.10.0
libtpu: 0.0.40
codegen_flags: <defaults>
</compile_context>

<pallas_src>
import jax
import jax.numpy as jnp
from jax import lax
from jax.experimental import pallas as pl
from jax.experimental.pallas import tpu as pltpu


def _round_up(v, m):
    return (v + m - 1) // m * m


def _make_fused_block_kernel(H, W, HM, WM):
    """conv3x3+bn+relu -> conv3x3+bn+residual+relu for one batch element."""
    M1 = HM * WM          # extended conv1 output rows (conv2's zero halo lives here)
    M2 = H * W            # true output rows

    def kernel(xp_ref, xr_ref, w1_ref, b1_ref, w2_ref, b2_ref, o_ref, patch_ref):
        Cp = o_ref.shape[3]                 # lane-padded channel count (multiple of 128)
        cdt = xp_ref.dtype                  # MXU input dtype (f32 or bf16)

        xp = xp_ref[0]                      # (HI, WI, Cp), zero-padded input

        # ---- conv1 im2col on the extended (HM, WM) domain -----------------
        # dx shifts (sublane axis) hoisted: 3 shifted slab copies; dy shifts are
        # leading-axis views, written into lane-aligned columns of the scratch.
        for dx in range(3):
            slab = xp[:, dx:dx + WM, :]                       # (HI, WM, Cp)
            for dy in range(3):
                col = (dy * 3 + dx) * Cp
                patch_ref[:, col:col + Cp] = slab[dy:dy + HM].reshape(M1, Cp)

        # One deep matmul: K = 9*Cp (BN1 scale already folded into w1).
        acc1 = jnp.dot(patch_ref[...], w1_ref[...],
                       preferred_element_type=jnp.float32)    # (M1, Cp) f32

        # BN1 shift + ReLU, then zero everything outside the true HxW interior
        # (rows 1..H, cols 1..W of the extended domain) = conv2's zero padding.
        mid = jnp.maximum(acc1 + b1_ref[...], 0.0).reshape(HM, WM, Cp)
        r = lax.broadcasted_iota(jnp.int32, (HM, WM, Cp), 0)
        c = lax.broadcasted_iota(jnp.int32, (HM, WM, Cp), 1)
        inside = (r >= 1) & (r <= H) & (c >= 1) & (c <= W)
        mid = jnp.where(inside, mid, 0.0).astype(cdt)          # (HM, WM, Cp)

        # ---- conv2 im2col on the true (H, W) domain ------------------------
        for dx in range(3):
            slab = mid[:, dx:dx + W, :]                        # (HM, W, Cp)
            for dy in range(3):
                col = (dy * 3 + dx) * Cp
                patch_ref[0:M2, col:col + Cp] = slab[dy:dy + H].reshape(M2, Cp)

        acc2 = jnp.dot(patch_ref[0:M2, :], w2_ref[...],
                       preferred_element_type=jnp.float32)     # (M2, Cp) f32

        # BN2 shift + residual (kept f32) + ReLU; lane-dense unmasked store.
        res = xr_ref[0].reshape(M2, Cp)
        out = jnp.maximum(acc2 + b2_ref[...] + res, 0.0)
        o_ref[0] = out.reshape(H, W, Cp).astype(o_ref.dtype)

    return kernel


def basic_block_pallas(x, params, *, compute_dtype=jnp.float32,
                       out_dtype=jnp.float32):
    """BasicBlock forward (identity shortcut).  x: (N, H, W, C) NHWC, f32.

    params = (w1, s1, b1, w2, s2, b2): conv weights in HWIO plus per-channel
    folded eval-mode BN scale/shift.  `compute_dtype` selects the MXU input
    precision (bf16 recommended in production); accumulation, bias and the
    residual stay f32.  `out_dtype` selects the activation dtype written back.
    """
    w1, s1, b1, w2, s2, b2 = params
    N, H, W, C = x.shape
    assert w1.shape == (3, 3, C, C) and w2.shape == (3, 3, C, C), \
        "only the identity-shortcut configuration (in_planes == planes) is supported"

    LANE = 128
    Cp = _round_up(C, LANE)              # lane-dense channel count
    HM, WM = H + 2, _round_up(W + 2, 8)  # extended conv1 output domain (8-aligned)
    HI, WI = HM + 2, WM + 2              # padded input extents

    # Fold BN scale into conv weights (eval mode), zero-pad channels to Cp and
    # flatten the 3x3 taps into the matmul K dimension (order dy, dx, cin).
    def prep_w(w, s):
        wf = w * s                                              # scale on Cout
        wp = jnp.zeros((3, 3, Cp, Cp), jnp.float32).at[:, :, :C, :C].set(wf)
        return wp.reshape(9 * Cp, Cp).astype(compute_dtype)

    def prep_b(b):
        return jnp.zeros((1, Cp), jnp.float32).at[0, :C].set(b)

    w1f, w2f = prep_w(w1, s1), prep_w(w2, s2)
    b1f, b2f = prep_b(b1), prep_b(b2)

    # Zero-padded conv input (2 px top/left halo + alignment pad) in the
    # compute dtype; residual passed separately and kept in f32.
    xpad = jnp.zeros((N, HI, WI, Cp), compute_dtype)
    xpad = xpad.at[:, 2:2 + H, 2:2 + W, :C].set(x.astype(compute_dtype))
    xres = jnp.zeros((N, H, W, Cp), jnp.float32).at[..., :C].set(
        x.astype(jnp.float32))

    kernel = _make_fused_block_kernel(H, W, HM, WM)

    cbytes = jnp.dtype(compute_dtype).itemsize
    obytes = jnp.dtype(out_dtype).itemsize
    flops = 2 * N * (HM * WM + H * W) * (9 * Cp) * Cp
    bytes_accessed = (N * HI * WI * Cp * cbytes      # padded input read
                      + N * H * W * Cp * 4           # f32 residual read
                      + N * H * W * Cp * obytes      # output write
                      + 2 * 9 * Cp * Cp * cbytes     # weights
                      + 2 * Cp * 4)                  # biases

    out = pl.pallas_call(
        kernel,
        out_shape=jax.ShapeDtypeStruct((N, H, W, Cp), out_dtype),
        grid_spec=pltpu.PrefetchScalarGridSpec(
            num_scalar_prefetch=0,
            grid=(N,),
            in_specs=[
                pl.BlockSpec((1, HI, WI, Cp), lambda n: (n, 0, 0, 0)),   # xpad
                pl.BlockSpec((1, H, W, Cp), lambda n: (n, 0, 0, 0)),     # residual
                pl.BlockSpec((9 * Cp, Cp), lambda n: (0, 0)),            # w1 (folded)
                pl.BlockSpec((1, Cp), lambda n: (0, 0)),                 # b1
                pl.BlockSpec((9 * Cp, Cp), lambda n: (0, 0)),            # w2 (folded)
                pl.BlockSpec((1, Cp), lambda n: (0, 0)),                 # b2
            ],
            out_specs=pl.BlockSpec((1, H, W, Cp), lambda n: (n, 0, 0, 0)),
            scratch_shapes=[pltpu.VMEM((HM * WM, 9 * Cp), compute_dtype)],  # im2col
        ),
        compiler_params=pltpu.CompilerParams(
            dimension_semantics=("parallel",),
            vmem_limit_bytes=64 * 1024 * 1024),
        cost_estimate=pl.CostEstimate(
            flops=int(flops), transcendentals=0,
            bytes_accessed=int(bytes_accessed)),
    )(xpad, xres, w1f, b1f, w2f, b2f)

    return out[..., :C] if Cp != C else out


def basic_block_reference(x, params):
    """Pure-JAX reference (same eval-mode BN semantics) for verification."""
    w1, s1, b1, w2, s2, b2 = params

    def conv(v, w):
        return lax.conv_general_dilated(
            v, w, window_strides=(1, 1), padding=((1, 1), (1, 1)),
            dimension_numbers=("NHWC", "HWIO", "NHWC"))

    o = jnp.maximum(conv(x, w1) * s1 + b1, 0.0)
    o = conv(o, w2) * s2 + b2 + x
    return jnp.maximum(o, 0.0)


def make_params(key, channels):
    """Deterministic synthetic parameters; BN folded to scale/shift (eval mode)."""
    ks = jax.random.split(key, 10)
    eps = 1e-5

    def bn_fold(kg, kb, km, kv):
        gamma = 1.0 + 0.1 * jax.random.normal(kg, (channels,), jnp.float32)
        beta = 0.1 * jax.random.normal(kb, (channels,), jnp.float32)
        mean = 0.1 * jax.random.normal(km, (channels,), jnp.float32)
        var = jax.random.uniform(kv, (channels,), jnp.float32, 0.5, 1.5)
        scale = gamma / jnp.sqrt(var + eps)
        shift = beta - mean * scale
        return scale, shift

    w1 = 0.2 * jax.random.normal(ks[0], (3, 3, channels, channels), jnp.float32)
    w2 = 0.2 * jax.random.normal(ks[1], (3, 3, channels, channels), jnp.float32)
    s1, b1 = bn_fold(ks[2], ks[3], ks[4], ks[5])
    s2, b2 = bn_fold(ks[6], ks[7], ks[8], ks[9])
    return (w1, s1, b1, w2, s2, b2)


if __name__ == "__main__":
    key = jax.random.PRNGKey(0)
    k_x, k_p = jax.random.split(key)

    N, H, W, C = 2, 16, 16, 4          # PyTorch NCHW equivalent: (2, 4, 16, 16)
    x = jax.random.normal(k_x, (N, H, W, C), jnp.float32)
    params = make_params(k_p, C)

    ref = jax.block_until_ready(basic_block_reference(x, params))

    # f32 compute path: must match the reference tightly.
    out_f32 = jax.block_until_ready(
        basic_block_pallas(x, params, compute_dtype=jnp.float32))
    assert out_f32.shape == (N, H, W, C)
    if not jnp.allclose(out_f32, ref, atol=5e-4, rtol=5e-4):
        err = float(jnp.max(jnp.abs(out_f32 - ref)))
        raise AssertionError(f"f32 Pallas output mismatch, max abs err = {err}")

    # bf16 MXU-input path (production setting): loose tolerance.
    out_bf16 = jax.block_until_ready(
        basic_block_pallas(x, params, compute_dtype=jnp.bfloat16))
    err_bf = float(jnp.max(jnp.abs(out_bf16 - ref)))
    if err_bf > 0.15:
        raise AssertionError(f"bf16 Pallas output mismatch, max abs err = {err_bf}")

    print("KERNEL_OK")
</pallas_src>

<mosaic_0001>
module attributes {stable_mosaic.version = 11 : i64} {
  func.func @kernel(%arg0: i32, %arg1: memref<1x20x26x128xf32, #tpu.memory_space<vmem>>, %arg2: memref<1x16x16x128xf32, #tpu.memory_space<vmem>>, %arg3: memref<1152x128xf32, #tpu.memory_space<vmem>>, %arg4: memref<1x128xf32, #tpu.memory_space<vmem>>, %arg5: memref<1152x128xf32, #tpu.memory_space<vmem>>, %arg6: memref<1x128xf32, #tpu.memory_space<vmem>>, %arg7: memref<1x16x16x128xf32, #tpu.memory_space<vmem>>, %arg8: memref<432x1152xf32, #tpu.memory_space<vmem>>) attributes {dimension_semantics = [#tpu.dimension_semantics<parallel>], iteration_bounds = array<i64: 2>, scalar_prefetch = 0 : i64, scratch_operands = 1 : i64, tpu.core_type = #tpu.core_type<tc>, window_params = [{transform_indices = @transform_0, window_bounds = array<i64: 1, 20, 26, 128>}, {transform_indices = @transform_1, window_bounds = array<i64: 1, 16, 16, 128>}, {pipeline_mode = #tpu.pipeline_mode<synchronous>, transform_indices = @transform_2, window_bounds = array<i64: 1152, 128>}, {pipeline_mode = #tpu.pipeline_mode<synchronous>, transform_indices = @transform_3, window_bounds = array<i64: 1, 128>}, {pipeline_mode = #tpu.pipeline_mode<synchronous>, transform_indices = @transform_4, window_bounds = array<i64: 1152, 128>}, {pipeline_mode = #tpu.pipeline_mode<synchronous>, transform_indices = @transform_5, window_bounds = array<i64: 1, 128>}, {transform_indices = @transform_6, window_bounds = array<i64: 1, 16, 16, 128>}]} {
    %c0 = arith.constant 0 : index
    %c0_0 = arith.constant 0 : index
    %c0_1 = arith.constant 0 : index
    %c0_2 = arith.constant 0 : index
    %0 = vector.load %arg1[%c0, %c0_0, %c0_1, %c0_2] : memref<1x20x26x128xf32, #tpu.memory_space<vmem>>, vector<1x20x26x128xf32>
    %1 = vector.shape_cast %0 : vector<1x20x26x128xf32> to vector<20x26x128xf32>
    %2 = vector.extract_strided_slice %1 {offsets = [0, 0, 0], sizes = [20, 24, 128], strides = [1, 1, 1]} : vector<20x26x128xf32> to vector<20x24x128xf32>
    %3 = vector.extract_strided_slice %2 {offsets = [0, 0, 0], sizes = [18, 24, 128], strides = [1, 1, 1]} : vector<20x24x128xf32> to vector<18x24x128xf32>
    %4 = vector.shape_cast %3 : vector<18x24x128xf32> to vector<432x128xf32>
    %c0_3 = arith.constant 0 : index
    %c0_4 = arith.constant 0 : index
    %5 = vector.load %arg8[%c0_3, %c0_4] : memref<432x1152xf32, #tpu.memory_space<vmem>>, vector<432x128xf32>
    tpu.vector_store %arg8[%c0_3, %c0_4], %4 {strides = array<i32>} : memref<432x1152xf32, #tpu.memory_space<vmem>>, vector<432x128xf32>,
    %6 = vector.extract_strided_slice %2 {offsets = [1, 0, 0], sizes = [18, 24, 128], strides = [1, 1, 1]} : vector<20x24x128xf32> to vector<18x24x128xf32>
    %7 = vector.shape_cast %6 : vector<18x24x128xf32> to vector<432x128xf32>
    %c0_5 = arith.constant 0 : index
    %c384 = arith.constant 384 : index
    %8 = vector.load %arg8[%c0_5, %c384] : memref<432x1152xf32, #tpu.memory_space<vmem>>, vector<432x128xf32>
    tpu.vector_store %arg8[%c0_5, %c384], %7 {strides = array<i32>} : memref<432x1152xf32, #tpu.memory_space<vmem>>, vector<432x128xf32>,
    %9 = vector.extract_strided_slice %2 {offsets = [2, 0, 0], sizes = [18, 24, 128], strides = [1, 1, 1]} : vector<20x24x128xf32> to vector<18x24x128xf32>
    %10 = vector.shape_cast %9 : vector<18x24x128xf32> to vector<432x128xf32>
    %c0_6 = arith.constant 0 : index
    %c768 = arith.constant 768 : index
    %11 = vector.load %arg8[%c0_6, %c768] : memref<432x1152xf32, #tpu.memory_space<vmem>>, vector<432x128xf32>
    tpu.vector_store %arg8[%c0_6, %c768], %10 {strides = array<i32>} : memref<432x1152xf32, #tpu.memory_space<vmem>>, vector<432x128xf32>,
    %12 = vector.extract_strided_slice %1 {offsets = [0, 1, 0], sizes = [20, 24, 128], strides = [1, 1, 1]} : vector<20x26x128xf32> to vector<20x24x128xf32>
    %13 = vector.extract_strided_slice %12 {offsets = [0, 0, 0], sizes = [18, 24, 128], strides = [1, 1, 1]} : vector<20x24x128xf32> to vector<18x24x128xf32>
    %14 = vector.shape_cast %13 : vector<18x24x128xf32> to vector<432x128xf32>
    %c0_7 = arith.constant 0 : index
    %c128 = arith.constant 128 : index
    %15 = vector.load %arg8[%c0_7, %c128] : memref<432x1152xf32, #tpu.memory_space<vmem>>, vector<432x128xf32>
    tpu.vector_store %arg8[%c0_7, %c128], %14 {strides = array<i32>} : memref<432x1152xf32, #tpu.memory_space<vmem>>, vector<432x128xf32>,
    %16 = vector.extract_strided_slice %12 {offsets = [1, 0, 0], sizes = [18, 24, 128], strides = [1, 1, 1]} : vector<20x24x128xf32> to vector<18x24x128xf32>
    %17 = vector.shape_cast %16 : vector<18x24x128xf32> to vector<432x128xf32>
    %c0_8 = arith.constant 0 : index
    %c512 = arith.constant 512 : index
    %18 = vector.load %arg8[%c0_8, %c512] : memref<432x1152xf32, #tpu.memory_space<vmem>>, vector<432x128xf32>
    tpu.vector_store %arg8[%c0_8, %c512], %17 {strides = array<i32>} : memref<432x1152xf32, #tpu.memory_space<vmem>>, vector<432x128xf32>,
    %19 = vector.extract_strided_slice %12 {offsets = [2, 0, 0], sizes = [18, 24, 128], strides = [1, 1, 1]} : vector<20x24x128xf32> to vector<18x24x128xf32>
    %20 = vector.shape_cast %19 : vector<18x24x128xf32> to vector<432x128xf32>
    %c0_9 = arith.constant 0 : index
    %c896 = arith.constant 896 : index
    %21 = vector.load %arg8[%c0_9, %c896] : memref<432x1152xf32, #tpu.memory_space<vmem>>, vector<432x128xf32>
    tpu.vector_store %arg8[%c0_9, %c896], %20 {strides = array<i32>} : memref<432x1152xf32, #tpu.memory_space<vmem>>, vector<432x128xf32>,
    %22 = vector.extract_strided_slice %1 {offsets = [0, 2, 0], sizes = [20, 24, 128], strides = [1, 1, 1]} : vector<20x26x128xf32> to vector<20x24x128xf32>
    %23 = vector.extract_strided_slice %22 {offsets = [0, 0, 0], sizes = [18, 24, 128], strides = [1, 1, 1]} : vector<20x24x128xf32> to vector<18x24x128xf32>
    %24 = vector.shape_cast %23 : vector<18x24x128xf32> to vector<432x128xf32>
    %c0_10 = arith.constant 0 : index
    %c256 = arith.constant 256 : index
    %25 = vector.load %arg8[%c0_10, %c256] : memref<432x1152xf32, #tpu.memory_space<vmem>>, vector<432x128xf32>
    tpu.vector_store %arg8[%c0_10, %c256], %24 {strides = array<i32>} : memref<432x1152xf32, #tpu.memory_space<vmem>>, vector<432x128xf32>,
    %26 = vector.extract_strided_slice %22 {offsets = [1, 0, 0], sizes = [18, 24, 128], strides = [1, 1, 1]} : vector<20x24x128xf32> to vector<18x24x128xf32>
    %27 = vector.shape_cast %26 : vector<18x24x128xf32> to vector<432x128xf32>
    %c0_11 = arith.constant 0 : index
    %c640 = arith.constant 640 : index
    %28 = vector.load %arg8[%c0_11, %c640] : memref<432x1152xf32, #tpu.memory_space<vmem>>, vector<432x128xf32>
    tpu.vector_store %arg8[%c0_11, %c640], %27 {strides = array<i32>} : memref<432x1152xf32, #tpu.memory_space<vmem>>, vector<432x128xf32>,
    %29 = vector.extract_strided_slice %22 {offsets = [2, 0, 0], sizes = [18, 24, 128], strides = [1, 1, 1]} : vector<20x24x128xf32> to vector<18x24x128xf32>
    %30 = vector.shape_cast %29 : vector<18x24x128xf32> to vector<432x128xf32>
    %c0_12 = arith.constant 0 : index
    %c1024 = arith.constant 1024 : index
    %31 = vector.load %arg8[%c0_12, %c1024] : memref<432x1152xf32, #tpu.memory_space<vmem>>, vector<432x128xf32>
    tpu.vector_store %arg8[%c0_12, %c1024], %30 {strides = array<i32>} : memref<432x1152xf32, #tpu.memory_space<vmem>>, vector<432x128xf32>,
    %c0_13 = arith.constant 0 : index
    %c0_14 = arith.constant 0 : index
    %32 = vector.load %arg8[%c0_13, %c0_14] : memref<432x1152xf32, #tpu.memory_space<vmem>>, vector<432x1152xf32>
    %c0_15 = arith.constant 0 : index
    %c0_16 = arith.constant 0 : index
    %33 = vector.load %arg3[%c0_15, %c0_16] : memref<1152x128xf32, #tpu.memory_space<vmem>>, vector<1152x128xf32>
    %cst = arith.constant dense<0.000000e+00> : vector<432x128xf32>
    %34 = tpu.matmul %32, %33, %cst {dimension_numbers = #tpu.dot_dimension_numbers<[1], [0], [0], [1], [0, 0, 1, 1], [], []>} : vector<432x1152xf32>, vector<1152x128xf32>, vector<432x128xf32> -> vector<432x128xf32>
    %c0_17 = arith.constant 0 : index
    %c0_18 = arith.constant 0 : index
    %35 = vector.load %arg4[%c0_17, %c0_18] : memref<1x128xf32, #tpu.memory_space<vmem>>, vector<1x128xf32>
    %36 = vector.broadcast %35 : vector<1x128xf32> to vector<432x128xf32>
    %37 = arith.addf %34, %36 : vector<432x128xf32>
    %cst_19 = arith.constant 0.000000e+00 : f32
    %38 = vector.broadcast %cst_19 : f32 to vector<432x128xf32>
    %39 = arith.maximumf %37, %38 : vector<432x128xf32>
    %40 = vector.shape_cast %39 : vector<432x128xf32> to vector<18x24x128xf32>
    %41 = tpu.iota {dimensions = array<i32: 0>} : vector<18x24x128xi32>
    %42 = tpu.iota {dimensions = array<i32: 1>} : vector<18x24x128xi32>
    %c1_i32 = arith.constant 1 : i32
    %43 = vector.broadcast %c1_i32 : i32 to vector<18x24x128xi32>
    %44 = arith.cmpi sge, %41, %43 : vector<18x24x128xi32>
    %c16_i32 = arith.constant 16 : i32
    %45 = vector.broadcast %c16_i32 : i32 to vector<18x24x128xi32>
    %46 = arith.cmpi sle, %41, %45 : vector<18x24x128xi32>
    %47 = arith.andi %44, %46 : vector<18x24x128xi1>
    %c1_i32_20 = arith.constant 1 : i32
    %48 = vector.broadcast %c1_i32_20 : i32 to vector<18x24x128xi32>
    %49 = arith.cmpi sge, %42, %48 : vector<18x24x128xi32>
    %50 = arith.andi %47, %49 : vector<18x24x128xi1>
    %c16_i32_21 = arith.constant 16 : i32
    %51 = vector.broadcast %c16_i32_21 : i32 to vector<18x24x128xi32>
    %52 = arith.cmpi sle, %42, %51 : vector<18x24x128xi32>
    %53 = arith.andi %50, %52 : vector<18x24x128xi1>
    %cst_22 = arith.constant 0.000000e+00 : f32
    %54 = vector.broadcast %cst_22 : f32 to vector<18x24x128xf32>
    %55 = arith.select %53, %40, %54 : vector<18x24x128xi1>, vector<18x24x128xf32>
    %56 = vector.extract_strided_slice %55 {offsets = [0, 0, 0], sizes = [18, 16, 128], strides = [1, 1, 1]} : vector<18x24x128xf32> to vector<18x16x128xf32>
    %57 = vector.extract_strided_slice %56 {offsets = [0, 0, 0], sizes = [16, 16, 128], strides = [1, 1, 1]} : vector<18x16x128xf32> to vector<16x16x128xf32>
    %58 = vector.shape_cast %57 : vector<16x16x128xf32> to vector<256x128xf32>
    %c0_23 = arith.constant 0 : index
    %c0_24 = arith.constant 0 : index
    %59 = vector.load %arg8[%c0_23, %c0_24] : memref<432x1152xf32, #tpu.memory_space<vmem>>, vector<256x128xf32>
    tpu.vector_store %arg8[%c0_23, %c0_24], %58 {strides = array<i32>} : memref<432x1152xf32, #tpu.memory_space<vmem>>, vector<256x128xf32>,
    %60 = vector.extract_strided_slice %56 {offsets = [1, 0, 0], sizes = [16, 16, 128], strides = [1, 1, 1]} : vector<18x16x128xf32> to vector<16x16x128xf32>
    %61 = vector.shape_cast %60 : vector<16x16x128xf32> to vector<256x128xf32>
    %c0_25 = arith.constant 0 : index
    %c384_26 = arith.constant 384 : index
    %62 = vector.load %arg8[%c0_25, %c384_26] : memref<432x1152xf32, #tpu.memory_space<vmem>>, vector<256x128xf32>
    tpu.vector_store %arg8[%c0_25, %c384_26], %61 {strides = array<i32>} : memref<432x1152xf32, #tpu.memory_space<vmem>>, vector<256x128xf32>,
    %63 = vector.extract_strided_slice %56 {offsets = [2, 0, 0], sizes = [16, 16, 128], strides = [1, 1, 1]} : vector<18x16x128xf32> to vector<16x16x128xf32>
    %64 = vector.shape_cast %63 : vector<16x16x128xf32> to vector<256x128xf32>
    %c0_27 = arith.constant 0 : index
    %c768_28 = arith.constant 768 : index
    %65 = vector.load %arg8[%c0_27, %c768_28] : memref<432x1152xf32, #tpu.memory_space<vmem>>, vector<256x128xf32>
    tpu.vector_store %arg8[%c0_27, %c768_28], %64 {strides = array<i32>} : memref<432x1152xf32, #tpu.memory_space<vmem>>, vector<256x128xf32>,
    %66 = vector.extract_strided_slice %55 {offsets = [0, 1, 0], sizes = [18, 16, 128], strides = [1, 1, 1]} : vector<18x24x128xf32> to vector<18x16x128xf32>
    %67 = vector.extract_strided_slice %66 {offsets = [0, 0, 0], sizes = [16, 16, 128], strides = [1, 1, 1]} : vector<18x16x128xf32> to vector<16x16x128xf32>
    %68 = vector.shape_cast %67 : vector<16x16x128xf32> to vector<256x128xf32>
    %c0_29 = arith.constant 0 : index
    %c128_30 = arith.constant 128 : index
    %69 = vector.load %arg8[%c0_29, %c128_30] : memref<432x1152xf32, #tpu.memory_space<vmem>>, vector<256x128xf32>
    tpu.vector_store %arg8[%c0_29, %c128_30], %68 {strides = array<i32>} : memref<432x1152xf32, #tpu.memory_space<vmem>>, vector<256x128xf32>,
    %70 = vector.extract_strided_slice %66 {offsets = [1, 0, 0], sizes = [16, 16, 128], strides = [1, 1, 1]} : vector<18x16x128xf32> to vector<16x16x128xf32>
    %71 = vector.shape_cast %70 : vector<16x16x128xf32> to vector<256x128xf32>
    %c0_31 = arith.constant 0 : index
    %c512_32 = arith.constant 512 : index
    %72 = vector.load %arg8[%c0_31, %c512_32] : memref<432x1152xf32, #tpu.memory_space<vmem>>, vector<256x128xf32>
    tpu.vector_store %arg8[%c0_31, %c512_32], %71 {strides = array<i32>} : memref<432x1152xf32, #tpu.memory_space<vmem>>, vector<256x128xf32>,
    %73 = vector.extract_strided_slice %66 {offsets = [2, 0, 0], sizes = [16, 16, 128], strides = [1, 1, 1]} : vector<18x16x128xf32> to vector<16x16x128xf32>
    %74 = vector.shape_cast %73 : vector<16x16x128xf32> to vector<256x128xf32>
    %c0_33 = arith.constant 0 : index
    %c896_34 = arith.constant 896 : index
    %75 = vector.load %arg8[%c0_33, %c896_34] : memref<432x1152xf32, #tpu.memory_space<vmem>>, vector<256x128xf32>
    tpu.vector_store %arg8[%c0_33, %c896_34], %74 {strides = array<i32>} : memref<432x1152xf32, #tpu.memory_space<vmem>>, vector<256x128xf32>,
    %76 = vector.extract_strided_slice %55 {offsets = [0, 2, 0], sizes = [18, 16, 128], strides = [1, 1, 1]} : vector<18x24x128xf32> to vector<18x16x128xf32>
    %77 = vector.extract_strided_slice %76 {offsets = [0, 0, 0], sizes = [16, 16, 128], strides = [1, 1, 1]} : vector<18x16x128xf32> to vector<16x16x128xf32>
    %78 = vector.shape_cast %77 : vector<16x16x128xf32> to vector<256x128xf32>
    %c0_35 = arith.constant 0 : index
    %c256_36 = arith.constant 256 : index
    %79 = vector.load %arg8[%c0_35, %c256_36] : memref<432x1152xf32, #tpu.memory_space<vmem>>, vector<256x128xf32>
    tpu.vector_store %arg8[%c0_35, %c256_36], %78 {strides = array<i32>} : memref<432x1152xf32, #tpu.memory_space<vmem>>, vector<256x128xf32>,
    %80 = vector.extract_strided_slice %76 {offsets = [1, 0, 0], sizes = [16, 16, 128], strides = [1, 1, 1]} : vector<18x16x128xf32> to vector<16x16x128xf32>
    %81 = vector.shape_cast %80 : vector<16x16x128xf32> to vector<256x128xf32>
    %c0_37 = arith.constant 0 : index
    %c640_38 = arith.constant 640 : index
    %82 = vector.load %arg8[%c0_37, %c640_38] : memref<432x1152xf32, #tpu.memory_space<vmem>>, vector<256x128xf32>
    tpu.vector_store %arg8[%c0_37, %c640_38], %81 {strides = array<i32>} : memref<432x1152xf32, #tpu.memory_space<vmem>>, vector<256x128xf32>,
    %83 = vector.extract_strided_slice %76 {offsets = [2, 0, 0], sizes = [16, 16, 128], strides = [1, 1, 1]} : vector<18x16x128xf32> to vector<16x16x128xf32>
    %84 = vector.shape_cast %83 : vector<16x16x128xf32> to vector<256x128xf32>
    %c0_39 = arith.constant 0 : index
    %c1024_40 = arith.constant 1024 : index
    %85 = vector.load %arg8[%c0_39, %c1024_40] : memref<432x1152xf32, #tpu.memory_space<vmem>>, vector<256x128xf32>
    tpu.vector_store %arg8[%c0_39, %c1024_40], %84 {strides = array<i32>} : memref<432x1152xf32, #tpu.memory_space<vmem>>, vector<256x128xf32>,
    %c0_41 = arith.constant 0 : index
    %c0_42 = arith.constant 0 : index
    %86 = vector.load %arg8[%c0_41, %c0_42] : memref<432x1152xf32, #tpu.memory_space<vmem>>, vector<256x1152xf32>
    %c0_43 = arith.constant 0 : index
    %c0_44 = arith.constant 0 : index
    %87 = vector.load %arg5[%c0_43, %c0_44] : memref<1152x128xf32, #tpu.memory_space<vmem>>, vector<1152x128xf32>
    %cst_45 = arith.constant dense<0.000000e+00> : vector<256x128xf32>
    %88 = tpu.matmul %86, %87, %cst_45 {dimension_numbers = #tpu.dot_dimension_numbers<[1], [0], [0], [1], [0, 0, 1, 1], [], []>} : vector<256x1152xf32>, vector<1152x128xf32>, vector<256x128xf32> -> vector<256x128xf32>
    %c0_46 = arith.constant 0 : index
    %c0_47 = arith.constant 0 : index
    %c0_48 = arith.constant 0 : index
    %c0_49 = arith.constant 0 : index
    %89 = vector.load %arg2[%c0_46, %c0_47, %c0_48, %c0_49] : memref<1x16x16x128xf32, #tpu.memory_space<vmem>>, vector<1x16x16x128xf32>
    %90 = vector.shape_cast %89 : vector<1x16x16x128xf32> to vector<16x16x128xf32>
    %91 = vector.shape_cast %90 : vector<16x16x128xf32> to vector<256x128xf32>
    %c0_50 = arith.constant 0 : index
    %c0_51 = arith.constant 0 : index
    %92 = vector.load %arg6[%c0_50, %c0_51] : memref<1x128xf32, #tpu.memory_space<vmem>>, vector<1x128xf32>
    %93 = vector.broadcast %92 : vector<1x128xf32> to vector<256x128xf32>
    %94 = arith.addf %88, %93 : vector<256x128xf32>
    %95 = arith.addf %94, %91 : vector<256x128xf32>
    %cst_52 = arith.constant 0.000000e+00 : f32
    %96 = vector.broadcast %cst_52 : f32 to vector<256x128xf32>
    %97 = arith.maximumf %95, %96 : vector<256x128xf32>
    %98 = vector.shape_cast %97 : vector<256x128xf32> to vector<16x16x128xf32>
    %c0_53 = arith.constant 0 : index
    %c0_54 = arith.constant 0 : index
    %c0_55 = arith.constant 0 : index
    %c0_56 = arith.constant 0 : index
    %99 = vector.load %arg7[%c0_53, %c0_54, %c0_55, %c0_56] : memref<1x16x16x128xf32, #tpu.memory_space<vmem>>, vector<1x16x16x128xf32>
    %100 = vector.shape_cast %99 : vector<1x16x16x128xf32> to vector<16x16x128xf32>
    %101 = vector.shape_cast %98 : vector<16x16x128xf32> to vector<1x16x16x128xf32>
    tpu.vector_store %arg7[%c0_53, %c0_54, %c0_55, %c0_56], %101 {strides = array<i32>} : memref<1x16x16x128xf32, #tpu.memory_space<vmem>>, vector<1x16x16x128xf32>,
    return
  }
  func.func @transform_0(%arg0: i32) -> (i32, i32, i32, i32) {
    %c0_i32 = arith.constant 0 : i32
    %c0_i32_0 = arith.constant 0 : i32
    %c0_i32_1 = arith.constant 0 : i32
    %c0_i32_2 = arith.constant 0 : i32
    return %arg0, %c0_i32, %c0_i32_0, %c0_i32_1 : i32, i32, i32, i32
  }
  func.func @transform_1(%arg0: i32) -> (i32, i32, i32, i32) {
    %c0_i32 = arith.constant 0 : i32
    %c0_i32_0 = arith.constant 0 : i32
    %c0_i32_1 = arith.constant 0 : i32
    %c0_i32_2 = arith.constant 0 : i32
    return %arg0, %c0_i32, %c0_i32_0, %c0_i32_1 : i32, i32, i32, i32
  }
  func.func @transform_2(%arg0: i32) -> (i32, i32) {
    %c0_i32 = arith.constant 0 : i32
    %c0_i32_0 = arith.constant 0 : i32
    %c0_i32_1 = arith.constant 0 : i32
    return %c0_i32, %c0_i32_0 : i32, i32
  }
  func.func @transform_3(%arg0: i32) -> (i32, i32) {
    %c0_i32 = arith.constant 0 : i32
    %c0_i32_0 = arith.constant 0 : i32
    %c0_i32_1 = arith.constant 0 : i32
    return %c0_i32, %c0_i32_0 : i32, i32
  }
  func.func @transform_4(%arg0: i32) -> (i32, i32) {
    %c0_i32 = arith.constant 0 : i32
    %c0_i32_0 = arith.constant 0 : i32
    %c0_i32_1 = arith.constant 0 : i32
    return %c0_i32, %c0_i32_0 : i32, i32
  }
  func.func @transform_5(%arg0: i32) -> (i32, i32) {
    %c0_i32 = arith.constant 0 : i32
    %c0_i32_0 = arith.constant 0 : i32
    %c0_i32_1 = arith.constant 0 : i32
    return %c0_i32, %c0_i32_0 : i32, i32
  }
  func.func @transform_6(%arg0: i32) -> (i32, i32, i32, i32) {
    %c0_i32 = arith.constant 0 : i32
    %c0_i32_0 = arith.constant 0 : i32
    %c0_i32_1 = arith.constant 0 : i32
    %c0_i32_2 = arith.constant 0 : i32
    return %arg0, %c0_i32, %c0_i32_0, %c0_i32_1 : i32, i32, i32, i32
  }
}

</mosaic_0001>

<bundles_post_ra>
// kernel: tpu_custom_call.1
= control target key start
LH: loop header
LB: loop body
LE: loop exit
PB: predicated region body
PF: predicated region fallthrough
CT: control target
= control target key end

     0   :  { %s11329_s0 = inlined_call_operand.hbm [shape: f32[2,20,26,128], index: 0, kind: input, shape index: {}]   ;;  %s11330_s1 = inlined_call_operand.hbm [shape: f32[2,16,16,128], index: 1, kind: input, shape index: {}]   ;;  %s11331_s2 = inlined_call_operand.hbm [shape: f32[1152,128], index: 2, kind: input, shape index: {}]   ;;  %s11332_s3 = inlined_call_operand.hbm [shape: f32[1,128], index: 3, kind: input, shape index: {}]   ;;  %s11333_s4 = inlined_call_operand.hbm [shape: f32[1152,128], index: 4, kind: input, shape index: {}]   ;;  %s11334_s5 = inlined_call_operand.hbm [shape: f32[1,128], index: 5, kind: input, shape index: {}]   ;;  %s11335_s6 = inlined_call_operand.hbm [shape: f32[2,16,16,128], index: 6, kind: output, shape index: {}]  }
   0x1   :  { %11653 = sst [smem:[#allocation107_spill]] %s11329_s0 }
   0x2   :  { %11654 = sst [smem:[#allocation108_spill]] %s11331_s2 }
   0x3   :  { %11655 = sst [smem:[#allocation109_spill]] %s11332_s3 }
   0x4   :  { %11656 = sst [smem:[#allocation110_spill]] %s11333_s4 }
   0x5   :  { %11 = vsyncpa [#allocation4], 0 }
   0x6   :  { %13 = vsyncpa [#allocation4 + $0x1], 0 }
   0x7   :  { %14 = vsyncpa [#allocation7], 0 }
   0x8   :  { %16 = vsyncpa [#allocation7 + $0x1], 0 }
   0x9   :  { %17 = vsyncpa [#allocation10], 0 }
   0xa   :  { %18 = vsyncpa [#allocation13], 0 }
   0xb   :  { %19 = vsyncpa [#allocation5], 0 }
   0xc   :  { %21 = vsyncpa [#allocation5 + $0x1], 0  ;;  %s8127_s21 = smov 0   ;;  %s8129_s22 = smov 0  }
   0xd   :  { %s8131_s23 = smov 0   ;;  %s8133_s24 = smov 0  }
   0xe LB: > { %s8148_s25 = sadd.s32 4294967295, %s8077_s24   ;;  %s6288_s26 = sadd.s32 4294967294, %s8077_s24   ;;  %s8077_s24 = sphi %s8133_s24, %s12110_s24   ;;  %s8073_s23 = sphi %s8131_s23, %s12109_s23   ;;  %s8069_s22 = sphi %s8129_s22, %s12108_s22   ;;  %s8065_s21 = sphi %s8127_s21, %s12107_s21  }
   0xf   : > { %p47_p0 = scmp.ne.s32.totalorder %s8069_s22, %s8065_s21  ;;  %p11336_p1 = scmp.eq.s32.totalorder %s8148_s25, 0 }
  0x10   : > { %p187_p3 = scmp.eq.s32.totalorder %s6288_s26, 1  ;;  %p6289_p5 = scmp.ge.s32.totalorder %s8077_s24, 1 }
  0x11   : > { %p8157_p4 = por %p11336_p1, %p47_p0  ;;  %p194_p7 = scmp.lt.s32.totalorder %s8077_s24, 3 }
  0x12   : > { %p8162_p6 = por %p187_p3, %p47_p0  ;;  %s8079_s30 = smov [#allocation8]  }
  0x13   : > { %s11657_s27 = scalar_select %p8157_p4, 1, 0 }
  0x14   : > { %s11658_s28 = scalar_select %p8162_p6, 1, 0 }
  0x15   : > { %p8167_p8 = pnand %p6289_p5, %p194_p7  ;;  %s206_s7 = sshll.u32 %s8079_s30, 4  ;;  %s8171_s7 = int_to_ptr.vmem [resolvable:$true] %s206_s7 }
  0x16   : > { %s8080_s9 = smov [#allocation9]   ;;  %s8081_s11 = smov [#allocation11]  }
  0x17   : > { %s11659_s29 = scalar_select %p8167_p8, 1, 0 }
  0x18   : > { %p7696_p9 = pneg %p8167_p8  ;;  %s220_s10 = sshll.u32 %s8080_s9, 4  ;;  %s8182_s10 = int_to_ptr.vmem [resolvable:$true] %s220_s10 }
  0x19   : > { %s8184_s12 = sshll.u32 %s8081_s11, 4  ;;  %s11661_s2 = sld [smem:[#allocation108_spill]]  ;;  %s231_s12 = int_to_ptr.vmem [resolvable:$true] %s8184_s12 }
  0x1a   : > { %p8178_p11 = pnand %p7696_p9, %p11336_p1 }
  0x1c   : > { %p8194_p13 = pneg %p8178_p11 }
  0x1f   : > { %s7823_s15 = scalar_lea.hbm %s11661_s2, 18432 }
  0x20   : > { %p7824_p12 = scmp.ne.s32.totalorder %s11661_s2, %s7823_s15  ;;  %p7830_p5 = scmp.lt.u32.totalorder %s7823_s15, %s11661_s2 }
  0x22   : > { %p7826_p0 = pnand %p8194_p13, %p7824_p12 }
  0x24   : > { %p7827_p3 = pneg %p7826_p0 }
  0x26   : > { %p7832_p7 = pnand %p7830_p5, %p7827_p3 }
  0x28   : > { %7835 = shalt.err (!%p7832_p7)
}
  0x29   : > { %s7836_s26 = scalar_lea.vmem %s8171_s7, 18432  ;;  %p7844_p2 = scmp.lt.s32.totalorder %s8171_s7, %s8171_s7 }
  0x2a   : > { %p7837_p9 = scmp.ne.s32.totalorder %s8171_s7, %s7836_s26  ;;  %p7845_p6 = scmp.lt.s32.totalorder %s7836_s26, %s7836_s26 }
  0x2c   : > { %p7839_p10 = pnand %p7837_p9, %p8194_p13  ;;  %p7846_p12 = por %p7845_p6, %p7844_p2 }
  0x2e   : > { %p7840_p1 = pneg %p7839_p10 }
  0x30   : > { %p7847_p0 = pnand %p7846_p12, %p7840_p1 }
  0x32   : > { %7850 = shalt.err (!%p7847_p0)
}
  0x33   : > { %s11339_s30 = smov 128   ;;  %s11341_s9 = smov 8  }
  0x34   : > { %7699 = dma.hbm_to_vmem [thread:$0]  (!%p8178_p11), %s11661_s2, 18432, %s8171_s7, [#allocation7], %s11339_s30, %s11339_s30, %s11341_s9  }
  0x35   : > { %s11663_s3 = sld [smem:[#allocation109_spill]] }
  0x3b   : > { %s7851_s16 = scalar_lea.hbm %s11663_s3, 16 }
  0x3c   : > { %p7852_p1 = scmp.ne.s32.totalorder %s11663_s3, %s7851_s16  ;;  %p7858_p10 = scmp.lt.u32.totalorder %s7851_s16, %s11663_s3 }
  0x3e   : > { %p7854_p2 = pnand %p7852_p1, %p8194_p13 }
  0x40   : > { %p7855_p6 = pneg %p7854_p2 }
  0x42   : > { %p7860_p3 = pnand %p7858_p10, %p7855_p6 }
  0x44   : > { %7863 = shalt.err (!%p7860_p3)
}
  0x45   : > { %s7864_s7 = scalar_lea.vmem %s8182_s10, 16  ;;  %s7871_s11 = scalar_lea.vmem %s8182_s10, 32 }
  0x46   : > { %p7865_p5 = scmp.ne.s32.totalorder %s8182_s10, %s7864_s7  ;;  %p7872_p12 = scmp.lt.s32.totalorder %s8182_s10, %s8182_s10 }
  0x47   : > { %p7873_p0 = scmp.lt.s32.totalorder %s7871_s11, %s7864_s7 }
  0x48   : > { %p7867_p7 = pnand %p7865_p5, %p8194_p13 }
  0x49   : > { %p7874_p1 = por %p7873_p0, %p7872_p12 }
  0x4a   : > { %p7868_p9 = pneg %p7867_p7 }
  0x4c   : > { %p7875_p2 = pnand %p7874_p1, %p7868_p9 }
  0x4e   : > { %7878 = shalt.err (!%p7875_p2)
}
  0x4f   : > { %7702 = dma.hbm_to_vmem [thread:$0]  (!%p8178_p11), %s11663_s3, 16, %s8182_s10, [#allocation10]  }
  0x50   : > { %s11664_s4 = sld [smem:[#allocation110_spill]] }
  0x56   : > { %s7879_s17 = scalar_lea.hbm %s11664_s4, 18432 }
  0x57   : > { %p7880_p6 = scmp.ne.s32.totalorder %s11664_s4, %s7879_s17  ;;  %p7886_p5 = scmp.lt.u32.totalorder %s7879_s17, %s11664_s4 }
  0x59   : > { %p7882_p10 = pnand %p7880_p6, %p8194_p13 }
  0x5b   : > { %p7883_p3 = pneg %p7882_p10 }
  0x5d   : > { %p7888_p7 = pnand %p7886_p5, %p7883_p3 }
  0x5f   : > { %7891 = shalt.err (!%p7888_p7)
}
  0x60   : > { %s7892_s11 = scalar_lea.vmem %s231_s12, 18432  ;;  %p7900_p1 = scmp.lt.s32.totalorder %s231_s12, %s231_s12 }
  0x61   : > { %p7893_p9 = scmp.ne.s32.totalorder %s231_s12, %s7892_s11  ;;  %p7901_p2 = scmp.lt.s32.totalorder %s7892_s11, %s7892_s11 }
  0x63   : > { %p7895_p12 = pnand %p7893_p9, %p8194_p13  ;;  %p7902_p4 = por %p7901_p2, %p7900_p1 }
  0x65   : > { %p7896_p0 = pneg %p7895_p12 }
  0x67   : > { %p7903_p8 = pnand %p7902_p4, %p7896_p0 }
  0x69   : > { %7906 = shalt.err (!%p7903_p8)
}
  0x6a   : > { %7705 = dma.hbm_to_vmem [thread:$0]  (!%p8178_p11), %s11664_s4, 18432, %s231_s12, [#allocation10], %s11339_s30, %s11339_s30, %s11341_s9  }
  0x6b   : > { %s8084_s14 = smov [#allocation12]   ;;  %s7907_s19 = scalar_lea.hbm %s11334_s5, 16 }
  0x6c   : > { %s244_s15 = sshll.u32 %s8084_s14, 4  ;;  %p7908_p4 = scmp.ne.s32.totalorder %s11334_s5, %s7907_s19  ;;  %s245_s15 = int_to_ptr.vmem [resolvable:$true] %s244_s15 }
  0x6d   : > { %p7914_p10 = scmp.lt.u32.totalorder %s7907_s19, %s11334_s5 }
  0x6e   : > { %p7910_p8 = pnand %p7908_p4, %p8194_p13 }
  0x70   : > { %p7911_p6 = pneg %p7910_p8 }
  0x72   : > { %p7916_p3 = pnand %p7914_p10, %p7911_p6 }
  0x74   : > { %7919 = shalt.err (!%p7916_p3)
}
  0x75   : > { %s7920_s12 = scalar_lea.vmem %s245_s15, 16  ;;  %s7927_s10 = scalar_lea.vmem %s245_s15, 32 }
  0x76   : > { %p7921_p5 = scmp.ne.s32.totalorder %s245_s15, %s7920_s12  ;;  %p7928_p12 = scmp.lt.s32.totalorder %s245_s15, %s245_s15 }
  0x77   : > { %p7929_p0 = scmp.lt.s32.totalorder %s7927_s10, %s7920_s12 }
  0x78   : > { %p7923_p7 = pnand %p7921_p5, %p8194_p13 }
  0x79   : > { %p7930_p1 = por %p7929_p0, %p7928_p12 }
  0x7a   : > { %p7924_p9 = pneg %p7923_p7 }
  0x7c   : > { %p7931_p2 = pnand %p7930_p1, %p7924_p9 }
  0x7e   : > { %7934 = shalt.err (!%p7931_p2)
}
  0x7f   : > { %7708 = dma.hbm_to_vmem [thread:$0]  (!%p8178_p11), %s11334_s5, 16, %s245_s15, [#allocation13]  }
  0x80   : > { %s8283_s18 = sadd.s32 1, %s8077_s24   ;;  %s34_s8 = sadd.s32 1, %s8073_s23 }
  0x81   : > { %s31_s16 = ssub.s32 %s8077_s24, %s8283_s18  ;;  %p41_p13 = scmp.ne.s32.totalorder %s8073_s23, %s8069_s22 }
  0x82   : > { %p32_p4 = scmp.eq.s32.totalorder %s31_s16, 0  ;;  %p42_p8 = scmp.eq.s32.totalorder %s8077_s24, 0 }
  0x83   : > { %p11665_p6 = scmp.eq.s32.totalorder %s8148_s25, 1  ;;  %p7724_p3 = scmp.lt.s32.totalorder %s8077_s24, 2 }
  0x84   : > { %s8299_s19 = scalar_select %p32_p4, %s8073_s23, %s34_s8  }
  0x85   : > { %p8293_p10 = por %p11665_p6, %p41_p13  ;;  %p43_p5 = por %p42_p8, %p41_p13 }
  0x86   : > { %s8302_s20 = sand.u32 1, %s8073_s23   ;;  %s7672_s26 = smul.u32 10240, %s8077_s24 }
  0x87   : > { %s7671_s15 = smul.u32 640, %s8302_s20  ;;  %p8306_p11 = pnand %p7724_p3, %p43_p5 }
  0x88   : > { %s11668_s0 = sld [smem:[#allocation107_spill]]  ;;  %s256_s16 = scalar_lea.sflag [#allocation4], %s8302_s20 }
  0x89   : > { %s259_s14 = scalar_lea.vmem [#allocation3], %s7671_s15  ;;  %p7937_p9 = pneg %p8306_p11 }
  0x8a   : > { %s266_s8 = sshll.u32 %s259_s14, 4  ;;  %s8316_s8 = int_to_ptr.vmem [resolvable:$true] %s266_s8 }
  0x8e   : > { %s8314_s13 = scalar_lea.hbm %s11668_s0, %s7672_s26  ;;  %s7940_s10 = scalar_lea.hbm %s11668_s0, 20480 }
  0x8f   : > { %s7935_s30 = scalar_lea.hbm %s8314_s13, 10240  ;;  %p7941_p1 = scmp.lt.u32.totalorder %s8314_s13, %s11668_s0 }
  0x90   : > { %p7936_p7 = scmp.ne.s32.totalorder %s8314_s13, %s7935_s30  ;;  %p7942_p2 = scmp.lt.u32.totalorder %s7940_s10, %s7935_s30 }
  0x91   : > { %p7944_p4 = scmp.lt.u32.totalorder %s7935_s30, %s8314_s13 }
  0x92   : > { %p7938_p12 = pnand %p7937_p9, %p7936_p7  ;;  %p7943_p13 = por %p7942_p2, %p7941_p1 }
  0x94   : > { %p7939_p0 = pneg %p7938_p12  ;;  %p7945_p8 = por %p7944_p4, %p7943_p13 }
  0x96   : > { %p7946_p6 = pnand %p7945_p8, %p7939_p0 }
  0x98   : > { %7949 = shalt.err (!%p7946_p6)
}
  0x99   : > { %s7950_s15 = scalar_lea.vmem %s8316_s8, 10240  ;;  %s8085_s14 = smov [#allocation3]  }
  0x9a   : > { %p7951_p3 = scmp.ne.s32.totalorder %s8316_s8, %s7950_s15  ;;  %s7955_s12 = sshll.u32 %s8085_s14, 4  ;;  %s7956_s12 = int_to_ptr.vmem [resolvable:$false] %s7955_s12 }
  0x9b   : > { %s7957_s9 = scalar_lea.vmem %s7956_s12, 20480  ;;  %p7958_p12 = scmp.lt.s32.totalorder %s8316_s8, %s7956_s12 }
  0x9c   : > { %p7953_p5 = pnand %p7951_p3, %p7937_p9  ;;  %p7959_p1 = scmp.lt.s32.totalorder %s7957_s9, %s7950_s15 }
  0x9e   : > { %p7954_p7 = pneg %p7953_p5  ;;  %p7960_p2 = por %p7959_p1, %p7958_p12 }
  0xa0   : > { %p7961_p13 = pnand %p7960_p2, %p7954_p7 }
  0xa2   : > { %7964 = shalt.err (!%p7961_p13)
}
  0xa3   : > { %s11669_s30 = smov 8   ;;  %s11670_s11 = smov 128  }
  0xa4   : > { %7712 = dma.hbm_to_vmem [thread:$0]  (!%p8306_p11), %s8314_s13, 10240, %s8316_s8, %s256_s16, %s11670_s11, %s11670_s11, %s11669_s30  }
  0xa5   : > { %s6296_s26 = sshll.u32 %s8302_s20, 8  ;;  %s6313_s10 = sshll.u32 %s8077_s24, 12 }
  0xa6   : > { %s8354_s12 = scalar_lea.hbm %s11330_s1, %s6313_s10  ;;  %s280_s9 = scalar_lea.vmem [#allocation6], %s6296_s26 }
  0xa7   : > { %s287_s0 = sshll.u32 %s280_s9, 4  ;;  %s11671_s2 = sand.u32 1, %s8077_s24   ;;  %s8356_s0 = int_to_ptr.vmem [resolvable:$true] %s287_s0 }
  0xa8   : > { %s8360_s3 = scalar_lea.sflag [#allocation7], %s11671_s2  ;;  %s7965_s4 = scalar_lea.hbm %s8354_s12, 4096 }
  0xa9   : > { %p7966_p0 = scmp.ne.s32.totalorder %s8354_s12, %s7965_s4  ;;  %s7970_s8 = scalar_lea.hbm %s11330_s1, 8192 }
  0xaa   : > { %p7971_p6 = scmp.lt.u32.totalorder %s8354_s12, %s11330_s1  ;;  %p7972_p3 = scmp.lt.u32.totalorder %s7970_s8, %s7965_s4 }
  0xab   : > { %p7968_p4 = pnand %p7966_p0, %p7937_p9  ;;  %p7974_p7 = scmp.lt.u32.totalorder %s7965_s4, %s8354_s12 }
  0xac   : > { %p7973_p5 = por %p7972_p3, %p7971_p6 }
  0xad   : > { %p7969_p8 = pneg %p7968_p4 }
  0xae   : > { %p7975_p12 = por %p7974_p7, %p7973_p5 }
  0xb0   : > { %p7976_p1 = pnand %p7975_p12, %p7969_p8 }
  0xb2   : > { %7979 = shalt.err (!%p7976_p1)
}
  0xb3   : > { %s7980_s2 = scalar_lea.vmem %s8356_s0, 4096  ;;  %s8086_s26 = smov [#allocation6]  }
  0xb4   : > { %p7981_p2 = scmp.ne.s32.totalorder %s8356_s0, %s7980_s2  ;;  %s7985_s15 = sshll.u32 %s8086_s26, 4  ;;  %s7986_s15 = int_to_ptr.vmem [resolvable:$false] %s7985_s15 }
  0xb5   : > { %s7987_s14 = scalar_lea.vmem %s7986_s15, 8192  ;;  %p7988_p4 = scmp.lt.s32.totalorder %s8356_s0, %s7986_s15 }
  0xb6   : > { %p7983_p13 = pnand %p7981_p2, %p7937_p9  ;;  %p7989_p6 = scmp.lt.s32.totalorder %s7987_s14, %s7980_s2 }
  0xb8   : > { %p7984_p0 = pneg %p7983_p13  ;;  %p7990_p3 = por %p7989_p6, %p7988_p4 }
  0xba   : > { %p7991_p5 = pnand %p7990_p3, %p7984_p0 }
  0xbc   : > { %7994 = shalt.err (!%p7991_p5)
}
  0xbd   : > { %7715 = dma.hbm_to_vmem [thread:$0]  (!%p8306_p11), %s8354_s12, 4096, %s8356_s0, %s8360_s3, %s11670_s11, %s11670_s11, %s11669_s30  }
  0xbe   : > { %p11672_p9 = scmp.ne.s32.totalorder %s11659_s29, 0 }
  0xc0   : > { %299 = sbr.rel (%p11672_p9) target bundleno = 1990 (0x7c6), region = 44 }
  0xc7   : > { %s8392_s4 = sand.u32 1, %s8069_s22   ;;  %p11673_p8 = scmp.ne.s32.totalorder %s11657_s27, 0 }
  0xc8   : > { %s7673_s9 = smul.u32 640, %s8392_s4  ;;  %s302_s20 = scalar_lea.sflag [#allocation4], %s8392_s4 }
  0xca   : > { %s8396_s13 = scalar_lea.vmem [#allocation3], %s7673_s9 }
  0xcb   : > { %8040 = dma.done.wait (%p11673_p8), %s302_s20, 10240  }
  0xcc   : > { %8042 = vsyncadd (%p11673_p8), %s302_s20, 4294957056  ;;  %s310_s0 = sand.u32 1, %s8148_s25   ;;  %s6300_s3 = sshll.u32 %s8392_s4, 8 }
  0xcd   : > { %s311_s29 = scalar_lea.sflag [#allocation7], %s310_s0  ;;  %s8406_s7 = scalar_lea.vmem [#allocation6], %s6300_s3 }
  0xce   : > { %8044 = dma.done.wait (%p11673_p8), %s311_s29, 4096  }
  0xcf   : > { %8046 = vsyncadd (%p11673_p8), %s311_s29, 4294963200  ;;  %p11674_p11 = scmp.eq.s32.totalorder %s8148_s25, 0 }
  0xd1   : > { %8048 = dma.done.wait (%p11674_p11), [#allocation7], 18432   ;;  %p11675_p7 = pmov %p11674_p11 }
  0xd3   : > { %8050 = vsyncadd (%p11675_p7), [#allocation7], 4294948864  ;;  %p11676_p12 = pmov %p11675_p7 }
  0xd4   : > { %p11677_p1 = pmov %p11675_p7 }
  0xd5   : > { %8052 = dma.done.wait (%p11676_p12), [#allocation10], 18448  }
  0xd6   : > { %8054 = vsyncadd (%p11677_p1), [#allocation10], 4294948848  ;;  %p11678_p2 = pmov %p11677_p1 }
  0xd7   : > { %p11679_p13 = pmov %p11677_p1 }
  0xd8   : > { %8056 = dma.done.wait (%p11678_p2), [#allocation13], 16  }
  0xd9   : > { %8058 = vsyncadd (%p11679_p13), [#allocation13], 4294967280  ;;  %v11343_v0 = vmov 0.0|0.0   ;;  %v1898_v1 = vld [vmem:[#allocation8] sm:$0xff]  ;;  %v1899_v2 = vld [vmem:[#allocation8 + $0x8] sm:$0xff]  ;;  %vm678_vm0 = vcmask 1046528  }
  0xda   : > { %6672 = vmatprep.subr.bf16.mxu0 %v11343_v0  ;;  %7120 = vmatprep.subr.bf16.mxu1 %v11343_v0  ;;  %v1900_v3 = vld [vmem:[#allocation8 + $0x10] sm:$0xff]  ;;  %v6673_v4 = vpack.c.bf16 %v1899_v2, %v1898_v1  ;;  %v1901_v5 = vld [vmem:[#allocation8 + $0x18] sm:$0xff]  ;;  %v1902_v7 = vld [vmem:[#allocation8 + $0x20] sm:$0xff]  ;;  %vm1049_vm1 = vcmask 1045504   ;;  %s11162_s27 = scalar_lea.vmem [#allocation14], %s6300_s3  ;;  %s6314_s30 = sshll.u32 %s8148_s25, 12 }
  0xdb   : > { %v6676_v6 = vpack.c.bf16 %v1901_v5, %v1900_v3  ;;  %v1903_v8 = vld [vmem:[#allocation8 + $0x28] sm:$0xff]  ;;  %v1904_v10 = vld [vmem:[#allocation8 + $0x30] sm:$0xff]  ;;  %v1905_v11 = vld [vmem:[#allocation8 + $0x38] sm:$0xff]  ;;  %s6154_s11 = sshll.u32 %s11162_s27, 4  ;;  %s11281_s16 = scalar_lea.hbm %s11335_s6, %s6314_s30  ;;  %s11283_s11 = int_to_ptr.vmem [resolvable:$true] %s6154_s11 }
  0xdc   : > { %6674 = vmatpush1.bf16.msra.mxu0 %v6673_v4  ;;  %v6679_v9 = vpack.c.bf16 %v1903_v8, %v1902_v7  ;;  %v8429_v12 = vld [vmem:[%s8396_s13] sm:$0xff]  ;;  %v6682_v13 = vpack.c.bf16 %v1905_v11, %v1904_v10  ;;  %v8432_v14 = vld [vmem:[%s8396_s13 + $0x8] sm:$0xff]  ;;  %v1908_v21 = vld [vmem:[#allocation8 + $0x50] sm:$0xff]  ;;  %s6141_s25 = scalar_lea.sflag [#allocation5], %s8392_s4  ;;  %s7995_s10 = scalar_lea.vmem %s11283_s11, 4096 }
  0xdd   : > { %6675 = vmatprep.subr.bf16.mxu0 %v11343_v0  ;;  %v679_v15 = vrot.slane %v8429_v12, 1  ;;  %v1906_v16 = vld [vmem:[#allocation8 + $0x40] sm:$0xff]  ;;  %v1907_v17 = vld [vmem:[#allocation8 + $0x48] sm:$0xff]  ;;  %v680_v18 = vrot.slane %v8432_v14, 1  ;;  %v1909_v22 = vld [vmem:[#allocation8 + $0x58] sm:$0xff]  ;;  %p7996_p0 = scmp.ne.s32.totalorder %s11283_s11, %s7995_s10  ;;  %s8089_s2 = smov [#allocation14]  }
  0xde   : > { %v6685_v20 = vpack.c.bf16 %v1907_v17, %v1906_v16  ;;  %v6688_v23 = vpack.c.bf16 %v1909_v22, %v1908_v21  ;;  %v8442_v24 = vld [vmem:[%s8396_s13 + $0x90] sm:$0xff]  ;;  %v1910_v25 = vld [vmem:[#allocation8 + $0x60] sm:$0xff]  ;;  %v1911_v26 = vld [vmem:[#allocation8 + $0x68] sm:$0xff]  ;;  %s7999_s26 = sshll.u32 %s8089_s2, 4  ;;  %s8000_s26 = int_to_ptr.vmem [resolvable:$false] %s7999_s26 }
  0xdf   : > { %v681_v19 = vsel %vm678_vm0, %v679_v15, %v680_v18  ;;  %v383_v27 = vld [vmem:[%s8396_s13 + $0x98] sm:$0x3]  ;;  %v710_v28 = vrot.slane %v8442_v24, 1  ;;  %v6691_v30 = vpack.c.bf16 %v1911_v26, %v1910_v25  ;;  %v1912_v32 = vld [vmem:[#allocation8 + $0x70] sm:$0xff]  ;;  %v1914_v35 = vld [vmem:[#allocation8 + $0x80] sm:$0xff]  ;;  %p7997_p4 = pnand %p7996_p0, %p8293_p10  ;;  %s8001_s15 = scalar_lea.vmem %s8000_s26, 8192 }
  0xe0   : > { %6677 = vmatpush1.bf16.msra.mxu0 %v6676_v6  ;;  %2113 = vmatprep.mubr.f32.mxu0 %v681_v19  ;;  %v712_v29 = vrot.slane %v383_v27, 1  ;;  %v1913_v33 = vld [vmem:[#allocation8 + $0x78] sm:$0xff]  ;;  %v1915_v36 = vld [vmem:[#allocation8 + $0x88] sm:$0xff]  ;;  %v1916_v38 = vld [vmem:[#allocation8 + $0x90] sm:$0xff]  ;;  %p8002_p3 = scmp.lt.s32.totalorder %s11283_s11, %s8000_s26  ;;  %p8003_p5 = scmp.lt.s32.totalorder %s8001_s15, %s7995_s10 }
  0xe1   : > { %6678 = vmatprep.subr.bf16.mxu0 %v11343_v0  ;;  %v6694_v34 = vpack.c.bf16 %v1913_v33, %v1912_v32  ;;  %v6697_v37 = vpack.c.bf16 %v1915_v36, %v1914_v35  ;;  %v1917_v39 = vld [vmem:[#allocation8 + $0x98] sm:$0xff]  ;;  %v1918_v41 = vld [vmem:[#allocation8 + $0xa0] sm:$0xff]  ;;  %v1919_v42 = vld [vmem:[#allocation8 + $0xa8] sm:$0xff]  ;;  %p7998_p6 = pneg %p7997_p4 }
  0xe2   : > { %v8450_v31 = vsel %vm678_vm0, %v710_v28, %v712_v29  ;;  %v6700_v40 = vpack.c.bf16 %v1917_v39, %v1916_v38  ;;  %v6703_v43 = vpack.c.bf16 %v1919_v42, %v1918_v41  ;;  %v1920_v44 = vld [vmem:[#allocation8 + $0xb0] sm:$0xff]  ;;  %v1921_v45 = vld [vmem:[#allocation8 + $0xb8] sm:$0xff]  ;;  %v1922_v47 = vld [vmem:[#allocation8 + $0xc0] sm:$0xff]  ;;  %p8004_p9 = por %p8003_p5, %p8002_p3 }
  0xe3   : > { %11680 = vst [vmem:[#allocation21_spill] sm:$0xff] %v8450_v31  ;;  %3158 = vmatprep.mubr.f32.mxu1 %v8450_v31  ;;  %v6706_v46 = vpack.c.bf16 %v1921_v45, %v1920_v44  ;;  %v1923_v48 = vld [vmem:[#allocation8 + $0xc8] sm:$0xff]  ;;  %v1924_v50 = vld [vmem:[#allocation8 + $0xd0] sm:$0xff]  ;;  %v1925_v51 = vld [vmem:[#allocation8 + $0xd8] sm:$0xff] }
  0xe4   : > { %6680 = vmatpush1.bf16.msra.mxu0 %v6679_v9  ;;  %v6709_v49 = vpack.c.bf16 %v1923_v48, %v1922_v47  ;;  %v6712_v52 = vpack.c.bf16 %v1925_v51, %v1924_v50  ;;  %v1926_v53 = vld [vmem:[#allocation8 + $0xe0] sm:$0xff]  ;;  %v1927_v54 = vld [vmem:[#allocation8 + $0xe8] sm:$0xff]  ;;  %v1928_v56 = vld [vmem:[#allocation8 + $0xf0] sm:$0xff]  ;;  %p8005_p8 = pnand %p8004_p9, %p7998_p6 }
  0xe5   : > { %6681 = vmatprep.subr.bf16.mxu0 %v11343_v0  ;;  %v6715_v55 = vpack.c.bf16 %v1927_v54, %v1926_v53  ;;  %v1929_v57 = vld [vmem:[#allocation8 + $0xf8] sm:$0xff]  ;;  %v8463_v58 = vld [vmem:[%s8396_s13 + $0x10] sm:$0xff]  ;;  %v1930_v60 = vld [vmem:[#allocation8 + $0x100] sm:$0xff] }
  0xe6   : > { %v6718_v59 = vpack.c.bf16 %v1929_v57, %v1928_v56  ;;  %v1931_v61 = vld [vmem:[#allocation8 + $0x108] sm:$0xff]  ;;  %v682_v62 = vrot.slane %v8463_v58, 1  ;;  %v8468_v63 = vld [vmem:[%s8396_s13 + $0x18] sm:$0x3]  ;;  %v1932_v4 = vld [vmem:[#allocation8 + $0x110] sm:$0xff] }
  0xe7   : > { %v6721_v1 = vpack.c.bf16 %v1931_v61, %v1930_v60  ;;  %v684_v3 = vrot.slane %v8468_v63, 1  ;;  %v1933_v5 = vld [vmem:[#allocation8 + $0x118] sm:$0xff]  ;;  %v8476_v6 = vld [vmem:[%s8396_s13 + $0x20] sm:$0xff]  ;;  %v8479_v7 = vld [vmem:[%s8396_s13 + $0x28] sm:$0xff] }
  0xe8   : > { %6683 = vmatpush1.bf16.msra.mxu0 %v6682_v13  ;;  %v683_v2 = vsel %vm678_vm0, %v680_v18, %v682_v62  ;;  %v6724_v8 = vpack.c.bf16 %v1933_v5, %v1932_v4  ;;  %v686_v10 = vrot.slane %v8476_v6, 1  ;;  %v687_v11 = vrot.slane %v8479_v7, 1  ;;  %v1934_v13 = vld [vmem:[#allocation8 + $0x120] sm:$0xff]  ;;  %v1935_v15 = vld [vmem:[#allocation8 + $0x128] sm:$0xff]  ;;  %v8487_v16 = vld [vmem:[%s8396_s13 + $0x30] sm:$0xff] }
  0xe9   : > { %6684 = vmatprep.subr.bf16.mxu0 %v11343_v0  ;;  %v685_v9 = vsel %vm678_vm0, %v682_v62, %v684_v3  ;;  %v6727_v17 = vpack.c.bf16 %v1935_v15, %v1934_v13  ;;  %v689_v19 = vrot.slane %v8487_v16, 1  ;;  %v1937_v21 = vld [vmem:[#allocation8 + $0x138] sm:$0xff]  ;;  %v1938_v27 = vld [vmem:[#allocation8 + $0x140] sm:$0xff]  ;;  %v1939_v29 = vld [vmem:[#allocation8 + $0x148] sm:$0xff] }
  0xea   : > { %v8491_v18 = vsel %vm678_vm0, %v686_v10, %v687_v11  ;;  %v8496_v22 = vld [vmem:[%s8396_s13 + $0x38] sm:$0x3]  ;;  %v8509_v32 = vld [vmem:[%s8396_s13 + $0x48] sm:$0xff]  ;;  %v6733_v33 = vpack.c.bf16 %v1939_v29, %v1938_v27  ;;  %v8520_v39 = vld [vmem:[%s8396_s13 + $0x50] sm:$0xff] }
  0xeb   : > { %11681 = vst [vmem:[#allocation22_spill] sm:$0xff] %v8491_v18  ;;  %v8501_v25 = vsel %vm678_vm0, %v687_v11, %v689_v19  ;;  %v691_v26 = vrot.slane %v8496_v22, 1  ;;  %v694_v36 = vrot.slane %v8509_v32, 1  ;;  %v1941_v38 = vld [vmem:[#allocation8 + $0x158] sm:$0xff]  ;;  %v696_v42 = vrot.slane %v8520_v39, 1  ;;  %v1943_v44 = vld [vmem:[#allocation8 + $0x168] sm:$0xff] }
  0xec   : > { %6686 = vmatpush1.bf16.msra.mxu0 %v6685_v20  ;;  %v1936_v20 = vld [vmem:[#allocation8 + $0x130] sm:$0xff]  ;;  %11682 = vst [vmem:[#allocation23_spill] sm:$0xff] %v8501_v25  ;;  %v8530_v45 = vld [vmem:[%s8396_s13 + $0x58] sm:$0x3]  ;;  %v8540_v51 = vld [vmem:[%s8396_s13 + $0x60] sm:$0xff] }
  0xed   : > { %6687 = vmatprep.subr.bf16.mxu0 %v11343_v0  ;;  %v8535_v47 = vsel %vm678_vm0, %v694_v36, %v696_v42  ;;  %v698_v48 = vrot.slane %v8530_v45, 1  ;;  %v1945_v50 = vld [vmem:[#allocation8 + $0x178] sm:$0xff]  ;;  %v1946_v57 = vld [vmem:[#allocation8 + $0x180] sm:$0xff]  ;;  %v8554_v60 = vld [vmem:[%s8396_s13 + $0x70] sm:$0xff] }
  0xee   : > { %11685 = vst [vmem:[#allocation26_spill] sm:$0xff] %v8535_v47  ;;  %v1949_v3 = vld [vmem:[#allocation8 + $0x198] sm:$0xff]  ;;  %v1950_v10 = vld [vmem:[#allocation8 + $0x1a0] sm:$0xff]  ;;  %v1951_v11 = vld [vmem:[#allocation8 + $0x1a8] sm:$0xff] }
  0xef   : > { %v8548_v54 = vsel %vm678_vm0, %v696_v42, %v698_v48  ;;  %v8564_v4 = vld [vmem:[%s8396_s13 + $0x78] sm:$0x3]  ;;  %v8574_v13 = vld [vmem:[%s8396_s13 + $0x80] sm:$0xff]  ;;  %v8577_v15 = vld [vmem:[%s8396_s13 + $0x88] sm:$0xff] }
  0xf0   : > { %6689 = vmatpush1.bf16.msra.mxu0 %v6688_v23  ;;  %v6730_v23 = vpack.c.bf16 %v1937_v21, %v1936_v20  ;;  %11686 = vst [vmem:[#allocation27_spill] sm:$0xff] %v8548_v54  ;;  %v707_v20 = vrot.slane %v8574_v13, 1  ;;  %v708_v21 = vrot.slane %v8577_v15, 1  ;;  %v1956_v42 = vld [vmem:[#allocation8 + $0x1d0] sm:$0xff] }
  0xf1   : > { %6690 = vmatprep.subr.bf16.mxu0 %v11343_v0  ;;  %v8613_v48 = vld [vmem:[%s8396_s13 + $0xb0] sm:$0xff] }
  0xf2   : > { %v8590_v29 = vsel %vm678_vm0, %v707_v20, %v708_v21 }
  0xf3   : > { %11690 = vst [vmem:[#allocation31_spill] sm:$0xff] %v8590_v29 }
  0xf4   : > { %6692 = vmatpush1.bf16.msra.mxu0 %v6691_v30  ;;  %v8506_v30 = vld [vmem:[%s8396_s13 + $0x40] sm:$0xff] }
  0xf5   : > { %6693 = vmatprep.subr.bf16.mxu0 %v11343_v0  ;;  %v693_v35 = vrot.slane %v8506_v30, 1 }
  0xf7   : > { %v8525_v41 = vsel %vm678_vm0, %v693_v35, %v694_v36  ;;  %v1955_v35 = vld [vmem:[#allocation8 + $0x1c8] sm:$0xff] }
  0xf8   : > { %6695 = vmatpush1.bf16.msra.mxu0 %v6694_v34  ;;  %v8514_v34 = vsel %vm678_vm0, %v689_v19, %v691_v26  ;;  %11684 = vst [vmem:[#allocation25_spill] sm:$0xff] %v8525_v41  ;;  %v1953_v26 = vld [vmem:[#allocation8 + $0x1b8] sm:$0xff] }
  0xf9   : > { %6696 = vmatprep.subr.bf16.mxu0 %v11343_v0  ;;  %11683 = vst [vmem:[#allocation24_spill] sm:$0xff] %v8514_v34 }
  0xfc   : > { %6698 = vmatpush1.bf16.msra.mxu0 %v6697_v37  ;;  %v1940_v37 = vld [vmem:[#allocation8 + $0x150] sm:$0xff] }
  0xfd   : > { %6699 = vmatprep.subr.bf16.mxu0 %v11343_v0 }
 0x100   : > { %6701 = vmatpush1.bf16.msra.mxu0 %v6700_v40  ;;  %v6736_v40 = vpack.c.bf16 %v1941_v38, %v1940_v37  ;;  %v8598_v37 = vsel %vm678_vm0, %v708_v21, %v710_v28  ;;  %v8602_v38 = vld [vmem:[%s8396_s13 + $0xa0] sm:$0xff] }
 0x101   : > { %6702 = vmatprep.subr.bf16.mxu0 %v11343_v0  ;;  %11691 = vst [vmem:[#allocation32_spill] sm:$0xff] %v8598_v37 }
 0x104   : > { %6704 = vmatpush1.bf16.msra.mxu0 %v6703_v43  ;;  %v1942_v43 = vld [vmem:[#allocation8 + $0x160] sm:$0xff] }
 0x105   : > { %6705 = vmatprep.subr.bf16.mxu0 %v11343_v0 }
 0x108   : > { %6707 = vmatpush1.bf16.msra.mxu0 %v6706_v46  ;;  %v6739_v46 = vpack.c.bf16 %v1943_v44, %v1942_v43  ;;  %v1957_v43 = vld [vmem:[#allocation8 + $0x1d8] sm:$0xff] }
 0x109   : > { %6708 = vmatprep.subr.bf16.mxu0 %v11343_v0  ;;  %v6760_v44 = vpack.c.bf16 %v1957_v43, %v1956_v42  ;;  %v1960_v42 = vld [vmem:[#allocation8 + $0x1f0] sm:$0xff]  ;;  %v1961_v43 = vld [vmem:[#allocation8 + $0x1f8] sm:$0xff] }
 0x10c   : > { %6710 = vmatpush1.bf16.msra.mxu0 %v6709_v49  ;;  %v1944_v49 = vld [vmem:[#allocation8 + $0x170] sm:$0xff] }
 0x10d   : > { %6711 = vmatprep.subr.bf16.mxu0 %v11343_v0  ;;  %v6742_v53 = vpack.c.bf16 %v1945_v50, %v1944_v49  ;;  %v717_v50 = vrot.slane %v8613_v48, 1 }
 0x110   : > { %6713 = vmatpush1.bf16.msra.mxu0 %v6712_v52  ;;  %v8543_v52 = vld [vmem:[%s8396_s13 + $0x68] sm:$0xff] }
 0x111   : > { %6714 = vmatprep.subr.bf16.mxu0 %v11343_v0  ;;  %v701_v56 = vrot.slane %v8543_v52, 1 }
 0x114   : > { %6716 = vmatpush1.bf16.msra.mxu0 %v6715_v55  ;;  %v700_v55 = vrot.slane %v8540_v51, 1 }
 0x115   : > { %6717 = vmatprep.subr.bf16.mxu0 %v11343_v0 }
 0x116   : > { %v8559_v62 = vsel %vm678_vm0, %v700_v55, %v701_v56 }
 0x117   : > { %11687 = vst [vmem:[#allocation28_spill] sm:$0xff] %v8559_v62 }
 0x118   : > { %6719 = vmatpush1.bf16.msra.mxu0 %v6718_v59  ;;  %v1947_v59 = vld [vmem:[#allocation8 + $0x188] sm:$0xff] }
 0x119   : > { %6720 = vmatprep.subr.bf16.mxu0 %v11343_v0  ;;  %v6745_v61 = vpack.c.bf16 %v1947_v59, %v1946_v57  ;;  %v8632_v57 = vld [vmem:[%s8396_s13 + $0xc0] sm:$0xff]  ;;  %v8635_v59 = vld [vmem:[%s8396_s13 + $0xc8] sm:$0xff] }
 0x11b   : > { %2114 = vmatmul.mubr.f32.vlgmr.msra.gmra.mrb[0].mxu0 %v8429_v12 }
 0x11c   : > { %6722 = vmatpush1.bf16.msra.mxu0 %v6721_v1  ;;  %2118 = vmatprep.mubr.f32.mxu0 %v683_v2  ;;  %v703_v1 = vrot.slane %v8554_v60, 1  ;;  %v1948_v2 = vld [vmem:[#allocation8 + $0x190] sm:$0xff] }
 0x11d   : > { %6723 = vmatprep.subr.bf16.mxu0 %v11343_v0  ;;  %v6748_v5 = vpack.c.bf16 %v1949_v3, %v1948_v2  ;;  %v721_v3 = vrot.slane %v8632_v57, 1 }
 0x11f   : > { %2119 = vmatmul.mubr.f32.gmra.mrb[2].mxu0 %v8432_v14 }
 0x120   : > { %2123 = vmatprep.mubr.f32.mxu0 %v685_v9  ;;  %6725 = vmatpush1.bf16.msra.mxu0 %v6724_v8  ;;  %v8569_v8 = vsel %vm678_vm0, %v701_v56, %v703_v1  ;;  %v705_v9 = vrot.slane %v8564_v4, 1 }
 0x121   : > { %6726 = vmatprep.subr.bf16.mxu0 %v11343_v0  ;;  %11688 = vst [vmem:[#allocation29_spill] sm:$0xff] %v8569_v8 }
 0x122   : > { %v8582_v19 = vsel %vm678_vm0, %v703_v1, %v705_v9  ;;  %v1959_v1 = vld [vmem:[#allocation8 + $0x1e8] sm:$0xff]  ;;  %v8645_v9 = vld [vmem:[%s8396_s13 + $0xd0] sm:$0xff] }
 0x123   : > { %2124 = vmatmul.mubr.f32.gmra.mrb[4].mxu0 %v8463_v58  ;;  %11689 = vst [vmem:[#allocation30_spill] sm:$0xff] %v8582_v19 }
 0x124   : > { %2128 = vmatprep.mubr.f32.mxu0 %v8491_v18  ;;  %6728 = vmatpush1.bf16.msra.mxu0 %v6727_v17  ;;  %v6751_v17 = vpack.c.bf16 %v1951_v11, %v1950_v10  ;;  %v724_v11 = vrot.slane %v8645_v9, 1  ;;  %v8796_v18 = vld [vmem:[%s8396_s13 + $0x160] sm:$0xff] }
 0x125   : > { %6729 = vmatprep.subr.bf16.mxu0 %v11343_v0 }
 0x127   : > { %2129 = vmatmul.mubr.f32.gmra.mrb[6].mxu0 %v8476_v6 }
 0x128   : > { %2133 = vmatprep.mubr.f32.mxu0 %v8501_v25  ;;  %6731 = vmatpush1.bf16.msra.mxu0 %v6730_v23  ;;  %v1952_v23 = vld [vmem:[#allocation8 + $0x1b0] sm:$0xff]  ;;  %v8787_v25 = vld [vmem:[%s8396_s13 + $0x158] sm:$0x3] }
 0x129   : > { %6732 = vmatprep.subr.bf16.mxu0 %v11343_v0  ;;  %v6754_v27 = vpack.c.bf16 %v1953_v26, %v1952_v23  ;;  %v8664_v23 = vld [vmem:[%s8396_s13 + $0xe0] sm:$0xff]  ;;  %v8667_v26 = vld [vmem:[%s8396_s13 + $0xe8] sm:$0xff] }
 0x12b   : > { %2134 = vmatmul.mubr.f32.gmra.mrb[8].mxu0 %v8479_v7 }
 0x12c   : > { %2138 = vmatprep.mubr.f32.mxu0 %v8514_v34  ;;  %6734 = vmatpush1.bf16.msra.mxu0 %v6733_v33  ;;  %v1954_v33 = vld [vmem:[#allocation8 + $0x1c0] sm:$0xff] }
 0x12d   : > { %6735 = vmatprep.subr.bf16.mxu0 %v11343_v0  ;;  %v6757_v36 = vpack.c.bf16 %v1955_v35, %v1954_v33  ;;  %v728_v33 = vrot.slane %v8664_v23, 1  ;;  %v729_v35 = vrot.slane %v8667_v26, 1 }
 0x12f   : > { %2139 = vmatmul.mubr.f32.gmra.mrb[10].mxu0 %v8487_v16 }
 0x130   : > { %2143 = vmatprep.mubr.f32.mxu0 %v8525_v41  ;;  %6737 = vmatpush1.bf16.msra.mxu0 %v6736_v40  ;;  %v8605_v40 = vld [vmem:[%s8396_s13 + $0xa8] sm:$0xff] }
 0x131   : > { %6738 = vmatprep.subr.bf16.mxu0 %v11343_v0  ;;  %v715_v28 = vrot.slane %v8605_v40, 1 }
 0x133   : > { %2144 = vmatmul.mubr.f32.gmra.mrb[12].mxu0 %v8506_v30  ;;  %v8628_v55 = vsel %vm678_vm0, %v715_v28, %v717_v50 }
 0x134   : > { %2148 = vmatprep.mubr.f32.mxu0 %v8535_v47  ;;  %6740 = vmatpush1.bf16.msra.mxu0 %v6739_v46  ;;  %v714_v46 = vrot.slane %v8602_v38, 1  ;;  %v8778_v47 = vld [vmem:[%s8396_s13 + $0x150] sm:$0xff] }
 0x135   : > { %6741 = vmatprep.subr.bf16.mxu0 %v11343_v0  ;;  %v752_v34 = vrot.slane %v8778_v47, 1 }
 0x136   : > { %v8618_v49 = vsel %vm678_vm0, %v714_v46, %v715_v28  ;;  %v8682_v46 = vsel %vm678_vm0, %v728_v33, %v729_v35  ;;  %v8711_v33 = vld [vmem:[%s8396_s13 + $0x110] sm:$0xff] }
 0x137   : > { %2149 = vmatmul.mubr.f32.gmra.mrb[14].mxu0 %v8509_v32  ;;  %11695 = vst [vmem:[#allocation36_spill] sm:$0xff] %v8682_v46 }
 0x138   : > { %2153 = vmatprep.mubr.f32.mxu0 %v8548_v54  ;;  %6743 = vmatpush1.bf16.msra.mxu0 %v6742_v53  ;;  %v8623_v53 = vld [vmem:[%s8396_s13 + $0xb8] sm:$0x3] }
 0x139   : > { %6744 = vmatprep.subr.bf16.mxu0 %v11343_v0  ;;  %v719_v56 = vrot.slane %v8623_v53, 1 }
 0x13b   : > { %2154 = vmatmul.mubr.f32.gmra.mrb[16].mxu0 %v8520_v39 }
 0x13c   : > { %2158 = vmatprep.mubr.f32.mxu0 %v8559_v62  ;;  %6746 = vmatpush1.bf16.msra.mxu0 %v6745_v61  ;;  %v1958_v61 = vld [vmem:[#allocation8 + $0x1e0] sm:$0xff]  ;;  %v8768_v62 = vld [vmem:[%s8396_s13 + $0x148] sm:$0xff] }
 0x13d   : > { %6747 = vmatprep.subr.bf16.mxu0 %v11343_v0  ;;  %v6763_v2 = vpack.c.bf16 %v1959_v1, %v1958_v61  ;;  %v1050_v1 = vrot.slane %v8429_v12, 2 }
 0x13f   : > { %2159 = vmatmul.mubr.f32.gmra.mrb[18].mxu0 %v8540_v51 }
 0x140   : > { %2163 = vmatprep.mubr.f32.mxu0 %v8569_v8  ;;  %6749 = vmatpush1.bf16.msra.mxu0 %v6748_v5  ;;  %v722_v5 = vrot.slane %v8635_v59, 1  ;;  %v8765_v8 = vld [vmem:[%s8396_s13 + $0x140] sm:$0xff] }
 0x141   : > { %6750 = vmatprep.subr.bf16.mxu0 %v11343_v0  ;;  %v749_v54 = vrot.slane %v8765_v8, 1 }
 0x142   : > { %v8651_v10 = vsel %vm678_vm0, %v721_v3, %v722_v5  ;;  %v8660_v20 = vsel %vm678_vm0, %v722_v5, %v724_v11  ;;  %v8698_v3 = vld [vmem:[%s8396_s13 + $0x100] sm:$0xff]  ;;  %v8701_v5 = vld [vmem:[%s8396_s13 + $0x108] sm:$0xff] }
 0x143   : > { %2164 = vmatmul.mubr.f32.gmra.mrb[20].mxu0 %v8543_v52  ;;  %11692 = vst [vmem:[#allocation33_spill] sm:$0xff] %v8651_v10  ;;  %11693 = vst [vmem:[#allocation34_spill] sm:$0xff] %v8660_v20  ;;  %v736_v12 = vrot.slane %v8701_v5, 1 }
 0x144   : > { %2168 = vmatprep.mubr.f32.mxu0 %v8582_v19  ;;  %6752 = vmatpush1.bf16.msra.mxu0 %v6751_v17  ;;  %v8655_v17 = vld [vmem:[%s8396_s13 + $0xd8] sm:$0x3] }
 0x145   : > { %6753 = vmatprep.subr.bf16.mxu0 %v11343_v0  ;;  %v726_v21 = vrot.slane %v8655_v17, 1  ;;  %v8756_v19 = vld [vmem:[%s8396_s13 + $0x138] sm:$0x3] }
 0x147   : > { %2169 = vmatmul.mubr.f32.gmra.mrb[22].mxu0 %v8554_v60 }
 0x148   : > { %2173 = vmatprep.mubr.f32.mxu0 %v8590_v29  ;;  %6755 = vmatpush1.bf16.msra.mxu0 %v6754_v27  ;;  %v8672_v27 = vsel %vm678_vm0, %v724_v11, %v726_v21  ;;  %v735_v21 = vrot.slane %v8698_v3, 1 }
 0x149   : > { %6756 = vmatprep.subr.bf16.mxu0 %v11343_v0  ;;  %11694 = vst [vmem:[#allocation35_spill] sm:$0xff] %v8672_v27 }
 0x14b   : > { %2174 = vmatmul.mubr.f32.gmra.mrb[24].mxu0 %v8574_v13 }
 0x14c   : > { %2178 = vmatprep.mubr.f32.mxu0 %v8598_v37  ;;  %6758 = vmatpush1.bf16.msra.mxu0 %v6757_v36  ;;  %v8677_v36 = vld [vmem:[%s8396_s13 + $0xf0] sm:$0xff] }
 0x14d   : > { %6759 = vmatprep.subr.bf16.mxu0 %v11343_v0  ;;  %v731_v28 = vrot.slane %v8677_v36, 1 }
 0x14f   : > { %2179 = vmatmul.mubr.f32.gmra.mrb[26].mxu0 %v8577_v15 }
 0x150   : > { %2183 = vmatprep.mubr.f32.mxu0 %v8450_v31  ;;  %6761 = vmatpush1.bf16.msra.mxu0 %v6760_v44  ;;  %v6766_v44 = vpack.c.bf16 %v1961_v43, %v1960_v42  ;;  %v8721_v42 = vsel %vm678_vm0, %v735_v21, %v736_v12  ;;  %v738_v43 = vrot.slane %v8711_v33, 1  ;;  %v8747_v31 = vld [vmem:[%s8396_s13 + $0x130] sm:$0xff] }
 0x151   : > { %6762 = vmatprep.subr.bf16.mxu0 %v11343_v0  ;;  %11698 = vst [vmem:[#allocation39_spill] sm:$0xff] %v8721_v42  ;;  %v745_v29 = vrot.slane %v8747_v31, 1 }
 0x153   : > { %2184 = vmatmul.mubr.f32.gmra.mrb[28].mxu0 %v8442_v24  ;;  %v8640_v24 = vsel %vm678_vm0, %v717_v50, %v719_v56  ;;  %v8686_v50 = vld [vmem:[%s8396_s13 + $0xf8] sm:$0x3]  ;;  %v8692_v56 = vsel %vm678_vm0, %v729_v35, %v731_v28 }
 0x154   : > { %2188 = vmatprep.mubr.f32.mxu0 %v8618_v49  ;;  %6764 = vmatpush1.bf16.msra.mxu0 %v6763_v2  ;;  %11696 = vst [vmem:[#allocation37_spill] sm:$0xff] %v8692_v56  ;;  %v733_v61 = vrot.slane %v8686_v50, 1  ;;  %v11345_v2 = vrot.slane %v8432_v14, 2 }
 0x155   : > { %6765 = vmatprep.subr.bf16.mxu0 %v11343_v0 }
 0x156   : > { %v8706_v11 = vsel %vm678_vm0, %v731_v28, %v733_v61  ;;  %v8716_v35 = vsel %vm1049_vm1, %v1050_v1, %v11345_v2  ;;  %v8730_v28 = vsel %vm678_vm0, %v736_v12, %v738_v43  ;;  %v8734_v1 = vld [vmem:[%s8396_s13 + $0x120] sm:$0xff] }
 0x157   : > { %2189 = vmatmul.mubr.f32.gmra.mrb[30].mxu0 %v8602_v38  ;;  %11697 = vst [vmem:[#allocation38_spill] sm:$0xff] %v8706_v11  ;;  %11699 = vst [vmem:[#allocation40_spill] sm:$0xff] %v8730_v28  ;;  %v742_v2 = vrot.slane %v8734_v1, 1 }
 0x158   : > { %2193 = vmatprep.mubr.f32.mxu0 %v8628_v55  ;;  %6767 = vmatpush1.bf16.msra.mxu0 %v6766_v44  ;;  %v8725_v44 = vld [vmem:[%s8396_s13 + $0x118] sm:$0x3] }
 0x159   : > { %6768 = vmatprep.subr.bf16.mxu0 %v11343_v0  ;;  %v740_v61 = vrot.slane %v8725_v44, 1  ;;  %v8737_v0 = vld [vmem:[%s8396_s13 + $0x128] sm:$0xff] }
 0x15a   : > { %v743_v12 = vrot.slane %v8737_v0, 1 }
 0x15b   : > { %2194 = vmatmul.mubr.f32.gmra.mrb[32].mxu0 %v8605_v40  ;;  %v8742_v21 = vsel %vm678_vm0, %v738_v43, %v740_v61  ;;  %v747_v61 = vrot.slane %v8756_v19, 1 }
 0x15c   : > { %2198 = vmatprep.mubr.f32.mxu0 %v8640_v24  ;;  %11700 = vst [vmem:[#allocation41_spill] sm:$0xff] %v8742_v21  ;;  %v8752_v37 = vsel %vm678_vm0, %v742_v2, %v743_v12  ;;  %v8761_v43 = vsel %vm678_vm0, %v743_v12, %v745_v29  ;;  %v750_v12 = vrot.slane %v8768_v62, 1 }
 0x15d   : > { %11701 = vst [vmem:[#allocation42_spill] sm:$0xff] %v8752_v37  ;;  %11702 = vst [vmem:[#allocation43_spill] sm:$0xff] %v8761_v43  ;;  %v8773_v2 = vsel %vm678_vm0, %v745_v29, %v747_v61  ;;  %v754_v61 = vrot.slane %v8787_v25, 1 }
 0x15e   : > { %11703 = vst [vmem:[#allocation44_spill] sm:$0xff] %v8773_v2  ;;  %v8783_v41 = vsel %vm678_vm0, %v749_v54, %v750_v12  ;;  %v8792_v29 = vsel %vm678_vm0, %v750_v12, %v752_v34 }
 0x15f   : > { %2199 = vmatmul.mubr.f32.gmra.mrb[34].mxu0 %v8613_v48  ;;  %11704 = vst [vmem:[#allocation45_spill] sm:$0xff] %v8783_v41  ;;  %11705 = vst [vmem:[#allocation46_spill] sm:$0xff] %v8792_v29  ;;  %v8804_v54 = vsel %vm678_vm0, %v752_v34, %v754_v61 }
 0x160   : > { %2203 = vmatprep.mubr.f32.mxu0 %v8651_v10  ;;  %11706 = vst [vmem:[#allocation47_spill] sm:$0xff] %v8804_v54  ;;  %v8889_v10 = vld [vmem:[%s8396_s13 + $0x1c0] sm:$0xff] }
 0x161   : > { %11722 = vst [vmem:[#allocation63_spill] sm:$0xff] %v8889_v10 }
 0x163   : > { %2204 = vmatmul.mubr.f32.gmra.mrb[36].mxu0 %v8632_v57 }
 0x164   : > { %2208 = vmatprep.mubr.f32.mxu0 %v8660_v20 }
 0x167   : > { %2209 = vmatmul.mubr.f32.gmra.mrb[38].mxu0 %v8635_v59 }
 0x168   : > { %2213 = vmatprep.mubr.f32.mxu0 %v8672_v27  ;;  %v8871_v27 = vld [vmem:[%s8396_s13 + $0x1b0] sm:$0xff] }
 0x169   : > { %11718 = vst [vmem:[#allocation59_spill] sm:$0xff] %v8871_v27  ;;  %v773_v20 = vrot.slane %v8871_v27, 1 }
 0x16b   : > { %2214 = vmatmul.mubr.f32.gmra.mrb[40].mxu0 %v8645_v9 }
 0x16c   : > { %2218 = vmatprep.mubr.f32.mxu0 %v8682_v46  ;;  %v8858_v46 = vld [vmem:[%s8396_s13 + $0x1a0] sm:$0xff] }
 0x16d   : > { %11715 = vst [vmem:[#allocation56_spill] sm:$0xff] %v8858_v46 }
 0x16f   : > { %2219 = vmatmul.mubr.f32.gmra.mrb[42].mxu0 %v8664_v23 }
 0x170   : > { %2223 = vmatprep.mubr.f32.mxu0 %v8692_v56 }
 0x173   : > { %2224 = vmatmul.mubr.f32.gmra.mrb[44].mxu0 %v8667_v26 }
 0x174   : > { %2228 = vmatprep.mubr.f32.mxu0 %v8706_v11 }
 0x177   : > { %2229 = vmatmul.mubr.f32.gmra.mrb[46].mxu0 %v8677_v36 }
 0x178   : > { %2233 = vmatprep.mubr.f32.mxu0 %v8721_v42  ;;  %v8840_v42 = vld [vmem:[%s8396_s13 + $0x190] sm:$0xff] }
 0x179   : > { %11711 = vst [vmem:[#allocation52_spill] sm:$0xff] %v8840_v42  ;;  %v766_v56 = vrot.slane %v8840_v42, 1 }
 0x17b   : > { %2234 = vmatmul.mubr.f32.gmra.mrb[48].mxu0 %v8698_v3 }
 0x17c   : > { %2238 = vmatprep.mubr.f32.mxu0 %v8730_v28  ;;  %v8827_v28 = vld [vmem:[%s8396_s13 + $0x180] sm:$0xff] }
 0x17f   : > { %2239 = vmatmul.mubr.f32.gmra.mrb[50].mxu0 %v8701_v5 }
 0x180   : > { %2243 = vmatprep.mubr.f32.mxu0 %v8742_v21 }
 0x183   : > { %2244 = vmatmul.mubr.f32.gmra.mrb[52].mxu0 %v8711_v33 }
 0x184   : > { %2248 = vmatprep.mubr.f32.mxu0 %v8752_v37 }
 0x187   : > { %2249 = vmatmul.mubr.f32.gmra.mrb[54].mxu0 %v8734_v1 }
 0x188   : > { %2253 = vmatprep.mubr.f32.mxu0 %v8761_v43  ;;  %v8809_v43 = vld [vmem:[%s8396_s13 + $0x170] sm:$0xff] }
 0x189   : > { %v759_v21 = vrot.slane %v8809_v43, 1 }
 0x18b   : > { %2254 = vmatmul.mubr.f32.gmra.mrb[56].mxu0 %v8737_v0 }
 0x18c   : > { %2258 = vmatprep.mubr.f32.mxu0 %v8773_v2  ;;  %v8799_v2 = vld [vmem:[%s8396_s13 + $0x168] sm:$0xff] }
 0x18d   : > { %v757_v12 = vrot.slane %v8799_v2, 1 }
 0x18f   : > { %2259 = vmatmul.mubr.f32.gmra.mrb[58].mxu0 %v8747_v31  ;;  %v8823_v34 = vsel %vm678_vm0, %v757_v12, %v759_v21 }
 0x190   : > { %2263 = vmatprep.mubr.f32.mxu0 %v8783_v41  ;;  %v756_v41 = vrot.slane %v8796_v18, 1  ;;  %11709 = vst [vmem:[#allocation50_spill] sm:$0xff] %v8823_v34 }
 0x192   : > { %v8814_v37 = vsel %vm678_vm0, %v756_v41, %v757_v12 }
 0x193   : > { %2264 = vmatmul.mubr.f32.gmra.mrb[60].mxu0 %v8765_v8  ;;  %11707 = vst [vmem:[#allocation48_spill] sm:$0xff] %v8814_v37 }
 0x194   : > { %2268 = vmatprep.mubr.f32.mxu0 %v8792_v29  ;;  %v8818_v29 = vld [vmem:[%s8396_s13 + $0x178] sm:$0x3] }
 0x195   : > { %11708 = vst [vmem:[#allocation49_spill] sm:$0xff] %v8818_v29  ;;  %v761_v61 = vrot.slane %v8818_v29, 1  ;;  %v8995_v29 = vld [vmem:[%s8396_s13 + $0x230] sm:$0xff] }
 0x196   : > { %11746 = vst [vmem:[#allocation87_spill] sm:$0xff] %v8995_v29 }
 0x197   : > { %2269 = vmatmul.mubr.f32.gmra.mrb[62].mxu0 %v8768_v62  ;;  %v8835_v41 = vsel %vm678_vm0, %v759_v21, %v761_v61 }
 0x198   : > { %2273 = vmatprep.mubr.f32.mxu0 %v8804_v54  ;;  %v8830_v54 = vld [vmem:[%s8396_s13 + $0x188] sm:$0xff]  ;;  %11710 = vst [vmem:[#allocation51_spill] sm:$0xff] %v8835_v41 }
 0x199   : > { %v764_v12 = vrot.slane %v8830_v54, 1 }
 0x19b   : > { %2274 = vmatmul.mubr.f32.gmra.mrb[64].mxu0 %v8778_v47  ;;  %v8854_v21 = vsel %vm678_vm0, %v764_v12, %v766_v56 }
 0x19c   : > { %2278 = vmatprep.mubr.f32.mxu0 %v8814_v37  ;;  %v763_v37 = vrot.slane %v8827_v28, 1  ;;  %11714 = vst [vmem:[#allocation55_spill] sm:$0xff] %v8854_v21 }
 0x19e   : > { %v8845_v11 = vsel %vm678_vm0, %v763_v37, %v764_v12 }
 0x19f   : > { %2279 = vmatmul.mubr.f32.gmra.mrb[66].mxu0 %v8796_v18  ;;  %11712 = vst [vmem:[#allocation53_spill] sm:$0xff] %v8845_v11 }
 0x1a0   : > { %2283 = vmatprep.mubr.f32.mxu0 %v8823_v34  ;;  %v8849_v34 = vld [vmem:[%s8396_s13 + $0x198] sm:$0x3] }
 0x1a1   : > { %11713 = vst [vmem:[#allocation54_spill] sm:$0xff] %v8849_v34  ;;  %v768_v61 = vrot.slane %v8849_v34, 1 }
 0x1a3   : > { %2284 = vmatmul.mubr.f32.gmra.mrb[68].mxu0 %v8799_v2  ;;  %v8866_v37 = vsel %vm678_vm0, %v766_v56, %v768_v61 }
 0x1a4   : > { %2288 = vmatprep.mubr.f32.mxu0 %v8835_v41  ;;  %v8861_v41 = vld [vmem:[%s8396_s13 + $0x1a8] sm:$0xff]  ;;  %11717 = vst [vmem:[#allocation58_spill] sm:$0xff] %v8866_v37 }
 0x1a5   : > { %11716 = vst [vmem:[#allocation57_spill] sm:$0xff] %v8861_v41  ;;  %v771_v12 = vrot.slane %v8861_v41, 1 }
 0x1a7   : > { %2289 = vmatmul.mubr.f32.gmra.mrb[70].mxu0 %v8809_v43  ;;  %v8885_v56 = vsel %vm678_vm0, %v771_v12, %v773_v20 }
 0x1a8   : > { %2293 = vmatprep.mubr.f32.mxu0 %v8845_v11  ;;  %v770_v11 = vrot.slane %v8858_v46, 1  ;;  %11721 = vst [vmem:[#allocation62_spill] sm:$0xff] %v8885_v56 }
 0x1aa   : > { %v8876_v34 = vsel %vm678_vm0, %v770_v11, %v771_v12 }
 0x1ab   : > { %2294 = vmatmul.mubr.f32.gmra.mrb[72].mxu0 %v8827_v28  ;;  %11719 = vst [vmem:[#allocation60_spill] sm:$0xff] %v8876_v34 }
 0x1ac   : > { %2298 = vmatprep.mubr.f32.mxu0 %v8854_v21  ;;  %v8880_v21 = vld [vmem:[%s8396_s13 + $0x1b8] sm:$0x3] }
 0x1ad   : > { %11720 = vst [vmem:[#allocation61_spill] sm:$0xff] %v8880_v21  ;;  %v775_v61 = vrot.slane %v8880_v21, 1 }
 0x1af   : > { %2299 = vmatmul.mubr.f32.gmra.mrb[74].mxu0 %v8830_v54  ;;  %v8897_v11 = vsel %vm678_vm0, %v773_v20, %v775_v61 }
 0x1b0   : > { %2303 = vmatprep.mubr.f32.mxu0 %v8866_v37  ;;  %v8892_v37 = vld [vmem:[%s8396_s13 + $0x1c8] sm:$0xff]  ;;  %11724 = vst [vmem:[#allocation65_spill] sm:$0xff] %v8897_v11 }
 0x1b1   : > { %11723 = vst [vmem:[#allocation64_spill] sm:$0xff] %v8892_v37  ;;  %v778_v12 = vrot.slane %v8892_v37, 1 }
 0x1b3   : > { %2304 = vmatmul.mubr.f32.gmra.mrb[76].mxu0 %v8840_v42  ;;  %v8902_v42 = vld [vmem:[%s8396_s13 + $0x1d0] sm:$0xff] }
 0x1b4   : > { %2308 = vmatprep.mubr.f32.mxu0 %v8876_v34  ;;  %v777_v34 = vrot.slane %v8889_v10, 1  ;;  %11725 = vst [vmem:[#allocation66_spill] sm:$0xff] %v8902_v42 }
 0x1b6   : > { %v8907_v21 = vsel %vm678_vm0, %v777_v34, %v778_v12 }
 0x1b7   : > { %2309 = vmatmul.mubr.f32.gmra.mrb[78].mxu0 %v8858_v46  ;;  %11726 = vst [vmem:[#allocation67_spill] sm:$0xff] %v8907_v21  ;;  %v780_v46 = vrot.slane %v8902_v42, 1 }
 0x1b8   : > { %2313 = vmatprep.mubr.f32.mxu0 %v8885_v56  ;;  %v8911_v56 = vld [vmem:[%s8396_s13 + $0x1d8] sm:$0x3] }
 0x1b9   : > { %11727 = vst [vmem:[#allocation68_spill] sm:$0xff] %v8911_v56  ;;  %v8916_v20 = vsel %vm678_vm0, %v778_v12, %v780_v46  ;;  %v782_v61 = vrot.slane %v8911_v56, 1 }
 0x1ba   : > { %11728 = vst [vmem:[#allocation69_spill] sm:$0xff] %v8916_v20 }
 0x1bb   : > { %2314 = vmatmul.mubr.f32.gmra.mrb[80].mxu0 %v8861_v41  ;;  %v8920_v41 = vld [vmem:[%s8396_s13 + $0x1e0] sm:$0xff]  ;;  %v8928_v34 = vsel %vm678_vm0, %v780_v46, %v782_v61 }
 0x1bc   : > { %2318 = vmatprep.mubr.f32.mxu0 %v8897_v11  ;;  %11729 = vst [vmem:[#allocation70_spill] sm:$0xff] %v8920_v41  ;;  %v8923_v11 = vld [vmem:[%s8396_s13 + $0x1e8] sm:$0xff]  ;;  %11731 = vst [vmem:[#allocation72_spill] sm:$0xff] %v8928_v34 }
 0x1bd   : > { %11730 = vst [vmem:[#allocation71_spill] sm:$0xff] %v8923_v11  ;;  %v785_v12 = vrot.slane %v8923_v11, 1 }
 0x1bf   : > { %2319 = vmatmul.mubr.f32.gmra.mrb[82].mxu0 %v8871_v27  ;;  %v8933_v27 = vld [vmem:[%s8396_s13 + $0x1f0] sm:$0xff] }
 0x1c0   : > { %2323 = vmatprep.mubr.f32.mxu0 %v8907_v21  ;;  %v784_v21 = vrot.slane %v8920_v41, 1  ;;  %11732 = vst [vmem:[#allocation73_spill] sm:$0xff] %v8933_v27 }
 0x1c2   : > { %v8938_v56 = vsel %vm678_vm0, %v784_v21, %v785_v12 }
 0x1c3   : > { %2324 = vmatmul.mubr.f32.gmra.mrb[84].mxu0 %v8889_v10  ;;  %11733 = vst [vmem:[#allocation74_spill] sm:$0xff] %v8938_v56  ;;  %v787_v10 = vrot.slane %v8933_v27, 1 }
 0x1c4   : > { %2328 = vmatprep.mubr.f32.mxu0 %v8916_v20  ;;  %v8942_v20 = vld [vmem:[%s8396_s13 + $0x1f8] sm:$0x3] }
 0x1c5   : > { %11734 = vst [vmem:[#allocation75_spill] sm:$0xff] %v8942_v20  ;;  %v8947_v46 = vsel %vm678_vm0, %v785_v12, %v787_v10  ;;  %v789_v61 = vrot.slane %v8942_v20, 1 }
 0x1c6   : > { %11735 = vst [vmem:[#allocation76_spill] sm:$0xff] %v8947_v46 }
 0x1c7   : > { %2329 = vmatmul.mubr.f32.gmra.mrb[86].mxu0 %v8892_v37  ;;  %v8951_v37 = vld [vmem:[%s8396_s13 + $0x200] sm:$0xff]  ;;  %v8959_v21 = vsel %vm678_vm0, %v787_v10, %v789_v61 }
 0x1c8   : > { %2333 = vmatprep.mubr.f32.mxu0 %v8928_v34  ;;  %11736 = vst [vmem:[#allocation77_spill] sm:$0xff] %v8951_v37  ;;  %v8954_v34 = vld [vmem:[%s8396_s13 + $0x208] sm:$0xff]  ;;  %11738 = vst [vmem:[#allocation79_spill] sm:$0xff] %v8959_v21 }
 0x1c9   : > { %11737 = vst [vmem:[#allocation78_spill] sm:$0xff] %v8954_v34  ;;  %v792_v12 = vrot.slane %v8954_v34, 1 }
 0x1cb   : > { %2334 = vmatmul.mubr.f32.gmra.mrb[88].mxu0 %v8902_v42  ;;  %v8964_v42 = vld [vmem:[%s8396_s13 + $0x210] sm:$0xff] }
 0x1cc   : > { %2338 = vmatprep.mubr.f32.mxu0 %v8938_v56  ;;  %v791_v56 = vrot.slane %v8951_v37, 1  ;;  %11739 = vst [vmem:[#allocation80_spill] sm:$0xff] %v8964_v42 }
 0x1ce   : > { %v8969_v20 = vsel %vm678_vm0, %v791_v56, %v792_v12 }
 0x1cf   : > { %2339 = vmatmul.mubr.f32.gmra.mrb[90].mxu0 %v8920_v41  ;;  %11740 = vst [vmem:[#allocation81_spill] sm:$0xff] %v8969_v20  ;;  %v794_v41 = vrot.slane %v8964_v42, 1 }
 0x1d0   : > { %2343 = vmatprep.mubr.f32.mxu0 %v8947_v46  ;;  %v8973_v46 = vld [vmem:[%s8396_s13 + $0x218] sm:$0x3] }
 0x1d1   : > { %11741 = vst [vmem:[#allocation82_spill] sm:$0xff] %v8973_v46  ;;  %v8978_v10 = vsel %vm678_vm0, %v792_v12, %v794_v41  ;;  %v796_v61 = vrot.slane %v8973_v46, 1  ;;  %v801_v46 = vrot.slane %v8995_v29, 1 }
 0x1d2   : > { %11742 = vst [vmem:[#allocation83_spill] sm:$0xff] %v8978_v10 }
 0x1d3   : > { %2344 = vmatmul.mubr.f32.gmra.mrb[92].mxu0 %v8923_v11  ;;  %v8982_v11 = vld [vmem:[%s8396_s13 + $0x220] sm:$0xff]  ;;  %v8990_v56 = vsel %vm678_vm0, %v794_v41, %v796_v61 }
 0x1d4   : > { %2348 = vmatprep.mubr.f32.mxu0 %v8959_v21  ;;  %11743 = vst [vmem:[#allocation84_spill] sm:$0xff] %v8982_v11  ;;  %v8985_v21 = vld [vmem:[%s8396_s13 + $0x228] sm:$0xff]  ;;  %11745 = vst [vmem:[#allocation86_spill] sm:$0xff] %v8990_v56 }
 0x1d5   : > { %11744 = vst [vmem:[#allocation85_spill] sm:$0xff] %v8985_v21 }
 0x1d7   : > { %2349 = vmatmul.mubr.f32.gmra.mrb[94].mxu0 %v8933_v27  ;;  %v798_v27 = vrot.slane %v8982_v11, 1 }
 0x1d8   : > { %2353 = vmatprep.mubr.f32.mxu0 %v8969_v20  ;;  %v799_v20 = vrot.slane %v8985_v21, 1 }
 0x1da   : > { %v9000_v12 = vsel %vm678_vm0, %v798_v27, %v799_v20  ;;  %v9009_v41 = vsel %vm678_vm0, %v799_v20, %v801_v46 }
 0x1db   : > { %2354 = vmatmul.mubr.f32.gmra.mrb[96].mxu0 %v8951_v37  ;;  %11747 = vst [vmem:[#allocation88_spill] sm:$0xff] %v9000_v12  ;;  %v9004_v37 = vld [vmem:[%s8396_s13 + $0x238] sm:$0x3]  ;;  %11749 = vst [vmem:[#allocation90_spill] sm:$0xff] %v9009_v41 }
 0x1dc   : > { %2358 = vmatprep.mubr.f32.mxu0 %v8978_v10  ;;  %11748 = vst [vmem:[#allocation89_spill] sm:$0xff] %v9004_v37  ;;  %v803_v61 = vrot.slane %v9004_v37, 1  ;;  %v1963_v10 = vld [vmem:[#allocation8 + $0x208] sm:$0xff]  ;;  %v1053_v37 = vrot.slane %v8463_v58, 2 }
 0x1dd   : > { %v1967_v58 = vld [vmem:[#allocation8 + $0x228] sm:$0xff] }
 0x1de   : > { %v9015_v27 = vsel %vm678_vm0, %v801_v46, %v803_v61  ;;  %v11751_v61 = vrot.slane %v8432_v14, 2  ;;  %v1058_v14 = vrot.slane %v8479_v7, 2 }
 0x1df   : > { %2359 = vmatmul.mubr.f32.gmra.mrb[98].mxu0 %v8954_v34  ;;  %11750 = vst [vmem:[#allocation91_spill] sm:$0xff] %v9015_v27 }
 0x1e0   : > { %2363 = vmatprep.mubr.f32.mxu0 %v8990_v56  ;;  %v1962_v56 = vld [vmem:[#allocation8 + $0x200] sm:$0xff] }
 0x1e1   : > { %v6769_v20 = vpack.c.bf16 %v1963_v10, %v1962_v56  ;;  %v1966_v10 = vld [vmem:[#allocation8 + $0x220] sm:$0xff] }
 0x1e3   : > { %2364 = vmatmul.mubr.f32.gmra.mrb[100].mxu0 %v8964_v42 }
 0x1e4   : > { %2368 = vmatprep.mubr.f32.mxu0 %v9000_v12 }
 0x1e7   : > { %2369 = vmatmul.mubr.f32.gmra.mrb[102].mxu0 %v8982_v11  ;;  %v1964_v11 = vld [vmem:[#allocation8 + $0x210] sm:$0xff] }
 0x1e8   : > { %2373 = vmatprep.mubr.f32.mxu0 %v9009_v41  ;;  %v1965_v41 = vld [vmem:[#allocation8 + $0x218] sm:$0xff] }
 0x1eb   : > { %2374 = vmatmul.mubr.f32.gmra.mrb[104].mxu0 %v8985_v21 }
 0x1ec   : > { %2378 = vmatprep.mubr.f32.mxu0 %v9015_v27  ;;  %v6772_v27 = vpack.c.bf16 %v1965_v41, %v1964_v11  ;;  %v1969_v11 = vld [vmem:[#allocation8 + $0x238] sm:$0xff]  ;;  %v1060_v41 = vrot.slane %v8487_v16, 2 }
 0x1ee   : > { %v2115_v42 = vpop.f32.mrb[0].mxu0 }
 0x1ef   : > { %v2117_v12 = vpop.f32.mrb[1].mxu0  ;;  %2379 = vmatmul.mubr.f32.gmra.mrb[106].mxu0 %v8995_v29  ;;  %v1054_v42 = vsel %vm1049_vm1, %v11751_v61, %v1053_v37  ;;  %v11752_v29 = vmov 0.0|0.0  }
 0x1f0   : > { %2448 = vmatprep.mubr.f32.mxu0 %v8476_v6  ;;  %v1055_v12 = vrot.slane %v8468_v63, 2  ;;  %v1968_v63 = vld [vmem:[#allocation8 + $0x230] sm:$0xff] }
 0x1f2   : > { %v2120_v34 = vpop.f32.mrb[2].mxu0 }
 0x1f3   : > { %v2122_v46 = vpop.f32.mrb[3].mxu0  ;;  %2449 = vmatmul.mubr.f32.vlgmr.msra.gmra.mrb[108].mxu0 %v8716_v35  ;;  %v1056_v35 = vsel %vm1049_vm1, %v1053_v37, %v1055_v12  ;;  %v1057_v34 = vrot.slane %v8476_v6, 2  ;;  %v6778_v37 = vpack.c.bf16 %v1969_v11, %v1968_v63  ;;  %v1970_v6 = vld [vmem:[#allocation8 + $0x240] sm:$0xff]  ;;  %v1069_v11 = vrot.slane %v8530_v45, 2  ;;  %v1980_v45 = vld [vmem:[#allocation8 + $0x290] sm:$0xff] }
 0x1f4   : > { %6770 = vmatpush1.bf16.msra.mxu0 %v6769_v20  ;;  %2453 = vmatprep.mubr.f32.mxu0 %v8479_v7  ;;  %v6775_v20 = vpack.c.bf16 %v1967_v58, %v1966_v10  ;;  %v1971_v7 = vld [vmem:[#allocation8 + $0x248] sm:$0xff]  ;;  %v1062_v46 = vrot.slane %v8496_v22, 2  ;;  %v1064_v10 = vrot.slane %v8506_v30, 2  ;;  %v1065_v58 = vrot.slane %v8509_v32, 2  ;;  %v1974_v22 = vld [vmem:[#allocation8 + $0x260] sm:$0xff] }
 0x1f5   : > { %6771 = vmatprep.subr.bf16.mxu0 %v11752_v29  ;;  %v6781_v61 = vpack.c.bf16 %v1971_v7, %v1970_v6  ;;  %v1071_v7 = vrot.slane %v8540_v51, 2 }
 0x1f6   : > { %v2125_v56 = vpop.f32.mrb[4].mxu0  ;;  %v9050_v12 = vsel %vm1049_vm1, %v1060_v41, %v1062_v46  ;;  %v1072_v46 = vrot.slane %v8543_v52, 2 }
 0x1f7   : > { %v2127_v21 = vpop.f32.mrb[5].mxu0  ;;  %2454 = vmatmul.mubr.f32.gmra.mrb[110].mxu0 %v1054_v42  ;;  %v1973_v42 = vld [vmem:[#allocation8 + $0x258] sm:$0xff] }
 0x1f8   : > { %2458 = vmatprep.mubr.f32.mxu0 %v8487_v16  ;;  %6773 = vmatpush1.bf16.msra.mxu0 %v6772_v27  ;;  %v9036_v21 = vsel %vm1049_vm1, %v1057_v34, %v1058_v14  ;;  %v9043_v27 = vsel %vm1049_vm1, %v1058_v14, %v1060_v41  ;;  %v1972_v16 = vld [vmem:[#allocation8 + $0x250] sm:$0xff]  ;;  %v9058_v34 = vsel %vm1049_vm1, %v1064_v10, %v1065_v58  ;;  %v1067_v14 = vrot.slane %v8520_v39, 2 }
 0x1f9   : > { %6774 = vmatprep.subr.bf16.mxu0 %v11752_v29  ;;  %v6784_v56 = vpack.c.bf16 %v1973_v42, %v1972_v16  ;;  %v1981_v16 = vld [vmem:[#allocation8 + $0x298] sm:$0xff]  ;;  %v9080_v42 = vsel %vm1049_vm1, %v1071_v7, %v1072_v46  ;;  %v1074_v10 = vrot.slane %v8554_v60, 2 }
 0x1fa   : > { %v9065_v63 = vsel %vm1049_vm1, %v1065_v58, %v1067_v14  ;;  %v9072_v6 = vsel %vm1049_vm1, %v1067_v14, %v1069_v11  ;;  %v1983_v58 = vld [vmem:[#allocation8 + $0x2a8] sm:$0xff]  ;;  %v1985_v14 = vld [vmem:[#allocation8 + $0x2b8] sm:$0xff]  ;;  %v1079_v11 = vrot.slane %v8577_v15, 2 }
 0x1fb   : > { %2459 = vmatmul.mubr.f32.gmra.mrb[112].mxu0 %v1056_v35  ;;  %v1975_v35 = vld [vmem:[#allocation8 + $0x268] sm:$0xff] }
 0x1fc   : > { %2463 = vmatprep.mubr.f32.mxu0 %v8506_v30  ;;  %6776 = vmatpush1.bf16.msra.mxu0 %v6775_v20  ;;  %v6787_v20 = vpack.c.bf16 %v1975_v35, %v1974_v22  ;;  %v1976_v30 = vld [vmem:[#allocation8 + $0x270] sm:$0xff]  ;;  %v1076_v22 = vrot.slane %v8564_v4, 2 }
 0x1fd   : > { %6777 = vmatprep.subr.bf16.mxu0 %v11752_v29 }
 0x1ff   : > { %2464 = vmatmul.mubr.f32.gmra.mrb[6].mxu0 %v9036_v21 }
 0x200   : > { %2468 = vmatprep.mubr.f32.mxu0 %v8509_v32  ;;  %6779 = vmatpush1.bf16.msra.mxu0 %v6778_v37  ;;  %v1977_v32 = vld [vmem:[#allocation8 + $0x278] sm:$0xff]  ;;  %v1979_v37 = vld [vmem:[#allocation8 + $0x288] sm:$0xff] }
 0x201   : > { %6780 = vmatprep.subr.bf16.mxu0 %v11752_v29  ;;  %v6790_v41 = vpack.c.bf16 %v1977_v32, %v1976_v30  ;;  %v9097_v30 = vsel %vm1049_vm1, %v1074_v10, %v1076_v22  ;;  %v1078_v32 = vrot.slane %v8574_v13, 2  ;;  %v1994_v22 = vld [vmem:[#allocation8 + $0x300] sm:$0xff] }
 0x203   : > { %2469 = vmatmul.mubr.f32.gmra.mrb[8].mxu0 %v9043_v27 }
 0x204   : > { %2473 = vmatprep.mubr.f32.mxu0 %v8520_v39  ;;  %6782 = vmatpush1.bf16.msra.mxu0 %v6781_v61  ;;  %v1978_v39 = vld [vmem:[#allocation8 + $0x280] sm:$0xff] }
 0x205   : > { %6783 = vmatprep.subr.bf16.mxu0 %v11752_v29  ;;  %v6793_v61 = vpack.c.bf16 %v1979_v37, %v1978_v39  ;;  %v1987_v39 = vld [vmem:[#allocation8 + $0x2c8] sm:$0xff]  ;;  %v9105_v37 = vsel %vm1049_vm1, %v1078_v32, %v1079_v11 }
 0x207   : > { %2474 = vmatmul.mubr.f32.gmra.mrb[10].mxu0 %v9050_v12 }
 0x208   : > { %2478 = vmatprep.mubr.f32.mxu0 %v8540_v51  ;;  %6785 = vmatpush1.bf16.msra.mxu0 %v6784_v56  ;;  %v6796_v51 = vpack.c.bf16 %v1981_v16, %v1980_v45  ;;  %v9087_v56 = vsel %vm1049_vm1, %v1072_v46, %v1074_v10  ;;  %v1989_v46 = vld [vmem:[#allocation8 + $0x2d8] sm:$0xff] }
 0x209   : > { %6786 = vmatprep.subr.bf16.mxu0 %v11752_v29  ;;  %v7773_v45 = vld [vmem:[%s8396_s13 + $0x98] sm:$0x3] }
 0x20a   : > { %v1083_v16 = vrot.slane %v7773_v45, 2  ;;  %v1092_v45 = vrot.slane %v8632_v57, 2 }
 0x20b   : > { %2479 = vmatmul.mubr.f32.gmra.mrb[12].mxu0 %v9058_v34 }
 0x20c   : > { %2483 = vmatprep.mubr.f32.mxu0 %v8543_v52  ;;  %6788 = vmatpush1.bf16.msra.mxu0 %v6787_v20  ;;  %v1982_v52 = vld [vmem:[#allocation8 + $0x2a0] sm:$0xff]  ;;  %v9093_v20 = vld [vmem:[%s8396_s13 + $0x90] sm:$0xff] }
 0x20d   : > { %6789 = vmatprep.subr.bf16.mxu0 %v11752_v29  ;;  %v6799_v35 = vpack.c.bf16 %v1983_v58, %v1982_v52  ;;  %v1081_v7 = vrot.slane %v9093_v20, 2  ;;  %v1085_v52 = vrot.slane %v8602_v38, 2  ;;  %v1086_v58 = vrot.slane %v8605_v40, 2 }
 0x20f   : > { %2484 = vmatmul.mubr.f32.gmra.mrb[14].mxu0 %v9065_v63 }
 0x210   : > { %2488 = vmatprep.mubr.f32.mxu0 %v8554_v60  ;;  %6791 = vmatpush1.bf16.msra.mxu0 %v6790_v41  ;;  %v1984_v60 = vld [vmem:[#allocation8 + $0x2b0] sm:$0xff]  ;;  %v1986_v41 = vld [vmem:[#allocation8 + $0x2c0] sm:$0xff] }
 0x211   : > { %6792 = vmatprep.subr.bf16.mxu0 %v11752_v29  ;;  %v6802_v4 = vpack.c.bf16 %v1985_v14, %v1984_v60  ;;  %v9127_v60 = vsel %vm1049_vm1, %v1085_v52, %v1086_v58  ;;  %v1088_v14 = vrot.slane %v8613_v48, 2  ;;  %v2001_v52 = vld [vmem:[#allocation8 + $0x338] sm:$0xff] }
 0x213   : > { %2489 = vmatmul.mubr.f32.gmra.mrb[16].mxu0 %v9072_v6 }
 0x214   : > { %2493 = vmatprep.mubr.f32.mxu0 %v8574_v13  ;;  %6794 = vmatpush1.bf16.msra.mxu0 %v6793_v61  ;;  %v6805_v13 = vpack.c.bf16 %v1987_v39, %v1986_v41  ;;  %v9112_v61 = vsel %vm1049_vm1, %v1079_v11, %v1081_v7  ;;  %v1996_v11 = vld [vmem:[#allocation8 + $0x310] sm:$0xff]  ;;  %v1090_v41 = vrot.slane %v8623_v53, 2  ;;  %v1093_v53 = vrot.slane %v8635_v59, 2 }
 0x215   : > { %6795 = vmatprep.subr.bf16.mxu0 %v11752_v29  ;;  %11753 = vst [vmem:[#allocation92_spill] sm:$0xff] %v9112_v61 }
 0x217   : > { %2494 = vmatmul.mubr.f32.gmra.mrb[18].mxu0 %v9080_v42 }
 0x218   : > { %2498 = vmatprep.mubr.f32.mxu0 %v8577_v15  ;;  %6797 = vmatpush1.bf16.msra.mxu0 %v6796_v51  ;;  %v1988_v15 = vld [vmem:[#allocation8 + $0x2d0] sm:$0xff]  ;;  %v9119_v51 = vsel %vm1049_vm1, %v1081_v7, %v1083_v16 }
 0x219   : > { %6798 = vmatprep.subr.bf16.mxu0 %v11752_v29  ;;  %v6808_v10 = vpack.c.bf16 %v1989_v46, %v1988_v15  ;;  %v1999_v15 = vld [vmem:[#allocation8 + $0x328] sm:$0xff]  ;;  %v9146_v46 = vsel %vm1049_vm1, %v1088_v14, %v1090_v41  ;;  %v2004_v41 = vld [vmem:[#allocation8 + $0x350] sm:$0xff] }
 0x21b   : > { %2499 = vmatmul.mubr.f32.gmra.mrb[20].mxu0 %v9087_v56 }
 0x21c   : > { %2503 = vmatprep.mubr.f32.mxu0 %v9093_v20  ;;  %6800 = vmatpush1.bf16.msra.mxu0 %v6799_v35  ;;  %v1995_v35 = vld [vmem:[#allocation8 + $0x308] sm:$0xff] }
 0x21d   : > { %6801 = vmatprep.subr.bf16.mxu0 %v11752_v29  ;;  %v9130_v32 = vpack.c.bf16 %v1995_v35, %v1994_v22  ;;  %v2002_v22 = vld [vmem:[#allocation8 + $0x340] sm:$0xff]  ;;  %v2003_v35 = vld [vmem:[#allocation8 + $0x348] sm:$0xff] }
 0x21f   : > { %2504 = vmatmul.mubr.f32.gmra.mrb[22].mxu0 %v9097_v30  ;;  %7136 = vmatpush1.bf16.msra.mxu1 %v9130_v32 }
 0x220   : > { %2508 = vmatprep.mubr.f32.mxu0 %v8602_v38  ;;  %6803 = vmatpush1.bf16.msra.mxu0 %v6802_v4  ;;  %v1990_v38 = vld [vmem:[#allocation8 + $0x2e0] sm:$0xff]  ;;  %v9137_v4 = vsel %vm1049_vm1, %v1086_v58, %v1088_v14  ;;  %v9158_v58 = vsel %vm1049_vm1, %v1092_v45, %v1093_v53 }
 0x221   : > { %6804 = vmatprep.subr.bf16.mxu0 %v11752_v29  ;;  %7121 = vmatprep.subr.bf16.mxu1 %v11752_v29 }
 0x223   : > { %2509 = vmatmul.mubr.f32.gmra.mrb[24].mxu0 %v9105_v37 }
 0x224   : > { %2513 = vmatprep.mubr.f32.mxu0 %v8605_v40  ;;  %6806 = vmatpush1.bf16.msra.mxu0 %v6805_v13  ;;  %v1991_v40 = vld [vmem:[#allocation8 + $0x2e8] sm:$0xff]  ;;  %v1998_v13 = vld [vmem:[#allocation8 + $0x320] sm:$0xff] }
 0x225   : > { %6807 = vmatprep.subr.bf16.mxu0 %v11752_v29  ;;  %v6811_v39 = vpack.c.bf16 %v1991_v40, %v1990_v38  ;;  %v9151_v16 = vpack.c.bf16 %v1999_v15, %v1998_v13  ;;  %v1097_v38 = vrot.slane %v8655_v17, 2  ;;  %v1992_v40 = vld [vmem:[#allocation8 + $0x2f0] sm:$0xff]  ;;  %v1100_v17 = vrot.slane %v8667_v26, 2  ;;  %v2005_v15 = vld [vmem:[#allocation8 + $0x358] sm:$0xff] }
 0x226   : > { %v9183_v45 = vpack.c.bf16 %v2005_v15, %v2004_v41  ;;  %v2013_v15 = vld [vmem:[#allocation8 + $0x398] sm:$0xff] }
 0x227   : > { %2514 = vmatmul.mubr.f32.gmra.mrb[26].mxu0 %v9112_v61 }
 0x228   : > { %2518 = vmatprep.mubr.f32.mxu0 %v8613_v48  ;;  %6809 = vmatpush1.bf16.msra.mxu0 %v6808_v10  ;;  %v1997_v48 = vld [vmem:[#allocation8 + $0x318] sm:$0xff]  ;;  %v2000_v10 = vld [vmem:[#allocation8 + $0x330] sm:$0xff] }
 0x229   : > { %6810 = vmatprep.subr.bf16.mxu0 %v11752_v29  ;;  %v9140_v7 = vpack.c.bf16 %v1997_v48, %v1996_v11  ;;  %v1993_v11 = vld [vmem:[#allocation8 + $0x2f8] sm:$0xff]  ;;  %v1099_v48 = vrot.slane %v8664_v23, 2 }
 0x22a   : > { %v6814_v13 = vpack.c.bf16 %v1993_v11, %v1992_v40  ;;  %v2010_v40 = vld [vmem:[#allocation8 + $0x380] sm:$0xff]  ;;  %v2011_v11 = vld [vmem:[#allocation8 + $0x388] sm:$0xff] }
 0x22b   : > { %2519 = vmatmul.mubr.f32.gmra.mrb[28].mxu0 %v9119_v51  ;;  %7137 = vmatpush1.bf16.msra.mxu1 %v9140_v7 }
 0x22c   : > { %2523 = vmatprep.mubr.f32.mxu0 %v8632_v57  ;;  %6812 = vmatpush1.bf16.msra.mxu0 %v6811_v39  ;;  %v1095_v57 = vrot.slane %v8645_v9, 2 }
 0x22d   : > { %7122 = vmatprep.subr.bf16.mxu1 %v11752_v29  ;;  %6813 = vmatprep.subr.bf16.mxu0 %v11752_v29 }
 0x22e   : > { %v9168_v14 = vsel %vm1049_vm1, %v1093_v53, %v1095_v57  ;;  %v9178_v39 = vsel %vm1049_vm1, %v1095_v57, %v1097_v38  ;;  %v2006_v53 = vld [vmem:[#allocation8 + $0x360] sm:$0xff]  ;;  %v2008_v57 = vld [vmem:[#allocation8 + $0x370] sm:$0xff]  ;;  %v1104_v38 = vrot.slane %v8686_v50, 2  ;;  %v9215_v50 = vpack.c.bf16 %v2011_v11, %v2010_v40  ;;  %v2017_v40 = vld [vmem:[#allocation8 + $0x3b8] sm:$0xff] }
 0x22f   : > { %2524 = vmatmul.mubr.f32.gmra.mrb[30].mxu0 %v9127_v60  ;;  %7138 = vmatpush1.bf16.msra.mxu1 %v9151_v16 }
 0x230   : > { %2528 = vmatprep.mubr.f32.mxu0 %v8635_v59  ;;  %7123 = vmatprep.subr.bf16.mxu1 %v11752_v29  ;;  %v9162_v59 = vpack.c.bf16 %v2001_v52, %v2000_v10  ;;  %v2007_v10 = vld [vmem:[#allocation8 + $0x368] sm:$0xff]  ;;  %v9189_v52 = vsel %vm1049_vm1, %v1099_v48, %v1100_v17  ;;  %v1106_v48 = vrot.slane %v8698_v3, 2 }
 0x231   : > { %6815 = vmatpush1.bf16.msra.mxu0 %v6814_v13  ;;  %11754 = vst [vmem:[#allocation93_spill] sm:$0xff] %v9189_v52  ;;  %v2012_v13 = vld [vmem:[#allocation8 + $0x390] sm:$0xff] }
 0x232   : > { %6816 = vmatprep.subr.bf16.mxu0 %v11752_v29 }
 0x233   : > { %2529 = vmatmul.mubr.f32.gmra.mrb[32].mxu0 %v9137_v4  ;;  %7139 = vmatpush1.bf16.msra.mxu1 %v9162_v59 }
 0x234   : > { %2533 = vmatprep.mubr.f32.mxu0 %v8645_v9  ;;  %7124 = vmatprep.subr.bf16.mxu1 %v11752_v29  ;;  %v9172_v9 = vpack.c.bf16 %v2003_v35, %v2002_v22  ;;  %v2009_v22 = vld [vmem:[#allocation8 + $0x378] sm:$0xff] }
 0x237   : > { %2534 = vmatmul.mubr.f32.gmra.mrb[34].mxu0 %v9146_v46  ;;  %7140 = vmatpush1.bf16.msra.mxu1 %v9172_v9 }
 0x238   : > { %2538 = vmatprep.mubr.f32.mxu0 %v8664_v23  ;;  %7125 = vmatprep.subr.bf16.mxu1 %v11752_v29  ;;  %v1102_v23 = vrot.slane %v8677_v36, 2 }
 0x23a   : > { %v9200_v35 = vsel %vm1049_vm1, %v1100_v17, %v1102_v23  ;;  %v9210_v41 = vsel %vm1049_vm1, %v1102_v23, %v1104_v38  ;;  %v1107_v17 = vrot.slane %v8701_v5, 2  ;;  %v2015_v23 = vld [vmem:[#allocation8 + $0x3a8] sm:$0xff]  ;;  %v2016_v38 = vld [vmem:[#allocation8 + $0x3b0] sm:$0xff] }
 0x23b   : > { %2539 = vmatmul.mubr.f32.gmra.mrb[36].mxu0 %v9158_v58  ;;  %7141 = vmatpush1.bf16.msra.mxu1 %v9183_v45  ;;  %11755 = vst [vmem:[#allocation94_spill] sm:$0xff] %v9200_v35  ;;  %11756 = vst [vmem:[#allocation95_spill] sm:$0xff] %v9210_v41 }
 0x23c   : > { %2543 = vmatprep.mubr.f32.mxu0 %v8667_v26  ;;  %7126 = vmatprep.subr.bf16.mxu1 %v11752_v29  ;;  %v9193_v26 = vpack.c.bf16 %v2007_v10, %v2006_v53  ;;  %v9221_v53 = vsel %vm1049_vm1, %v1106_v48, %v1107_v17  ;;  %v1109_v10 = vrot.slane %v8711_v33, 2  ;;  %v1113_v48 = vrot.slane %v8734_v1, 2 }
 0x23d   : > { %11757 = vst [vmem:[#allocation96_spill] sm:$0xff] %v9221_v53 }
 0x23f   : > { %2544 = vmatmul.mubr.f32.gmra.mrb[38].mxu0 %v9168_v14  ;;  %7142 = vmatpush1.bf16.msra.mxu1 %v9193_v26 }
 0x240   : > { %2548 = vmatprep.mubr.f32.mxu0 %v8677_v36  ;;  %7127 = vmatprep.subr.bf16.mxu1 %v11752_v29  ;;  %v9204_v36 = vpack.c.bf16 %v2009_v22, %v2008_v57  ;;  %v9231_v57 = vsel %vm1049_vm1, %v1107_v17, %v1109_v10  ;;  %v1111_v22 = vrot.slane %v8725_v44, 2  ;;  %v1114_v17 = vrot.slane %v8737_v0, 2 }
 0x241   : > { %11758 = vst [vmem:[#allocation97_spill] sm:$0xff] %v9231_v57  ;;  %v9246_v44 = vpack.c.bf16 %v2017_v40, %v2016_v38  ;;  %v1118_v38 = vrot.slane %v8756_v19, 2  ;;  %v2022_v40 = vld [vmem:[#allocation8 + $0x3e0] sm:$0xff] }
 0x242   : > { %v9241_v11 = vsel %vm1049_vm1, %v1109_v10, %v1111_v22  ;;  %v1116_v10 = vrot.slane %v8747_v31, 2 }
 0x243   : > { %2549 = vmatmul.mubr.f32.gmra.mrb[40].mxu0 %v9178_v39  ;;  %7143 = vmatpush1.bf16.msra.mxu1 %v9204_v36  ;;  %11759 = vst [vmem:[#allocation98_spill] sm:$0xff] %v9241_v11 }
 0x244   : > { %2553 = vmatprep.mubr.f32.mxu0 %v8698_v3  ;;  %7128 = vmatprep.subr.bf16.mxu1 %v11752_v29  ;;  %v9225_v3 = vpack.c.bf16 %v2013_v15, %v2012_v13  ;;  %v2018_v13 = vld [vmem:[#allocation8 + $0x3c0] sm:$0xff]  ;;  %v2019_v15 = vld [vmem:[#allocation8 + $0x3c8] sm:$0xff]  ;;  %v9262_v22 = vsel %vm1049_vm1, %v1114_v17, %v1116_v10 }
 0x245   : > { %11761 = vst [vmem:[#allocation100_spill] sm:$0xff] %v9262_v22 }
 0x247   : > { %2554 = vmatmul.mubr.f32.gmra.mrb[42].mxu0 %v9189_v52  ;;  %7144 = vmatpush1.bf16.msra.mxu1 %v9215_v50 }
 0x248   : > { %2558 = vmatprep.mubr.f32.mxu0 %v8701_v5  ;;  %7129 = vmatprep.subr.bf16.mxu1 %v11752_v29  ;;  %v2014_v5 = vld [vmem:[#allocation8 + $0x3a0] sm:$0xff] }
 0x24b   : > { %2559 = vmatmul.mubr.f32.gmra.mrb[44].mxu0 %v9200_v35  ;;  %7145 = vmatpush1.bf16.msra.mxu1 %v9225_v3 }
 0x24c   : > { %2563 = vmatprep.mubr.f32.mxu0 %v8711_v33  ;;  %7130 = vmatprep.subr.bf16.mxu1 %v11752_v29  ;;  %v9235_v33 = vpack.c.bf16 %v2015_v23, %v2014_v5  ;;  %v9252_v5 = vsel %vm1049_vm1, %v1113_v48, %v1114_v17  ;;  %v2021_v23 = vld [vmem:[#allocation8 + $0x3d8] sm:$0xff]  ;;  %v2023_v48 = vld [vmem:[#allocation8 + $0x3e8] sm:$0xff]  ;;  %v1120_v17 = vrot.slane %v8765_v8, 2 }
 0x24d   : > { %11760 = vst [vmem:[#allocation99_spill] sm:$0xff] %v9252_v5  ;;  %v9277_v19 = vpack.c.bf16 %v2023_v48, %v2022_v40  ;;  %v1127_v40 = vrot.slane %v8796_v18, 2  ;;  %v1128_v48 = vrot.slane %v8799_v2, 2 }
 0x24f   : > { %2564 = vmatmul.mubr.f32.gmra.mrb[46].mxu0 %v9210_v41  ;;  %7146 = vmatpush1.bf16.msra.mxu1 %v9235_v33 }
 0x250   : > { %2568 = vmatprep.mubr.f32.mxu0 %v8734_v1  ;;  %7131 = vmatprep.subr.bf16.mxu1 %v11752_v29  ;;  %v2020_v1 = vld [vmem:[#allocation8 + $0x3d0] sm:$0xff] }
 0x253   : > { %2569 = vmatmul.mubr.f32.gmra.mrb[48].mxu0 %v9221_v53  ;;  %7147 = vmatpush1.bf16.msra.mxu1 %v9246_v44 }
 0x254   : > { %2573 = vmatprep.mubr.f32.mxu0 %v8737_v0  ;;  %7132 = vmatprep.subr.bf16.mxu1 %v11752_v29  ;;  %v9256_v0 = vpack.c.bf16 %v2019_v15, %v2018_v13  ;;  %v9272_v13 = vsel %vm1049_vm1, %v1116_v10, %v1118_v38  ;;  %v1121_v15 = vrot.slane %v8768_v62, 2  ;;  %v1123_v10 = vrot.slane %v8778_v47, 2 }
 0x255   : > { %11762 = vst [vmem:[#allocation101_spill] sm:$0xff] %v9272_v13  ;;  %v1125_v38 = vrot.slane %v8787_v25, 2  ;;  %v7774_v25 = vld [vmem:[%s8396_s13 + $0xa0] sm:$0xff] }
 0x257   : > { %2574 = vmatmul.mubr.f32.gmra.mrb[50].mxu0 %v9231_v57  ;;  %7148 = vmatpush1.bf16.msra.mxu1 %v9256_v0 }
 0x258   : > { %2578 = vmatprep.mubr.f32.mxu0 %v8747_v31  ;;  %7133 = vmatprep.subr.bf16.mxu1 %v11752_v29  ;;  %v9266_v31 = vpack.c.bf16 %v2021_v23, %v2020_v1  ;;  %v2024_v1 = vld [vmem:[#allocation8 + $0x3f0] sm:$0xff]  ;;  %v2025_v23 = vld [vmem:[#allocation8 + $0x3f8] sm:$0xff] }
 0x25b   : > { %2579 = vmatmul.mubr.f32.gmra.mrb[52].mxu0 %v9241_v11  ;;  %7149 = vmatpush1.bf16.msra.mxu1 %v9266_v31  ;;  %v7785_v11 = vld [vmem:[%s8396_s13 + $0x110] sm:$0xff] }
 0x25c   : > { %2583 = vmatprep.mubr.f32.mxu0 %v8765_v8  ;;  %7134 = vmatprep.subr.bf16.mxu1 %v11752_v29  ;;  %v9293_v8 = vsel %vm1049_vm1, %v1121_v15, %v1123_v10 }
 0x25d   : > { %11764 = vst [vmem:[#allocation103_spill] sm:$0xff] %v9293_v8 }
 0x25f   : > { %2584 = vmatmul.mubr.f32.gmra.mrb[54].mxu0 %v9252_v5  ;;  %7150 = vmatpush1.bf16.msra.mxu1 %v9277_v19 }
 0x260   : > { %2588 = vmatprep.mubr.f32.mxu0 %v8768_v62  ;;  %7135 = vmatprep.subr.bf16.mxu1 %v11752_v29  ;;  %v9287_v62 = vpack.c.bf16 %v2025_v23, %v2024_v1  ;;  %v7776_v23 = vld [vmem:[%s8396_s13 + $0xb0] sm:$0xff] }
 0x263   : > { %2589 = vmatmul.mubr.f32.gmra.mrb[56].mxu0 %v9262_v22  ;;  %v9283_v22 = vsel %vm1049_vm1, %v1120_v17, %v1121_v15  ;;  %7151 = vmatpush1.bf16.msra.mxu1 %v9287_v62  ;;  %v1130_v17 = vrot.slane %v8809_v43, 2  ;;  %v7775_v15 = vld [vmem:[%s8396_s13 + $0xa8] sm:$0xff] }
 0x264   : > { %2593 = vmatprep.mubr.f32.mxu0 %v8778_v47  ;;  %11763 = vst [vmem:[#allocation102_spill] sm:$0xff] %v9283_v22  ;;  %6896 = vmatprep.subr.bf16.mxu1 %v11752_v29  ;;  %v9302_v47 = vsel %vm1049_vm1, %v1123_v10, %v1125_v38  ;;  %v11770_v10 = vld [vmem:[#allocation52_spill] sm:$0xff] }
 0x265   : > { %11765 = vst [vmem:[#allocation104_spill] sm:$0xff] %v9302_v47 }
 0x266   : > { %3159 = vmatmul.mubr.f32.vlgmr.msra.gmra.mrb[0].mxu1 %v9093_v20  ;;  %v9311_v20 = vsel %vm1049_vm1, %v1127_v40, %v1128_v48  ;;  %v1134_v40 = vrot.slane %v8827_v28, 2 }
 0x267   : > { %2594 = vmatmul.mubr.f32.gmra.mrb[58].mxu0 %v9272_v13  ;;  %3163 = vmatprep.mubr.f32.mxu1 %v8618_v49  ;;  %11766 = vst [vmem:[#allocation105_spill] sm:$0xff] %v9311_v20  ;;  %v7783_v13 = vld [vmem:[%s8396_s13 + $0x100] sm:$0xff] }
 0x268   : > { %2598 = vmatprep.mubr.f32.mxu0 %v8796_v18  ;;  %v9319_v18 = vsel %vm1049_vm1, %v1128_v48, %v1130_v17  ;;  %v1135_v48 = vrot.slane %v8830_v54, 2 }
 0x269   : > { %11767 = vst [vmem:[#allocation106_spill] sm:$0xff] %v9319_v18 }
 0x26a   : > { %3164 = vmatmul.mubr.f32.gmra.mrb[2].mxu1 %v7774_v25  ;;  %v7777_v25 = vld [vmem:[%s8396_s13 + $0xc0] sm:$0xff] }
 0x26b   : > { %2599 = vmatmul.mubr.f32.gmra.mrb[60].mxu0 %v9283_v22  ;;  %3168 = vmatprep.mubr.f32.mxu1 %v8628_v55  ;;  %v7782_v22 = vld [vmem:[%s8396_s13 + $0xf0] sm:$0xff] }
 0x26c   : > { %2603 = vmatprep.mubr.f32.mxu0 %v8799_v2  ;;  %v11768_v2 = vld [vmem:[#allocation49_spill] sm:$0xff] }
 0x26d   : > { %v1132_v1 = vrot.slane %v11768_v2, 2  ;;  %v11773_v2 = vld [vmem:[#allocation56_spill] sm:$0xff] }
 0x26e   : > { %3169 = vmatmul.mubr.f32.gmra.mrb[4].mxu1 %v7775_v15  ;;  %v11772_v15 = vld [vmem:[#allocation34_spill] sm:$0xff] }
 0x26f   : > { %2604 = vmatmul.mubr.f32.gmra.mrb[62].mxu0 %v9293_v8  ;;  %3173 = vmatprep.mubr.f32.mxu1 %v8640_v24  ;;  %v9327_v38 = vsel %vm1049_vm1, %v1130_v17, %v1132_v1  ;;  %v7778_v17 = vld [vmem:[%s8396_s13 + $0xc8] sm:$0xff] }
 0x270   : > { %2608 = vmatprep.mubr.f32.mxu0 %v8809_v43  ;;  %v11769_v43 = vld [vmem:[#allocation33_spill] sm:$0xff]  ;;  %11771 = vst [vmem:[#allocation49_spill] sm:$0xff] %v9327_v38 }
 0x272   : > { %3174 = vmatmul.mubr.f32.gmra.mrb[6].mxu1 %v7776_v23  ;;  %v9336_v23 = vsel %vm1049_vm1, %v1134_v40, %v1135_v48  ;;  %v11780_v40 = vld [vmem:[#allocation59_spill] sm:$0xff] }
 0x273   : > { %2609 = vmatmul.mubr.f32.gmra.mrb[64].mxu0 %v9302_v47  ;;  %3178 = vmatprep.mubr.f32.mxu1 %v11769_v43  ;;  %11774 = vst [vmem:[#allocation33_spill] sm:$0xff] %v9336_v23  ;;  %v7780_v47 = vld [vmem:[%s8396_s13 + $0xe0] sm:$0xff]  ;;  %v1144_v8 = vrot.slane %v11780_v40, 2 }
 0x274   : > { %2613 = vmatprep.mubr.f32.mxu0 %v8827_v28  ;;  %v11775_v28 = vld [vmem:[#allocation35_spill] sm:$0xff] }
 0x276   : > { %3179 = vmatmul.mubr.f32.gmra.mrb[8].mxu1 %v7777_v25  ;;  %v11778_v25 = vld [vmem:[#allocation54_spill] sm:$0xff] }
 0x277   : > { %2614 = vmatmul.mubr.f32.gmra.mrb[66].mxu0 %v9311_v20  ;;  %3183 = vmatprep.mubr.f32.mxu1 %v11772_v15  ;;  %v7779_v20 = vld [vmem:[%s8396_s13 + $0xd0] sm:$0xff] }
 0x278   : > { %2618 = vmatprep.mubr.f32.mxu0 %v8830_v54  ;;  %v11776_v54 = vld [vmem:[#allocation57_spill] sm:$0xff] }
 0x27a   : > { %3184 = vmatmul.mubr.f32.gmra.mrb[10].mxu1 %v7778_v17 }
 0x27b   : > { %2619 = vmatmul.mubr.f32.gmra.mrb[68].mxu0 %v9319_v18  ;;  %v1137_v18 = vrot.slane %v11770_v10, 2  ;;  %3188 = vmatprep.mubr.f32.mxu1 %v11775_v28 }
 0x27c   : > { %2623 = vmatprep.mubr.f32.mxu0 %v11770_v10  ;;  %v11779_v10 = vld [vmem:[#allocation36_spill] sm:$0xff] }
 0x27d   : > { %v9344_v1 = vsel %vm1049_vm1, %v1135_v48, %v1137_v18  ;;  %v1142_v48 = vrot.slane %v11776_v54, 2 }
 0x27e   : > { %11777 = vst [vmem:[#allocation52_spill] sm:$0xff] %v9344_v1  ;;  %3189 = vmatmul.mubr.f32.gmra.mrb[12].mxu1 %v7779_v20  ;;  %v11783_v20 = vld [vmem:[#allocation63_spill] sm:$0xff] }
 0x27f   : > { %2624 = vmatmul.mubr.f32.gmra.mrb[70].mxu0 %v9327_v38  ;;  %v1139_v38 = vrot.slane %v11778_v25, 2  ;;  %3193 = vmatprep.mubr.f32.mxu1 %v11779_v10  ;;  %v11782_v25 = vld [vmem:[#allocation37_spill] sm:$0xff] }
 0x280   : > { %2628 = vmatprep.mubr.f32.mxu0 %v11773_v2 }
 0x281   : > { %v9352_v17 = vsel %vm1049_vm1, %v1137_v18, %v1139_v38  ;;  %v7781_v18 = vld [vmem:[%s8396_s13 + $0xe8] sm:$0xff] }
 0x282   : > { %11781 = vst [vmem:[#allocation34_spill] sm:$0xff] %v9352_v17  ;;  %3194 = vmatmul.mubr.f32.gmra.mrb[14].mxu1 %v7780_v47  ;;  %v11785_v38 = vld [vmem:[#allocation38_spill] sm:$0xff]  ;;  %v9369_v47 = vsel %vm1049_vm1, %v1142_v48, %v1144_v8 }
 0x283   : > { %2629 = vmatmul.mubr.f32.gmra.mrb[72].mxu0 %v9336_v23  ;;  %v1141_v23 = vrot.slane %v11773_v2, 2  ;;  %3198 = vmatprep.mubr.f32.mxu1 %v11782_v25  ;;  %v11786_v2 = vld [vmem:[#allocation64_spill] sm:$0xff]  ;;  %11787 = vst [vmem:[#allocation35_spill] sm:$0xff] %v9369_v47 }
 0x284   : > { %2633 = vmatprep.mubr.f32.mxu0 %v11776_v54  ;;  %v11788_v54 = vld [vmem:[#allocation61_spill] sm:$0xff] }
 0x286   : > { %3199 = vmatmul.mubr.f32.gmra.mrb[16].mxu1 %v7781_v18 }
 0x287   : > { %2634 = vmatmul.mubr.f32.gmra.mrb[74].mxu0 %v9344_v1  ;;  %v9361_v1 = vsel %vm1049_vm1, %v1141_v23, %v1142_v48  ;;  %3203 = vmatprep.mubr.f32.mxu1 %v11785_v38  ;;  %v11789_v23 = vld [vmem:[#allocation39_spill] sm:$0xff]  ;;  %v1149_v48 = vrot.slane %v11786_v2, 2 }
 0x288   : > { %2638 = vmatprep.mubr.f32.mxu0 %v11780_v40  ;;  %11784 = vst [vmem:[#allocation56_spill] sm:$0xff] %v9361_v1  ;;  %v11790_v40 = vld [vmem:[#allocation66_spill] sm:$0xff] }
 0x289   : > { %v1151_v5 = vrot.slane %v11790_v40, 2 }
 0x28a   : > { %3204 = vmatmul.mubr.f32.gmra.mrb[18].mxu1 %v7782_v22  ;;  %v11793_v22 = vld [vmem:[#allocation70_spill] sm:$0xff] }
 0x28b   : > { %2639 = vmatmul.mubr.f32.gmra.mrb[76].mxu0 %v9352_v17  ;;  %v1146_v17 = vrot.slane %v11788_v54, 2  ;;  %3208 = vmatprep.mubr.f32.mxu1 %v11789_v23  ;;  %v11792_v54 = vld [vmem:[#allocation40_spill] sm:$0xff] }
 0x28c   : > { %2643 = vmatprep.mubr.f32.mxu0 %v11783_v20 }
 0x28d   : > { %v9377_v18 = vsel %vm1049_vm1, %v1144_v8, %v1146_v17  ;;  %v7784_v8 = vld [vmem:[%s8396_s13 + $0x108] sm:$0xff] }
 0x28e   : > { %11791 = vst [vmem:[#allocation57_spill] sm:$0xff] %v9377_v18  ;;  %3209 = vmatmul.mubr.f32.gmra.mrb[20].mxu1 %v7783_v13  ;;  %v11795_v17 = vld [vmem:[#allocation41_spill] sm:$0xff]  ;;  %v9394_v13 = vsel %vm1049_vm1, %v1149_v48, %v1151_v5 }
 0x28f   : > { %2644 = vmatmul.mubr.f32.gmra.mrb[78].mxu0 %v9361_v1  ;;  %v1148_v1 = vrot.slane %v11783_v20, 2  ;;  %3213 = vmatprep.mubr.f32.mxu1 %v11792_v54  ;;  %v11796_v20 = vld [vmem:[#allocation71_spill] sm:$0xff]  ;;  %11797 = vst [vmem:[#allocation36_spill] sm:$0xff] %v9394_v13  ;;  %v7792_v54 = vld [vmem:[%s8396_s13 + $0x160] sm:$0xff] }
 0x290   : > { %2648 = vmatprep.mubr.f32.mxu0 %v11786_v2  ;;  %v11798_v2 = vld [vmem:[#allocation68_spill] sm:$0xff] }
 0x292   : > { %3214 = vmatmul.mubr.f32.gmra.mrb[22].mxu1 %v7784_v8 }
 0x293   : > { %2649 = vmatmul.mubr.f32.gmra.mrb[80].mxu0 %v9369_v47  ;;  %v9386_v47 = vsel %vm1049_vm1, %v1148_v1, %v1149_v48  ;;  %3218 = vmatprep.mubr.f32.mxu1 %v11795_v17  ;;  %v11799_v1 = vld [vmem:[#allocation42_spill] sm:$0xff]  ;;  %v1156_v48 = vrot.slane %v11796_v20, 2  ;;  %v7786_v17 = vld [vmem:[%s8396_s13 + $0x120] sm:$0xff] }
 0x294   : > { %2653 = vmatprep.mubr.f32.mxu0 %v11790_v40  ;;  %11794 = vst [vmem:[#allocation54_spill] sm:$0xff] %v9386_v47  ;;  %v11800_v40 = vld [vmem:[#allocation73_spill] sm:$0xff] }
 0x296   : > { %3219 = vmatmul.mubr.f32.gmra.mrb[24].mxu1 %v7785_v11  ;;  %v11803_v11 = vld [vmem:[#allocation77_spill] sm:$0xff] }
 0x297   : > { %2654 = vmatmul.mubr.f32.gmra.mrb[82].mxu0 %v9377_v18  ;;  %v1153_v18 = vrot.slane %v11798_v2, 2  ;;  %3223 = vmatprep.mubr.f32.mxu1 %v11799_v1  ;;  %v11802_v2 = vld [vmem:[#allocation43_spill] sm:$0xff]  ;;  %v1158_v1 = vrot.slane %v11800_v40, 2 }
 0x298   : > { %2658 = vmatprep.mubr.f32.mxu0 %v11793_v22 }
 0x299   : > { %v9402_v8 = vsel %vm1049_vm1, %v1151_v5, %v1153_v18  ;;  %v7787_v5 = vld [vmem:[%s8396_s13 + $0x128] sm:$0xff]  ;;  %v11805_v18 = vld [vmem:[#allocation44_spill] sm:$0xff] }
 0x29a   : > { %11801 = vst [vmem:[#allocation59_spill] sm:$0xff] %v9402_v8  ;;  %3224 = vmatmul.mubr.f32.gmra.mrb[26].mxu1 %v7786_v17  ;;  %v9419_v17 = vsel %vm1049_vm1, %v1156_v48, %v1158_v1 }
 0x29b   : > { %2659 = vmatmul.mubr.f32.gmra.mrb[84].mxu0 %v9386_v47  ;;  %v1155_v47 = vrot.slane %v11793_v22, 2  ;;  %3228 = vmatprep.mubr.f32.mxu1 %v11802_v2  ;;  %v11806_v22 = vld [vmem:[#allocation78_spill] sm:$0xff]  ;;  %11807 = vst [vmem:[#allocation63_spill] sm:$0xff] %v9419_v17 }
 0x29c   : > { %2663 = vmatprep.mubr.f32.mxu0 %v11796_v20  ;;  %v11808_v20 = vld [vmem:[#allocation75_spill] sm:$0xff] }
 0x29d   : > { %v7788_v2 = vld [vmem:[%s8396_s13 + $0x130] sm:$0xff] }
 0x29e   : > { %3229 = vmatmul.mubr.f32.gmra.mrb[28].mxu1 %v7787_v5 }
 0x29f   : > { %2664 = vmatmul.mubr.f32.gmra.mrb[86].mxu0 %v9394_v13  ;;  %v9411_v13 = vsel %vm1049_vm1, %v1155_v47, %v1156_v48  ;;  %3233 = vmatprep.mubr.f32.mxu1 %v11805_v18  ;;  %v11809_v47 = vld [vmem:[#allocation45_spill] sm:$0xff]  ;;  %v1163_v48 = vrot.slane %v11806_v22, 2 }
 0x2a0   : > { %2668 = vmatprep.mubr.f32.mxu0 %v11800_v40  ;;  %11804 = vst [vmem:[#allocation37_spill] sm:$0xff] %v9411_v13  ;;  %v11810_v40 = vld [vmem:[#allocation80_spill] sm:$0xff] }
 0x2a1   : > { %v7789_v18 = vld [vmem:[%s8396_s13 + $0x140] sm:$0xff] }
 0x2a2   : > { %3234 = vmatmul.mubr.f32.gmra.mrb[30].mxu1 %v7788_v2  ;;  %v11813_v2 = vld [vmem:[#allocation84_spill] sm:$0xff] }
 0x2a3   : > { %2669 = vmatmul.mubr.f32.gmra.mrb[88].mxu0 %v9402_v8  ;;  %v1160_v8 = vrot.slane %v11808_v20, 2  ;;  %3238 = vmatprep.mubr.f32.mxu1 %v11809_v47  ;;  %v11812_v20 = vld [vmem:[#allocation46_spill] sm:$0xff]  ;;  %v1165_v47 = vrot.slane %v11810_v40, 2 }
 0x2a4   : > { %2673 = vmatprep.mubr.f32.mxu0 %v11803_v11 }
 0x2a5   : > { %v9427_v5 = vsel %vm1049_vm1, %v1158_v1, %v1160_v8  ;;  %v7790_v1 = vld [vmem:[%s8396_s13 + $0x148] sm:$0xff]  ;;  %v11815_v8 = vld [vmem:[#allocation47_spill] sm:$0xff] }
 0x2a6   : > { %11811 = vst [vmem:[#allocation38_spill] sm:$0xff] %v9427_v5  ;;  %3239 = vmatmul.mubr.f32.gmra.mrb[32].mxu1 %v7789_v18  ;;  %v9444_v18 = vsel %vm1049_vm1, %v1163_v48, %v1165_v47 }
 0x2a7   : > { %2674 = vmatmul.mubr.f32.gmra.mrb[90].mxu0 %v9411_v13  ;;  %v1162_v13 = vrot.slane %v11803_v11, 2  ;;  %3243 = vmatprep.mubr.f32.mxu1 %v11812_v20  ;;  %v11816_v11 = vld [vmem:[#allocation85_spill] sm:$0xff]  ;;  %11817 = vst [vmem:[#allocation61_spill] sm:$0xff] %v9444_v18  ;;  %v7791_v20 = vld [vmem:[%s8396_s13 + $0x150] sm:$0xff] }
 0x2a8   : > { %2678 = vmatprep.mubr.f32.mxu0 %v11806_v22  ;;  %v11818_v22 = vld [vmem:[#allocation82_spill] sm:$0xff] }
 0x2aa   : > { %3244 = vmatmul.mubr.f32.gmra.mrb[34].mxu1 %v7790_v1 }
 0x2ab   : > { %2679 = vmatmul.mubr.f32.gmra.mrb[92].mxu0 %v9419_v17  ;;  %v9436_v17 = vsel %vm1049_vm1, %v1162_v13, %v1163_v48  ;;  %3248 = vmatprep.mubr.f32.mxu1 %v11815_v8  ;;  %v11819_v13 = vld [vmem:[#allocation48_spill] sm:$0xff]  ;;  %v1170_v48 = vrot.slane %v11816_v11, 2 }
 0x2ac   : > { %2683 = vmatprep.mubr.f32.mxu0 %v11810_v40  ;;  %11814 = vst [vmem:[#allocation64_spill] sm:$0xff] %v9436_v17  ;;  %v11820_v40 = vld [vmem:[#allocation87_spill] sm:$0xff]  ;;  %v9457_v8 = vld [vmem:[%s8396_s13 + $0x240] sm:$0xff] }
 0x2ae   : > { %3249 = vmatmul.mubr.f32.gmra.mrb[36].mxu1 %v7791_v20 }
 0x2af   : > { %2684 = vmatmul.mubr.f32.gmra.mrb[94].mxu0 %v9427_v5  ;;  %v1167_v5 = vrot.slane %v11818_v22, 2  ;;  %3253 = vmatprep.mubr.f32.mxu1 %v11819_v13  ;;  %v9479_v13 = vld [vmem:[%s8396_s13 + $0x250] sm:$0xff] }
 0x2b0   : > { %2688 = vmatprep.mubr.f32.mxu0 %v11813_v2 }
 0x2b1   : > { %v9452_v1 = vsel %vm1049_vm1, %v1165_v47, %v1167_v5  ;;  %v1172_v5 = vrot.slane %v11820_v40, 2 }
 0x2b2   : > { %11821 = vst [vmem:[#allocation39_spill] sm:$0xff] %v9452_v1  ;;  %3254 = vmatmul.mubr.f32.gmra.mrb[38].mxu1 %v7792_v54 }
 0x2b3   : > { %2689 = vmatmul.mubr.f32.gmra.mrb[96].mxu0 %v9436_v17  ;;  %v1169_v17 = vrot.slane %v11813_v2, 2  ;;  %v9468_v2 = vld [vmem:[%s8396_s13 + $0x248] sm:$0xff] }
 0x2b4   : > { %2693 = vmatprep.mubr.f32.mxu0 %v11816_v11 }
 0x2b5   : > { %v9464_v47 = vsel %vm1049_vm1, %v1169_v17, %v1170_v48  ;;  %v11826_v17 = vld [vmem:[#allocation89_spill] sm:$0xff] }
 0x2b6   : > { %11823 = vst [vmem:[#allocation66_spill] sm:$0xff] %v9464_v47 }
 0x2b7   : > { %2694 = vmatmul.mubr.f32.gmra.mrb[98].mxu0 %v9444_v18  ;;  %v11822_v18 = vld [vmem:[#allocation50_spill] sm:$0xff] }
 0x2b8   : > { %2698 = vmatprep.mubr.f32.mxu0 %v11820_v40  ;;  %3258 = vmatprep.mubr.f32.mxu1 %v11822_v18  ;;  %v1174_v18 = vrot.slane %v11826_v17, 2 }
 0x2ba   : > { %v2370_v22 = vpop.f32.mrb[102].mxu0 }
 0x2bb   : > { %v2372_v20 = vpop.f32.mrb[103].mxu0  ;;  %2699 = vmatmul.mubr.f32.gmra.mrb[100].mxu0 %v9452_v1  ;;  %v7793_v22 = vld [vmem:[%s8396_s13 + $0x168] sm:$0xff]  ;;  %v9475_v1 = vsel %vm1049_vm1, %v1170_v48, %v1172_v5 }
 0x2bc   : > { %2703 = vmatprep.mubr.f32.mxu0 %v9457_v8  ;;  %3259 = vmatmul.mubr.f32.gmra.mrb[40].mxu1 %v7793_v22  ;;  %v11824_v20 = vld [vmem:[#allocation51_spill] sm:$0xff]  ;;  %11825 = vst [vmem:[#allocation70_spill] sm:$0xff] %v9475_v1 }
 0x2bd   : > { %3263 = vmatprep.mubr.f32.mxu1 %v11824_v20  ;;  %v7795_v20 = vld [vmem:[%s8396_s13 + $0x180] sm:$0xff] }
 0x2be   : > { %v2375_v11 = vpop.f32.mrb[104].mxu0 }
 0x2bf   : > { %v2377_v54 = vpop.f32.mrb[105].mxu0  ;;  %2704 = vmatmul.mubr.f32.gmra.mrb[114].mxu0 %v9464_v47  ;;  %v7794_v11 = vld [vmem:[%s8396_s13 + $0x170] sm:$0xff]  ;;  %v9486_v47 = vsel %vm1049_vm1, %v1172_v5, %v1174_v18 }
 0x2c0   : > { %2708 = vmatprep.mubr.f32.mxu0 %v9468_v2  ;;  %3264 = vmatmul.mubr.f32.gmra.mrb[42].mxu1 %v7794_v11  ;;  %v11827_v54 = vld [vmem:[#allocation53_spill] sm:$0xff]  ;;  %v11830_v18 = vld [vmem:[#allocation58_spill] sm:$0xff] }
 0x2c1   : > { %3268 = vmatprep.mubr.f32.mxu1 %v11827_v54  ;;  %v11829_v54 = vld [vmem:[#allocation22_spill] sm:$0xff] }
 0x2c2   : > { %v2380_v40 = vpop.f32.mrb[106].mxu0 }
 0x2c3   : > { %v2382_v22 = vpop.f32.mrb[107].mxu0  ;;  %2709 = vmatmul.mubr.f32.gmra.mrb[116].mxu0 %v9475_v1  ;;  %v11828_v40 = vld [vmem:[#allocation55_spill] sm:$0xff] }
 0x2c4   : > { %2713 = vmatprep.mubr.f32.mxu0 %v9479_v13  ;;  %3269 = vmatmul.mubr.f32.gmra.mrb[44].mxu1 %v7795_v20  ;;  %v7796_v22 = vld [vmem:[%s8396_s13 + $0x188] sm:$0xff]  ;;  %v7797_v20 = vld [vmem:[%s8396_s13 + $0x190] sm:$0xff] }
 0x2c5   : > { %3273 = vmatprep.mubr.f32.mxu1 %v11828_v40 }
 0x2c6   : > { %v2450_v48 = vpop.f32.mrb[108].mxu0 }
 0x2c7   : > { %v2452_v17 = vpop.f32.mrb[109].mxu0  ;;  %2714 = vmatmul.mubr.f32.gmra.mrb[118].mxu0 %v9486_v47  ;;  %v11831_v48 = vld [vmem:[#allocation23_spill] sm:$0xff] }
 0x2c8   : > { %2783 = vmatprep.mubr.f32.mxu0 %v9036_v21  ;;  %3274 = vmatmul.mubr.f32.gmra.mrb[46].mxu1 %v7796_v22  ;;  %v11832_v17 = vld [vmem:[#allocation60_spill] sm:$0xff]  ;;  %v11837_v22 = vld [vmem:[#allocation26_spill] sm:$0xff] }
 0x2c9   : > { %3278 = vmatprep.mubr.f32.mxu1 %v11830_v18 }
 0x2ca   : > { %v2455_v11 = vpop.f32.mrb[110].mxu0 }
 0x2cb   : > { %v2457_v1 = vpop.f32.mrb[111].mxu0  ;;  %2784 = vmatmul.mubr.f32.vlgmr.msra.gmra.mrb[120].mxu0 %v11829_v54  ;;  %v7799_v54 = vld [vmem:[%s8396_s13 + $0x1a8] sm:$0xff]  ;;  %v7800_v11 = vld [vmem:[%s8396_s13 + $0x1b0] sm:$0xff] }
 0x2cc   : > { %6818 = vmatpush1.bf16.msra.mxu0 %v9130_v32  ;;  %2788 = vmatprep.mubr.f32.mxu0 %v9043_v27  ;;  %v7798_v32 = vld [vmem:[%s8396_s13 + $0x1a0] sm:$0xff]  ;;  %v11834_v1 = vld [vmem:[#allocation62_spill] sm:$0xff] }
 0x2cd   : > { %6819 = vmatprep.subr.bf16.mxu0 %v11752_v29  ;;  %3279 = vmatmul.mubr.f32.gmra.mrb[48].mxu1 %v7797_v20  ;;  %v11833_v27 = vld [vmem:[#allocation24_spill] sm:$0xff]  ;;  %v11839_v20 = vld [vmem:[#allocation27_spill] sm:$0xff] }
 0x2ce   : > { %v2460_v5 = vpop.f32.mrb[112].mxu0  ;;  %3283 = vmatprep.mubr.f32.mxu1 %v11832_v17 }
 0x2cf   : > { %v2462_v21 = vpop.f32.mrb[113].mxu0  ;;  %2789 = vmatmul.mubr.f32.gmra.mrb[122].mxu0 %v11831_v48  ;;  %v7801_v5 = vld [vmem:[%s8396_s13 + $0x1c0] sm:$0xff] }
 0x2d0   : > { %2793 = vmatprep.mubr.f32.mxu0 %v9050_v12  ;;  %6821 = vmatpush1.bf16.msra.mxu0 %v9140_v7  ;;  %v11835_v12 = vld [vmem:[#allocation25_spill] sm:$0xff]  ;;  %v11841_v48 = vld [vmem:[#allocation28_spill] sm:$0xff] }
 0x2d1   : > { %6822 = vmatprep.subr.bf16.mxu0 %v11752_v29  ;;  %3284 = vmatmul.mubr.f32.gmra.mrb[50].mxu1 %v7798_v32  ;;  %v11836_v7 = vld [vmem:[#allocation65_spill] sm:$0xff]  ;;  %v7803_v32 = vld [vmem:[%s8396_s13 + $0x1d0] sm:$0xff] }
 0x2d2   : > { %3288 = vmatprep.mubr.f32.mxu1 %v11834_v1  ;;  %v7802_v21 = vld [vmem:[%s8396_s13 + $0x1c8] sm:$0xff] }
 0x2d3   : > { %2794 = vmatmul.mubr.f32.gmra.mrb[124].mxu0 %v11833_v27  ;;  %v11843_v27 = vld [vmem:[#allocation29_spill] sm:$0xff] }
 0x2d4   : > { %2798 = vmatprep.mubr.f32.mxu0 %v9058_v34  ;;  %6824 = vmatpush1.bf16.msra.mxu0 %v9151_v16  ;;  %v11838_v16 = vld [vmem:[#allocation67_spill] sm:$0xff] }
 0x2d5   : > { %6825 = vmatprep.subr.bf16.mxu0 %v11752_v29  ;;  %3289 = vmatmul.mubr.f32.gmra.mrb[52].mxu1 %v7799_v54  ;;  %v7804_v54 = vld [vmem:[%s8396_s13 + $0x1e0] sm:$0xff] }
 0x2d6   : > { %3293 = vmatprep.mubr.f32.mxu1 %v11836_v7 }
 0x2d7   : > { %2799 = vmatmul.mubr.f32.gmra.mrb[6].mxu0 %v11835_v12 }
 0x2d8   : > { %2803 = vmatprep.mubr.f32.mxu0 %v9065_v63  ;;  %6827 = vmatpush1.bf16.msra.mxu0 %v9162_v59  ;;  %v11840_v59 = vld [vmem:[#allocation69_spill] sm:$0xff] }
 0x2d9   : > { %6828 = vmatprep.subr.bf16.mxu0 %v11752_v29  ;;  %3294 = vmatmul.mubr.f32.gmra.mrb[54].mxu1 %v7800_v11  ;;  %v11845_v11 = vld [vmem:[#allocation30_spill] sm:$0xff] }
 0x2da   : > { %3298 = vmatprep.mubr.f32.mxu1 %v11838_v16 }
 0x2db   : > { %2804 = vmatmul.mubr.f32.gmra.mrb[8].mxu0 %v11837_v22 }
 0x2dc   : > { %2808 = vmatprep.mubr.f32.mxu0 %v9072_v6  ;;  %6830 = vmatpush1.bf16.msra.mxu0 %v9172_v9  ;;  %v11842_v9 = vld [vmem:[#allocation72_spill] sm:$0xff] }
 0x2dd   : > { %6831 = vmatprep.subr.bf16.mxu0 %v11752_v29  ;;  %3299 = vmatmul.mubr.f32.gmra.mrb[56].mxu1 %v7801_v5  ;;  %v7805_v5 = vld [vmem:[%s8396_s13 + $0x1e8] sm:$0xff] }
 0x2de   : > { %3303 = vmatprep.mubr.f32.mxu1 %v11840_v59 }
 0x2df   : > { %2809 = vmatmul.mubr.f32.gmra.mrb[10].mxu0 %v11839_v20 }
 0x2e0   : > { %2813 = vmatprep.mubr.f32.mxu0 %v9080_v42  ;;  %6833 = vmatpush1.bf16.msra.mxu0 %v9183_v45  ;;  %v11844_v45 = vld [vmem:[#allocation74_spill] sm:$0xff] }
 0x2e1   : > { %6834 = vmatprep.subr.bf16.mxu0 %v11752_v29  ;;  %3304 = vmatmul.mubr.f32.gmra.mrb[58].mxu1 %v7802_v21  ;;  %v11847_v21 = vld [vmem:[#allocation31_spill] sm:$0xff] }
 0x2e2   : > { %3308 = vmatprep.mubr.f32.mxu1 %v11842_v9 }
 0x2e3   : > { %2814 = vmatmul.mubr.f32.gmra.mrb[12].mxu0 %v11841_v48 }
 0x2e4   : > { %2818 = vmatprep.mubr.f32.mxu0 %v9087_v56  ;;  %6836 = vmatpush1.bf16.msra.mxu0 %v9193_v26  ;;  %v11846_v26 = vld [vmem:[#allocation76_spill] sm:$0xff] }
 0x2e5   : > { %6837 = vmatprep.subr.bf16.mxu0 %v11752_v29  ;;  %3309 = vmatmul.mubr.f32.gmra.mrb[60].mxu1 %v7803_v32  ;;  %v7806_v32 = vld [vmem:[%s8396_s13 + $0x1f0] sm:$0xff] }
 0x2e6   : > { %3313 = vmatprep.mubr.f32.mxu1 %v11844_v45 }
 0x2e7   : > { %2819 = vmatmul.mubr.f32.gmra.mrb[14].mxu0 %v11843_v27 }
 0x2e8   : > { %2823 = vmatprep.mubr.f32.mxu0 %v9097_v30  ;;  %6839 = vmatpush1.bf16.msra.mxu0 %v9204_v36  ;;  %v11848_v36 = vld [vmem:[#allocation79_spill] sm:$0xff] }
 0x2e9   : > { %6840 = vmatprep.subr.bf16.mxu0 %v11752_v29  ;;  %3314 = vmatmul.mubr.f32.gmra.mrb[62].mxu1 %v7804_v54  ;;  %v11849_v54 = vld [vmem:[#allocation32_spill] sm:$0xff] }
 0x2ea   : > { %3318 = vmatprep.mubr.f32.mxu1 %v11846_v26 }
 0x2eb   : > { %2824 = vmatmul.mubr.f32.gmra.mrb[16].mxu0 %v11845_v11 }
 0x2ec   : > { %2828 = vmatprep.mubr.f32.mxu0 %v9105_v37  ;;  %6842 = vmatpush1.bf16.msra.mxu0 %v9215_v50  ;;  %v11850_v50 = vld [vmem:[#allocation81_spill] sm:$0xff] }
 0x2ed   : > { %6843 = vmatprep.subr.bf16.mxu0 %v11752_v29  ;;  %3319 = vmatmul.mubr.f32.gmra.mrb[64].mxu1 %v7805_v5  ;;  %v7807_v5 = vld [vmem:[%s8396_s13 + $0x200] sm:$0xff] }
 0x2ee   : > { %3323 = vmatprep.mubr.f32.mxu1 %v11848_v36 }
 0x2ef   : > { %2829 = vmatmul.mubr.f32.gmra.mrb[18].mxu0 %v11847_v21 }
 0x2f0   : > { %2833 = vmatprep.mubr.f32.mxu0 %v9112_v61  ;;  %6845 = vmatpush1.bf16.msra.mxu0 %v9225_v3  ;;  %v11851_v61 = vld [vmem:[#allocation21_spill] sm:$0xff]  ;;  %v11852_v3 = vld [vmem:[#allocation83_spill] sm:$0xff] }
 0x2f1   : > { %6846 = vmatprep.subr.bf16.mxu0 %v11752_v29  ;;  %3324 = vmatmul.mubr.f32.gmra.mrb[66].mxu1 %v7806_v32  ;;  %v7808_v32 = vld [vmem:[%s8396_s13 + $0x208] sm:$0xff] }
 0x2f2   : > { %3328 = vmatprep.mubr.f32.mxu1 %v11850_v50 }
 0x2f3   : > { %2834 = vmatmul.mubr.f32.gmra.mrb[20].mxu0 %v11849_v54 }
 0x2f4   : > { %2838 = vmatprep.mubr.f32.mxu0 %v9119_v51  ;;  %6848 = vmatpush1.bf16.msra.mxu0 %v9235_v33  ;;  %v11853_v33 = vld [vmem:[#allocation86_spill] sm:$0xff] }
 0x2f5   : > { %6849 = vmatprep.subr.bf16.mxu0 %v11752_v29  ;;  %3329 = vmatmul.mubr.f32.gmra.mrb[68].mxu1 %v7807_v5  ;;  %v918_v5 = vrot.slane %v9468_v2, 1 }
 0x2f6   : > { %3333 = vmatprep.mubr.f32.mxu1 %v11852_v3 }
 0x2f7   : > { %2839 = vmatmul.mubr.f32.gmra.mrb[22].mxu0 %v11851_v61  ;;  %v7809_v61 = vld [vmem:[%s8396_s13 + $0x210] sm:$0xff] }
 0x2f8   : > { %2843 = vmatprep.mubr.f32.mxu0 %v9127_v60  ;;  %6851 = vmatpush1.bf16.msra.mxu0 %v9246_v44  ;;  %v11854_v44 = vld [vmem:[#allocation88_spill] sm:$0xff] }
 0x2f9   : > { %6852 = vmatprep.subr.bf16.mxu0 %v11752_v29  ;;  %3334 = vmatmul.mubr.f32.gmra.mrb[70].mxu1 %v7808_v32  ;;  %v7812_v32 = vld [vmem:[%s8396_s13 + $0x230] sm:$0xff] }
 0x2fa   : > { %3338 = vmatprep.mubr.f32.mxu1 %v11853_v33 }
 0x2fb   : > { %2844 = vmatmul.mubr.f32.gmra.mrb[24].mxu0 %v8618_v49  ;;  %v7810_v49 = vld [vmem:[%s8396_s13 + $0x220] sm:$0xff] }
 0x2fc   : > { %2848 = vmatprep.mubr.f32.mxu0 %v9137_v4  ;;  %6854 = vmatpush1.bf16.msra.mxu0 %v9256_v0  ;;  %v11855_v0 = vld [vmem:[#allocation90_spill] sm:$0xff] }
 0x2fd   : > { %6855 = vmatprep.subr.bf16.mxu0 %v11752_v29  ;;  %3339 = vmatmul.mubr.f32.gmra.mrb[72].mxu1 %v7809_v61 }
 0x2fe   : > { %3343 = vmatprep.mubr.f32.mxu1 %v11854_v44 }
 0x2ff   : > { %2849 = vmatmul.mubr.f32.gmra.mrb[26].mxu0 %v8628_v55  ;;  %v7811_v55 = vld [vmem:[%s8396_s13 + $0x228] sm:$0xff] }
 0x300   : > { %2853 = vmatprep.mubr.f32.mxu0 %v9146_v46  ;;  %6857 = vmatpush1.bf16.msra.mxu0 %v9266_v31  ;;  %v11856_v31 = vld [vmem:[#allocation91_spill] sm:$0xff] }
 0x301   : > { %6858 = vmatprep.subr.bf16.mxu0 %v11752_v29  ;;  %3344 = vmatmul.mubr.f32.gmra.mrb[74].mxu1 %v7810_v49 }
 0x302   : > { %3348 = vmatprep.mubr.f32.mxu1 %v11855_v0 }
 0x303   : > { %2854 = vmatmul.mubr.f32.gmra.mrb[28].mxu0 %v8640_v24  ;;  %v917_v24 = vrot.slane %v9457_v8, 1 }
 0x304   : > { %2858 = vmatprep.mubr.f32.mxu0 %v9158_v58  ;;  %6860 = vmatpush1.bf16.msra.mxu0 %v9277_v19 }
 0x305   : > { %6861 = vmatprep.subr.bf16.mxu0 %v11752_v29  ;;  %3349 = vmatmul.mubr.f32.gmra.mrb[76].mxu1 %v7811_v55  ;;  %v9592_v19 = vsel %vm678_vm0, %v917_v24, %v918_v5  ;;  %v11857_v24 = vld [vmem:[#allocation40_spill] sm:$0xff] }
 0x306   : > { %3353 = vmatprep.mubr.f32.mxu1 %v11856_v31 }
 0x307   : > { %2859 = vmatmul.mubr.f32.gmra.mrb[30].mxu0 %v11769_v43  ;;  %v920_v43 = vrot.slane %v9479_v13, 1 }
 0x308   : > { %2863 = vmatprep.mubr.f32.mxu0 %v9168_v14  ;;  %6863 = vmatpush1.bf16.msra.mxu0 %v9287_v62 }
 0x309   : > { %3354 = vmatmul.mubr.f32.gmra.mrb[78].mxu1 %v7812_v32  ;;  %v9600_v62 = vsel %vm678_vm0, %v918_v5, %v920_v43  ;;  %v11858_v5 = vld [vmem:[#allocation98_spill] sm:$0xff]  ;;  %v11860_v32 = vld [vmem:[#allocation99_spill] sm:$0xff] }
 0x30a   : > { %3358 = vmatprep.mubr.f32.mxu1 %v9592_v19 }
 0x30b   : > { %2864 = vmatmul.mubr.f32.gmra.mrb[32].mxu0 %v11772_v15  ;;  %v9605_v15 = vld [vmem:[%s8396_s13 + $0x258] sm:$0x3] }
 0x30c   : > { %2868 = vmatprep.mubr.f32.mxu0 %v9178_v39  ;;  %v922_v61 = vrot.slane %v9605_v15, 1 }
 0x30d   : > { %3359 = vmatmul.mubr.f32.gmra.mrb[80].mxu1 %v9457_v8 }
 0x30e   : > { %3363 = vmatprep.mubr.f32.mxu1 %v9600_v62  ;;  %v9611_v49 = vsel %vm678_vm0, %v920_v43, %v922_v61  ;;  %v11862_v43 = vld [vmem:[#allocation100_spill] sm:$0xff]  ;;  %v11864_v61 = vld [vmem:[#allocation101_spill] sm:$0xff] }
 0x30f   : > { %2869 = vmatmul.mubr.f32.gmra.mrb[34].mxu0 %v11775_v28  ;;  %v2026_v28 = vld [vmem:[#allocation8 + $0x400] sm:$0xff] }
 0x310   : > { %2873 = vmatprep.mubr.f32.mxu0 %v9189_v52 }
 0x311   : > { %3364 = vmatmul.mubr.f32.gmra.mrb[82].mxu1 %v9468_v2 }
 0x312   : > { %3368 = vmatprep.mubr.f32.mxu1 %v9611_v49 }
 0x313   : > { %2874 = vmatmul.mubr.f32.gmra.mrb[36].mxu0 %v11779_v10  ;;  %v2027_v10 = vld [vmem:[#allocation8 + $0x408] sm:$0xff] }
 0x314   : > { %2878 = vmatprep.mubr.f32.mxu0 %v9200_v35  ;;  %v9622_v55 = vpack.c.bf16 %v2027_v10, %v2026_v28  ;;  %v11865_v28 = vld [vmem:[#allocation44_spill] sm:$0xff]  ;;  %v11866_v10 = vld [vmem:[#allocation102_spill] sm:$0xff] }
 0x315   : > { %3369 = vmatmul.mubr.f32.gmra.mrb[84].mxu1 %v9479_v13 }
 0x316   : > { %6865 = vmatprep.subr.bf16.mxu0 %v9622_v55 }
 0x317   : > { %2879 = vmatmul.mubr.f32.gmra.mrb[38].mxu0 %v11782_v25  ;;  %v11859_v25 = vld [vmem:[#allocation41_spill] sm:$0xff] }
 0x318   : > { %2883 = vmatprep.mubr.f32.mxu0 %v9210_v41 }
 0x31b   : > { %2884 = vmatmul.mubr.f32.gmra.mrb[40].mxu0 %v11785_v38  ;;  %v11861_v38 = vld [vmem:[#allocation42_spill] sm:$0xff] }
 0x31c   : > { %2888 = vmatprep.mubr.f32.mxu0 %v9221_v53  ;;  %v11875_v53 = vld [vmem:[#allocation50_spill] sm:$0xff] }
 0x31f   : > { %2889 = vmatmul.mubr.f32.gmra.mrb[42].mxu0 %v11789_v23  ;;  %v11863_v23 = vld [vmem:[#allocation43_spill] sm:$0xff] }
 0x320   : > { %2893 = vmatprep.mubr.f32.mxu0 %v9231_v57  ;;  %v11868_v57 = vld [vmem:[#allocation103_spill] sm:$0xff] }
 0x323   : > { %2894 = vmatmul.mubr.f32.gmra.mrb[44].mxu0 %v11857_v24  ;;  %v11867_v24 = vld [vmem:[#allocation45_spill] sm:$0xff] }
 0x324   : > { %2898 = vmatprep.mubr.f32.mxu0 %v11858_v5  ;;  %v11869_v5 = vld [vmem:[#allocation46_spill] sm:$0xff] }
 0x327   : > { %2899 = vmatmul.mubr.f32.gmra.mrb[46].mxu0 %v11859_v25  ;;  %v11870_v25 = vld [vmem:[#allocation104_spill] sm:$0xff] }
 0x328   : > { %2903 = vmatprep.mubr.f32.mxu0 %v11860_v32  ;;  %v11871_v32 = vld [vmem:[#allocation47_spill] sm:$0xff] }
 0x32b   : > { %2904 = vmatmul.mubr.f32.gmra.mrb[48].mxu0 %v11861_v38  ;;  %v11872_v38 = vld [vmem:[#allocation105_spill] sm:$0xff] }
 0x32c   : > { %2908 = vmatprep.mubr.f32.mxu0 %v11862_v43 }
 0x32f   : > { %2909 = vmatmul.mubr.f32.gmra.mrb[50].mxu0 %v11863_v23 }
 0x330   : > { %2913 = vmatprep.mubr.f32.mxu0 %v11864_v61  ;;  %v11873_v61 = vld [vmem:[#allocation48_spill] sm:$0xff] }
 0x333   : > { %2914 = vmatmul.mubr.f32.gmra.mrb[52].mxu0 %v11865_v28  ;;  %v11874_v28 = vld [vmem:[#allocation106_spill] sm:$0xff] }
 0x334   : > { %2918 = vmatprep.mubr.f32.mxu0 %v11866_v10 }
 0x337   : > { %2919 = vmatmul.mubr.f32.gmra.mrb[54].mxu0 %v11867_v24 }
 0x338   : > { %2923 = vmatprep.mubr.f32.mxu0 %v11868_v57  ;;  %v11876_v57 = vld [vmem:[#allocation49_spill] sm:$0xff] }
 0x339   : > { %v9641_v43 = vpop.f32.mrb[0].mxu1 }
 0x33a   : > { %v3162_v23 = vpop.f32.mrb[1].mxu1 }
 0x33b   : > { %2924 = vmatmul.mubr.f32.gmra.mrb[56].mxu0 %v11869_v5 }
 0x33c   : > { %2928 = vmatprep.mubr.f32.mxu0 %v11870_v25 }
 0x33d   : > { %v9645_v10 = vpop.f32.mrb[2].mxu1 }
 0x33e   : > { %v3167_v24 = vpop.f32.mrb[3].mxu1 }
 0x33f   : > { %2929 = vmatmul.mubr.f32.gmra.mrb[58].mxu0 %v11871_v32  ;;  %v11877_v32 = vld [vmem:[#allocation51_spill] sm:$0xff] }
 0x340   : > { %2933 = vmatprep.mubr.f32.mxu0 %v11872_v38  ;;  %v11878_v38 = vld [vmem:[#allocation33_spill] sm:$0xff] }
 0x341   : > { %v9649_v5 = vpop.f32.mrb[4].mxu1 }
 0x342   : > { %v3172_v25 = vpop.f32.mrb[5].mxu1 }
 0x343   : > { %2934 = vmatmul.mubr.f32.gmra.mrb[60].mxu0 %v11873_v61  ;;  %v11879_v61 = vld [vmem:[#allocation53_spill] sm:$0xff] }
 0x344   : > { %2938 = vmatprep.mubr.f32.mxu0 %v11874_v28  ;;  %v11880_v28 = vld [vmem:[#allocation52_spill] sm:$0xff] }
 0x345   : > { %v9653_v41 = vpop.f32.mrb[6].mxu1 }
 0x346   : > { %v3177_v23 = vpop.f32.mrb[7].mxu1 }
 0x347   : > { %2939 = vmatmul.mubr.f32.gmra.mrb[62].mxu0 %v11875_v53  ;;  %v11881_v53 = vld [vmem:[#allocation34_spill] sm:$0xff] }
 0x348   : > { %2943 = vmatprep.mubr.f32.mxu0 %v11876_v57 }
 0x349   : > { %v9657_v35 = vpop.f32.mrb[8].mxu1 }
 0x34a   : > { %v3182_v24 = vpop.f32.mrb[9].mxu1 }
 0x34b   : > { %2944 = vmatmul.mubr.f32.gmra.mrb[64].mxu0 %v11877_v32  ;;  %v11882_v32 = vld [vmem:[#allocation56_spill] sm:$0xff] }
 0x34c   : > { %2948 = vmatprep.mubr.f32.mxu0 %v11878_v38 }
 0x34d   : > { %v9661_v57 = vpop.f32.mrb[10].mxu1 }
 0x34e   : > { %v3187_v25 = vpop.f32.mrb[11].mxu1 }
 0x34f   : > { %2949 = vmatmul.mubr.f32.gmra.mrb[66].mxu0 %v11879_v61  ;;  %v11883_v61 = vld [vmem:[#allocation35_spill] sm:$0xff] }
 0x350   : > { %2953 = vmatprep.mubr.f32.mxu0 %v11880_v28 }
 0x351   : > { %v9665_v38 = vpop.f32.mrb[12].mxu1 }
 0x352   : > { %v3192_v23 = vpop.f32.mrb[13].mxu1 }
 0x353   : > { %2954 = vmatmul.mubr.f32.gmra.mrb[68].mxu0 %v11828_v40  ;;  %v11884_v40 = vld [vmem:[#allocation57_spill] sm:$0xff] }
 0x354   : > { %2958 = vmatprep.mubr.f32.mxu0 %v11881_v53 }
 0x355   : > { %v9669_v28 = vpop.f32.mrb[14].mxu1 }
 0x356   : > { %v3197_v24 = vpop.f32.mrb[15].mxu1 }
 0x357   : > { %2959 = vmatmul.mubr.f32.gmra.mrb[70].mxu0 %v11830_v18  ;;  %v11885_v18 = vld [vmem:[#allocation54_spill] sm:$0xff]  ;;  %v4736_v24 = vld [vmem:[#allocation11] sm:$0xff] }
 0x358   : > { %2963 = vmatprep.mubr.f32.mxu0 %v11882_v32 }
 0x359   : > { %v9673_v53 = vpop.f32.mrb[16].mxu1 }
 0x35a   : > { %v3202_v25 = vpop.f32.mrb[17].mxu1 }
 0x35b   : > { %2964 = vmatmul.mubr.f32.gmra.mrb[72].mxu0 %v11832_v17  ;;  %v11886_v17 = vld [vmem:[#allocation36_spill] sm:$0xff]  ;;  %v11887_v25 = vld [vmem:[#allocation59_spill] sm:$0xff] }
 0x35c   : > { %2968 = vmatprep.mubr.f32.mxu0 %v11883_v61 }
 0x35d   : > { %v9677_v32 = vpop.f32.mrb[18].mxu1 }
 0x35e   : > { %v3207_v23 = vpop.f32.mrb[19].mxu1 }
 0x35f   : > { %2969 = vmatmul.mubr.f32.gmra.mrb[74].mxu0 %v11834_v1  ;;  %v4737_v1 = vld [vmem:[#allocation11 + $0x8] sm:$0xff] }
 0x360   : > { %2973 = vmatprep.mubr.f32.mxu0 %v11884_v40  ;;  %v6897_v52 = vpack.c.bf16 %v4737_v1, %v4736_v24  ;;  %v4738_v24 = vld [vmem:[#allocation11 + $0x10] sm:$0xff] }
 0x361   : > { %v9681_v61 = vpop.f32.mrb[20].mxu1 }
 0x362   : > { %v3212_v40 = vpop.f32.mrb[21].mxu1  ;;  %6898 = vmatpush1.bf16.msra.mxu1 %v6897_v52  ;;  %v4739_v52 = vld [vmem:[#allocation11 + $0x18] sm:$0xff] }
 0x363   : > { %2974 = vmatmul.mubr.f32.gmra.mrb[76].mxu0 %v11836_v7  ;;  %6899 = vmatprep.subr.bf16.mxu1 %v11752_v29  ;;  %v11889_v40 = vld [vmem:[#allocation63_spill] sm:$0xff]  ;;  %v6900_v1 = vpack.c.bf16 %v4739_v52, %v4738_v24  ;;  %v4740_v24 = vld [vmem:[#allocation11 + $0x20] sm:$0xff]  ;;  %v4741_v52 = vld [vmem:[#allocation11 + $0x28] sm:$0xff] }
 0x364   : > { %2978 = vmatprep.mubr.f32.mxu0 %v11885_v18 }
 0x365   : > { %v9685_v7 = vpop.f32.mrb[22].mxu1 }
 0x366   : > { %v3217_v23 = vpop.f32.mrb[23].mxu1  ;;  %6901 = vmatpush1.bf16.msra.mxu1 %v6900_v1  ;;  %v6903_v1 = vpack.c.bf16 %v4741_v52, %v4740_v24  ;;  %v1285_v24 = vrot.slane %v9468_v2, 2 }
 0x367   : > { %2979 = vmatmul.mubr.f32.gmra.mrb[78].mxu0 %v11838_v16  ;;  %v11888_v16 = vld [vmem:[#allocation37_spill] sm:$0xff]  ;;  %v11890_v23 = vld [vmem:[#allocation38_spill] sm:$0xff]  ;;  %6902 = vmatprep.subr.bf16.mxu1 %v11752_v29 }
 0x368   : > { %2983 = vmatprep.mubr.f32.mxu0 %v11886_v17 }
 0x369   : > { %v9690_v17 = vpop.f32.mrb[24].mxu1 }
 0x36a   : > { %v3222_v18 = vpop.f32.mrb[25].mxu1  ;;  %6904 = vmatpush1.bf16.msra.mxu1 %v6903_v1  ;;  %v4742_v1 = vld [vmem:[#allocation11 + $0x30] sm:$0xff] }
 0x36b   : > { %2984 = vmatmul.mubr.f32.gmra.mrb[80].mxu0 %v11840_v59  ;;  %6905 = vmatprep.subr.bf16.mxu1 %v11752_v29 }
 0x36c   : > { %2988 = vmatprep.mubr.f32.mxu0 %v11887_v25 }
 0x36d   : > { %v9694_v59 = vpop.f32.mrb[26].mxu1 }
 0x36e   : > { %v3227_v25 = vpop.f32.mrb[27].mxu1 }
 0x36f   : > { %2989 = vmatmul.mubr.f32.gmra.mrb[82].mxu0 %v11842_v9  ;;  %v11892_v25 = vld [vmem:[#allocation61_spill] sm:$0xff] }
 0x370   : > { %2993 = vmatprep.mubr.f32.mxu0 %v11888_v16 }
 0x371   : > { %v9698_v9 = vpop.f32.mrb[28].mxu1 }
 0x372   : > { %v3232_v18 = vpop.f32.mrb[29].mxu1 }
 0x373   : > { %2994 = vmatmul.mubr.f32.gmra.mrb[84].mxu0 %v11844_v45  ;;  %v11891_v45 = vld [vmem:[#allocation64_spill] sm:$0xff]  ;;  %v11893_v18 = vld [vmem:[#allocation39_spill] sm:$0xff] }
 0x374   : > { %2998 = vmatprep.mubr.f32.mxu0 %v11889_v40 }
 0x375   : > { %v9703_v40 = vpop.f32.mrb[30].mxu1 }
 0x376   : > { %v3237_v16 = vpop.f32.mrb[31].mxu1 }
 0x377   : > { %2999 = vmatmul.mubr.f32.gmra.mrb[86].mxu0 %v11846_v26 }
 0x378   : > { %3003 = vmatprep.mubr.f32.mxu0 %v11890_v23 }
 0x379   : > { %v9707_v26 = vpop.f32.mrb[32].mxu1 }
 0x37a   : > { %v3242_v23 = vpop.f32.mrb[33].mxu1 }
 0x37b   : > { %3004 = vmatmul.mubr.f32.gmra.mrb[88].mxu0 %v11848_v36  ;;  %v11896_v23 = vld [vmem:[#allocation70_spill] sm:$0xff] }
 0x37c   : > { %3008 = vmatprep.mubr.f32.mxu0 %v11891_v45 }
 0x37d   : > { %v9711_v36 = vpop.f32.mrb[34].mxu1 }
 0x37e   : > { %11894 = vst [vmem:[#allocation71_spill] sm:$0xff] %v9711_v36  ;;  %v3247_v16 = vpop.f32.mrb[35].mxu1 }
 0x37f   : > { %3009 = vmatmul.mubr.f32.gmra.mrb[90].mxu0 %v11850_v50  ;;  %v11895_v50 = vld [vmem:[#allocation66_spill] sm:$0xff] }
 0x380   : > { %3013 = vmatprep.mubr.f32.mxu0 %v11892_v25 }
 0x381   : > { %v9716_v25 = vpop.f32.mrb[36].mxu1 }
 0x382   : > { %v3252_v45 = vpop.f32.mrb[37].mxu1 }
 0x383   : > { %3014 = vmatmul.mubr.f32.gmra.mrb[92].mxu0 %v11852_v3  ;;  %v1284_v3 = vrot.slane %v9457_v8, 2 }
 0x384   : > { %3018 = vmatprep.mubr.f32.mxu0 %v11893_v18  ;;  %v4743_v18 = vld [vmem:[#allocation11 + $0x38] sm:$0xff] }
 0x385   : > { %v9722_v52 = vpop.f32.mrb[38].mxu1  ;;  %v6906_v16 = vpack.c.bf16 %v4743_v18, %v4742_v1  ;;  %v1289_v18 = vrot.slane %v9605_v15, 2 }
 0x386   : > { %v3257_v36 = vpop.f32.mrb[39].mxu1 }
 0x387   : > { %3019 = vmatmul.mubr.f32.gmra.mrb[94].mxu0 %v11853_v33  ;;  %6907 = vmatpush1.bf16.msra.mxu1 %v6906_v16  ;;  %v9727_v33 = vsel %vm1049_vm1, %v1284_v3, %v1285_v24  ;;  %v4744_v16 = vld [vmem:[#allocation11 + $0x40] sm:$0xff] }
 0x388   : > { %3023 = vmatprep.mubr.f32.mxu0 %v11895_v50  ;;  %11897 = vst [vmem:[#allocation68_spill] sm:$0xff] %v9727_v33  ;;  %6908 = vmatprep.subr.bf16.mxu1 %v11752_v29 }
 0x38b   : > { %3024 = vmatmul.mubr.f32.gmra.mrb[96].mxu0 %v11854_v44  ;;  %v1287_v44 = vrot.slane %v9479_v13, 2 }
 0x38c   : > { %3028 = vmatprep.mubr.f32.mxu0 %v11896_v23 }
 0x38f   : > { %3029 = vmatmul.mubr.f32.gmra.mrb[98].mxu0 %v11855_v0  ;;  %v9730_v45 = vpop.f32.mrb[40].mxu1  ;;  %v9736_v0 = vsel %vm1049_vm1, %v1285_v24, %v1287_v44 }
 0x390   : > { %3033 = vmatprep.mubr.f32.mxu0 %v9486_v47  ;;  %v3262_v2 = vpop.f32.mrb[41].mxu1  ;;  %11898 = vst [vmem:[#allocation73_spill] sm:$0xff] %v9736_v0 }
 0x392   : > { %v2705_v8 = vpop.f32.mrb[114].mxu0 }
 0x393   : > { %v2707_v23 = vpop.f32.mrb[115].mxu0  ;;  %3034 = vmatmul.mubr.f32.gmra.mrb[100].mxu0 %v11856_v31  ;;  %v9739_v36 = vpop.f32.mrb[42].mxu1  ;;  %v4745_v8 = vld [vmem:[#allocation11 + $0x48] sm:$0xff]  ;;  %v9744_v31 = vsel %vm1049_vm1, %v1287_v44, %v1289_v18 }
 0x394   : > { %3038 = vmatprep.mubr.f32.mxu0 %v9727_v33  ;;  %v3267_v13 = vpop.f32.mrb[43].mxu1  ;;  %v6909_v23 = vpack.c.bf16 %v4745_v8, %v4744_v16  ;;  %11899 = vst [vmem:[#allocation77_spill] sm:$0xff] %v9744_v31  ;;  %v2030_v8 = vld [vmem:[#allocation8 + $0x420] sm:$0xff] }
 0x395   : > { %v2028_v13 = vld [vmem:[#allocation8 + $0x410] sm:$0xff] }
 0x396   : > { %v2710_v3 = vpop.f32.mrb[116].mxu0  ;;  %6910 = vmatpush1.bf16.msra.mxu1 %v6909_v23  ;;  %v2031_v23 = vld [vmem:[#allocation8 + $0x428] sm:$0xff] }
 0x397   : > { %v2712_v1 = vpop.f32.mrb[117].mxu0  ;;  %3039 = vmatmul.mubr.f32.gmra.mrb[126].mxu0 %v9592_v19  ;;  %v9746_v2 = vpop.f32.mrb[44].mxu1  ;;  %6911 = vmatprep.subr.bf16.mxu1 %v11752_v29 }
 0x398   : > { %3043 = vmatprep.mubr.f32.mxu0 %v9736_v0  ;;  %v3272_v15 = vpop.f32.mrb[45].mxu1  ;;  %v2029_v1 = vld [vmem:[#allocation8 + $0x418] sm:$0xff] }
 0x399   : > { %v6868_v16 = vpack.c.bf16 %v2029_v1, %v2028_v13  ;;  %v4747_v0 = vld [vmem:[#allocation11 + $0x58] sm:$0xff] }
 0x39a   : > { %v2715_v24 = vpop.f32.mrb[118].mxu0 }
 0x39b   : > { %v2717_v33 = vpop.f32.mrb[119].mxu0  ;;  %3044 = vmatmul.mubr.f32.gmra.mrb[128].mxu0 %v9600_v62  ;;  %v9751_v19 = vpop.f32.mrb[46].mxu1 }
 0x39c   : > { %3048 = vmatprep.mubr.f32.mxu0 %v9744_v31  ;;  %v3277_v44 = vpop.f32.mrb[47].mxu1  ;;  %v7813_v31 = vld [vmem:[%s8396_s13 + $0x40] sm:$0xff] }
 0x39d   : > { %v2032_v44 = vld [vmem:[#allocation8 + $0x430] sm:$0xff] }
 0x39e   : > { %v2785_v3 = vpop.f32.mrb[120].mxu0 }
 0x39f   : > { %v2787_v18 = vpop.f32.mrb[121].mxu0  ;;  %3049 = vmatmul.mubr.f32.gmra.mrb[130].mxu0 %v9611_v49  ;;  %v4746_v3 = vld [vmem:[#allocation11 + $0x50] sm:$0xff] }
 0x3a0   : > { %3118 = vmatprep.mubr.f32.mxu0 %v11835_v12  ;;  %v9755_v33 = vpop.f32.mrb[48].mxu1  ;;  %v6912_v49 = vpack.c.bf16 %v4747_v0, %v4746_v3  ;;  %v6872_v12 = vpack.c.bf16 %v2031_v23, %v2030_v8  ;;  %v2033_v18 = vld [vmem:[#allocation8 + $0x438] sm:$0xff]  ;;  %v2034_v0 = vld [vmem:[#allocation8 + $0x440] sm:$0xff]  ;;  %v7815_v23 = vld [vmem:[%s8396_s13 + $0x50] sm:$0xff] }
 0x3a1   : > { %v3282_v24 = vpop.f32.mrb[49].mxu1 }
 0x3a2   : > { %v2790_v62 = vpop.f32.mrb[122].mxu0  ;;  %6913 = vmatpush1.bf16.msra.mxu1 %v6912_v49 }
 0x3a3   : > { %v2792_v15 = vpop.f32.mrb[123].mxu0  ;;  %3119 = vmatmul.mubr.f32.vlgmr.msra.gmra.mrb[132].mxu0 %v7813_v31  ;;  %6914 = vmatprep.subr.bf16.mxu1 %v11752_v29  ;;  %v2035_v31 = vld [vmem:[#allocation8 + $0x448] sm:$0xff] }
 0x3a4   : > { %6867 = vmatpush3.bf16.msra.mxu0 %v9622_v55  ;;  %3123 = vmatprep.mubr.f32.mxu0 %v11837_v22  ;;  %v9760_v13 = vpop.f32.mrb[50].mxu1  ;;  %v7814_v15 = vld [vmem:[%s8396_s13 + $0x48] sm:$0xff]  ;;  %v6876_v22 = vpack.c.bf16 %v2033_v18, %v2032_v44  ;;  %v6880_v3 = vpack.c.bf16 %v2035_v31, %v2034_v0 }
 0x3a5   : > { %6869 = vmatprep.subr.bf16.mxu0 %v6868_v16  ;;  %v3287_v62 = vpop.f32.mrb[51].mxu1  ;;  %v4748_v44 = vld [vmem:[#allocation11 + $0x60] sm:$0xff]  ;;  %v4749_v18 = vld [vmem:[#allocation11 + $0x68] sm:$0xff] }
 0x3a6   : > { %v2795_v1 = vpop.f32.mrb[124].mxu0  ;;  %v7816_v62 = vld [vmem:[%s8396_s13 + $0x60] sm:$0xff]  ;;  %v2039_v0 = vld [vmem:[#allocation8 + $0x468] sm:$0xff] }
 0x3a7   : > { %v2797_v24 = vpop.f32.mrb[125].mxu0  ;;  %3124 = vmatmul.mubr.f32.gmra.mrb[134].mxu0 %v7814_v15  ;;  %v2037_v1 = vld [vmem:[#allocation8 + $0x458] sm:$0xff] }
 0x3a8   : > { %6871 = vmatpush3.bf16.msra.mxu0 %v6868_v16  ;;  %3128 = vmatprep.mubr.f32.mxu0 %v11839_v20  ;;  %v9765_v55 = vpop.f32.mrb[52].mxu1  ;;  %v2036_v16 = vld [vmem:[#allocation8 + $0x450] sm:$0xff]  ;;  %v6915_v24 = vpack.c.bf16 %v4749_v18, %v4748_v44  ;;  %v7819_v18 = vld [vmem:[%s8396_s13 + $0x80] sm:$0xff] }
 0x3a9   : > { %6873 = vmatprep.subr.bf16.mxu0 %v6872_v12  ;;  %v3292_v8 = vpop.f32.mrb[53].mxu1 }
 0x3aa   : > { %6916 = vmatpush1.bf16.msra.mxu1 %v6915_v24  ;;  %v7817_v8 = vld [vmem:[%s8396_s13 + $0x68] sm:$0xff]  ;;  %v4751_v24 = vld [vmem:[#allocation11 + $0x78] sm:$0xff] }
 0x3ab   : > { %3129 = vmatmul.mubr.f32.gmra.mrb[136].mxu0 %v7815_v23  ;;  %6917 = vmatprep.subr.bf16.mxu1 %v11752_v29  ;;  %v2040_v23 = vld [vmem:[#allocation8 + $0x470] sm:$0xff] }
 0x3ac   : > { %6875 = vmatpush3.bf16.msra.mxu0 %v6872_v12  ;;  %3133 = vmatprep.mubr.f32.mxu0 %v11841_v48  ;;  %v9769_v49 = vpop.f32.mrb[54].mxu1  ;;  %v6884_v12 = vpack.c.bf16 %v2037_v1, %v2036_v16  ;;  %v2038_v48 = vld [vmem:[#allocation8 + $0x460] sm:$0xff]  ;;  %v2041_v16 = vld [vmem:[#allocation8 + $0x478] sm:$0xff] }
 0x3ad   : > { %6877 = vmatprep.subr.bf16.mxu0 %v6876_v22  ;;  %v3297_v20 = vpop.f32.mrb[55].mxu1 }
 0x3ae   : > { %v7818_v20 = vld [vmem:[%s8396_s13 + $0x70] sm:$0xff] }
 0x3af   : > { %3134 = vmatmul.mubr.f32.gmra.mrb[6].mxu0 %v7816_v62  ;;  %v6892_v62 = vpack.c.bf16 %v2041_v16, %v2040_v23  ;;  %v7820_v16 = vld [vmem:[%s8396_s13 + $0x88] sm:$0xff] }
 0x3b0   : > { %6879 = vmatpush3.bf16.msra.mxu0 %v6876_v22  ;;  %3138 = vmatprep.mubr.f32.mxu0 %v11843_v27  ;;  %v9773_v15 = vpop.f32.mrb[56].mxu1  ;;  %v6888_v27 = vpack.c.bf16 %v2039_v0, %v2038_v48  ;;  %v9785_v48 = vld [vmem:[#allocation9] ss:$0 sm:$0xff] }
 0x3b1   : > { %6881 = vmatprep.subr.bf16.mxu0 %v6880_v3  ;;  %v3302_v31 = vpop.f32.mrb[57].mxu1 }
 0x3b3   : > { %3139 = vmatmul.mubr.f32.gmra.mrb[8].mxu0 %v7817_v8 }
 0x3b4   : > { %6883 = vmatpush3.bf16.msra.mxu0 %v6880_v3  ;;  %3143 = vmatprep.mubr.f32.mxu0 %v11845_v11  ;;  %v9778_v22 = vpop.f32.mrb[58].mxu1  ;;  %v4750_v11 = vld [vmem:[#allocation11 + $0x70] sm:$0xff] }
 0x3b5   : > { %6885 = vmatprep.subr.bf16.mxu0 %v6884_v12  ;;  %v3307_v1 = vpop.f32.mrb[59].mxu1  ;;  %v6918_v0 = vpack.c.bf16 %v4751_v24, %v4750_v11  ;;  %v4753_v24 = vld [vmem:[#allocation11 + $0x88] sm:$0xff] }
 0x3b7   : > { %3144 = vmatmul.mubr.f32.gmra.mrb[10].mxu0 %v7818_v20  ;;  %6919 = vmatpush1.bf16.msra.mxu1 %v6918_v0 }
 0x3b8   : > { %6887 = vmatpush3.bf16.msra.mxu0 %v6884_v12  ;;  %3148 = vmatprep.mubr.f32.mxu0 %v11847_v21  ;;  %v9782_v44 = vpop.f32.mrb[60].mxu1 }
 0x3b9   : > { %6889 = vmatprep.subr.bf16.mxu0 %v6888_v27  ;;  %v3312_v3 = vpop.f32.mrb[61].mxu1  ;;  %6920 = vmatprep.subr.bf16.mxu1 %v11752_v29 }
 0x3bb   : > { %3149 = vmatmul.mubr.f32.gmra.mrb[12].mxu0 %v7819_v18 }
 0x3bc   : > { %6891 = vmatpush3.bf16.msra.mxu0 %v6888_v27  ;;  %3153 = vmatprep.mubr.f32.mxu0 %v11849_v54  ;;  %v9788_v12 = vpop.f32.mrb[62].mxu1 }
 0x3bd   : > { %6893 = vmatprep.subr.bf16.mxu0 %v6892_v62  ;;  %v3317_v31 = vpop.f32.mrb[63].mxu1 }
 0x3be   : > { %v2825_v21 = vpop.f32.mrb[16].mxu0 }
 0x3bf   : > { %v7157_v8 = vadd.f32 %v9785_v48, %v2825_v21  ;;  %v2827_v23 = vpop.f32.mrb[17].mxu0  ;;  %3154 = vmatmul.mubr.f32.gmra.mrb[14].mxu0 %v7820_v16 }
 0x3c0   : > { %6895 = vmatpush3.bf16.msra.mxu0 %v6892_v62  ;;  %6511 = vmatprep.mubr.f32.mxu0 %v9058_v34  ;;  %v9797_v54 = vpop.f32.mrb[64].mxu1  ;;  %v4752_v34 = vld [vmem:[#allocation11 + $0x80] sm:$0xff] }
 0x3c1   : > { %v9795_v27 = vadd.f32 %v7157_v8, %v9641_v43  ;;  %v3322_v20 = vpop.f32.mrb[65].mxu1  ;;  %v6921_v0 = vpack.c.bf16 %v4753_v24, %v4752_v34  ;;  %v11900_v34 = vld [vmem:[#allocation92_spill] sm:$0xff] }
 0x3c2   : > { %v2830_v1 = vpop.f32.mrb[18].mxu0 }
 0x3c3   : > { %v7159_v3 = vadd.f32 %v9785_v48, %v2830_v1  ;;  %v2832_v18 = vpop.f32.mrb[19].mxu0  ;;  %6512 = vmatmul.mubr.f32.vlgmr.msra.gmra.mrb[138].mxu0 %v9065_v63  ;;  %6922 = vmatpush1.bf16.msra.mxu1 %v6921_v0 }
 0x3c4   : > { %6514 = vmatprep.mubr.f32.mxu0 %v9072_v6  ;;  %v9805_v62 = vpop.f32.mrb[66].mxu1  ;;  %6923 = vmatprep.subr.bf16.mxu1 %v11752_v29 }
 0x3c5   : > { %v9803_v11 = vadd.f32 %v7159_v3, %v9645_v10  ;;  %v3327_v21 = vpop.f32.mrb[67].mxu1 }
 0x3c6   : > { %v2835_v43 = vpop.f32.mrb[20].mxu0 }
 0x3c7   : > { %v7161_v31 = vadd.f32 %v9785_v48, %v2835_v43  ;;  %v2837_v8 = vpop.f32.mrb[21].mxu0  ;;  %6515 = vmatmul.mubr.f32.gmra.mrb[6].mxu0 %v9080_v42  ;;  %v4755_v43 = vld [vmem:[#allocation11 + $0x98] sm:$0xff] }
 0x3c8   : > { %6517 = vmatprep.mubr.f32.mxu0 %v9087_v56  ;;  %v9813_v6 = vpop.f32.mrb[68].mxu1 }
 0x3c9   : > { %v9811_v63 = vadd.f32 %v7161_v31, %v9649_v5  ;;  %v3332_v23 = vpop.f32.mrb[69].mxu1 }
 0x3ca   : > { %v2840_v10 = vpop.f32.mrb[22].mxu0 }
 0x3cb   : > { %v7163_v16 = vadd.f32 %v9785_v48, %v2840_v10  ;;  %v2842_v1 = vpop.f32.mrb[23].mxu0  ;;  %6518 = vmatmul.mubr.f32.gmra.mrb[140].mxu0 %v9097_v30 }
 0x3cc   : > { %6520 = vmatprep.mubr.f32.mxu0 %v9105_v37  ;;  %v9822_v56 = vpop.f32.mrb[70].mxu1  ;;  %v4754_v37 = vld [vmem:[#allocation11 + $0x90] sm:$0xff] }
 0x3cd   : > { %v9820_v42 = vadd.f32 %v7163_v16, %v9653_v41  ;;  %v3337_v20 = vpop.f32.mrb[71].mxu1  ;;  %v6924_v0 = vpack.c.bf16 %v4755_v43, %v4754_v37 }
 0x3ce   : > { %v2845_v5 = vpop.f32.mrb[24].mxu0 }
 0x3cf   : > { %v7165_v3 = vadd.f32 %v9785_v48, %v2845_v5  ;;  %v2847_v18 = vpop.f32.mrb[25].mxu0  ;;  %6521 = vmatmul.mubr.f32.gmra.mrb[142].mxu0 %v11900_v34  ;;  %6925 = vmatpush1.bf16.msra.mxu1 %v6924_v0  ;;  %v4757_v34 = vld [vmem:[#allocation11 + $0xa8] sm:$0xff] }
 0x3d0   : > { %6523 = vmatprep.mubr.f32.mxu0 %v9119_v51  ;;  %v9830_v30 = vpop.f32.mrb[72].mxu1  ;;  %6926 = vmatprep.subr.bf16.mxu1 %v11752_v29 }
 0x3d1   : > { %v9828_v24 = vadd.f32 %v7165_v3, %v9657_v35  ;;  %v3342_v21 = vpop.f32.mrb[73].mxu1 }
 0x3d2   : > { %v2850_v41 = vpop.f32.mrb[26].mxu0  ;;  %v11901_v21 = vld [vmem:[#allocation93_spill] sm:$0xff] }
 0x3d3   : > { %v7167_v31 = vadd.f32 %v9785_v48, %v2850_v41  ;;  %v2852_v8 = vpop.f32.mrb[27].mxu0  ;;  %6524 = vmatmul.mubr.f32.gmra.mrb[144].mxu0 %v9127_v60 }
 0x3d4   : > { %6526 = vmatprep.mubr.f32.mxu0 %v9137_v4  ;;  %v9838_v35 = vpop.f32.mrb[74].mxu1 }
 0x3d5   : > { %v9836_v51 = vadd.f32 %v7167_v31, %v9661_v57  ;;  %v3347_v23 = vpop.f32.mrb[75].mxu1  ;;  %v11902_v31 = vld [vmem:[#allocation94_spill] sm:$0xff] }
 0x3d6   : > { %v2855_v10 = vpop.f32.mrb[28].mxu0 }
 0x3d7   : > { %v7169_v16 = vadd.f32 %v9785_v48, %v2855_v10  ;;  %v2857_v1 = vpop.f32.mrb[29].mxu0  ;;  %6527 = vmatmul.mubr.f32.gmra.mrb[146].mxu0 %v9146_v46 }
 0x3d8   : > { %6529 = vmatprep.mubr.f32.mxu0 %v9158_v58  ;;  %v9847_v4 = vpop.f32.mrb[76].mxu1  ;;  %v4756_v58 = vld [vmem:[#allocation11 + $0xa0] sm:$0xff] }
 0x3d9   : > { %v9845_v60 = vadd.f32 %v7169_v16, %v9665_v38  ;;  %v3352_v5 = vpop.f32.mrb[77].mxu1  ;;  %v6927_v37 = vpack.c.bf16 %v4757_v34, %v4756_v58  ;;  %v11903_v16 = vld [vmem:[#allocation95_spill] sm:$0xff]  ;;  %v11904_v1 = vld [vmem:[#allocation96_spill] sm:$0xff]  ;;  %v11905_v34 = vld [vmem:[#allocation97_spill] sm:$0xff] }
 0x3da   : > { %v2860_v57 = vpop.f32.mrb[30].mxu0 }
 0x3db   : > { %v7171_v20 = vadd.f32 %v9785_v48, %v2860_v57  ;;  %v2862_v3 = vpop.f32.mrb[31].mxu0  ;;  %6530 = vmatmul.mubr.f32.gmra.mrb[148].mxu0 %v9168_v14  ;;  %6928 = vmatpush1.bf16.msra.mxu1 %v6927_v37 }
 0x3dc   : > { %6532 = vmatprep.mubr.f32.mxu0 %v9178_v39  ;;  %v9855_v46 = vpop.f32.mrb[78].mxu1  ;;  %6929 = vmatprep.subr.bf16.mxu1 %v11752_v29 }
 0x3dd   : > { %v9853_v18 = vadd.f32 %v7171_v20, %v9669_v28  ;;  %v3357_v43 = vpop.f32.mrb[79].mxu1 }
 0x3de   : > { %v2865_v38 = vpop.f32.mrb[32].mxu0 }
 0x3df   : > { %v7173_v41 = vadd.f32 %v9785_v48, %v2865_v38  ;;  %v2867_v0 = vpop.f32.mrb[33].mxu0  ;;  %6533 = vmatmul.mubr.f32.gmra.mrb[150].mxu0 %v11901_v21  ;;  %v11906_v38 = vld [vmem:[#allocation98_spill] sm:$0xff] }
 0x3e0   : > { %6535 = vmatprep.mubr.f32.mxu0 %v11902_v31  ;;  %v9863_v39 = vpop.f32.mrb[80].mxu1  ;;  %v4759_v0 = vld [vmem:[#allocation11 + $0xb8] sm:$0xff] }
 0x3e1   : > { %v9861_v14 = vadd.f32 %v7173_v41, %v9673_v53  ;;  %v3362_v8 = vpop.f32.mrb[81].mxu1  ;;  %v4758_v41 = vld [vmem:[#allocation11 + $0xb0] sm:$0xff] }
 0x3e2   : > { %v2870_v28 = vpop.f32.mrb[34].mxu0  ;;  %v6930_v21 = vpack.c.bf16 %v4759_v0, %v4758_v41  ;;  %v11911_v0 = vld [vmem:[#allocation103_spill] sm:$0xff] }
 0x3e3   : > { %v7175_v10 = vadd.f32 %v9785_v48, %v2870_v28  ;;  %v2872_v23 = vpop.f32.mrb[35].mxu0  ;;  %6536 = vmatmul.mubr.f32.gmra.mrb[152].mxu0 %v11903_v16 }
 0x3e4   : > { %6538 = vmatprep.mubr.f32.mxu0 %v11904_v1  ;;  %v9872_v5 = vpop.f32.mrb[82].mxu1  ;;  %v11908_v23 = vld [vmem:[#allocation100_spill] sm:$0xff]  ;;  %6931 = vmatpush1.bf16.msra.mxu1 %v6930_v21 }
 0x3e5   : > { %v9870_v57 = vadd.f32 %v7175_v10, %v9677_v32  ;;  %v3367_v20 = vpop.f32.mrb[83].mxu1  ;;  %v11907_v10 = vld [vmem:[#allocation99_spill] sm:$0xff]  ;;  %6932 = vmatprep.subr.bf16.mxu1 %v11752_v29  ;;  %v11912_v21 = vld [vmem:[#allocation104_spill] sm:$0xff] }
 0x3e6   : > { %v2875_v53 = vpop.f32.mrb[36].mxu0  ;;  %v11909_v20 = vld [vmem:[#allocation101_spill] sm:$0xff] }
 0x3e7   : > { %v7177_v3 = vadd.f32 %v9785_v48, %v2875_v53  ;;  %v2877_v58 = vpop.f32.mrb[37].mxu0  ;;  %6539 = vmatmul.mubr.f32.gmra.mrb[154].mxu0 %v11905_v34 }
 0x3e8   : > { %6541 = vmatprep.mubr.f32.mxu0 %v11906_v38  ;;  %v9880_v43 = vpop.f32.mrb[84].mxu1 }
 0x3e9   : > { %v9878_v37 = vadd.f32 %v7177_v3, %v9681_v61  ;;  %v3372_v31 = vpop.f32.mrb[85].mxu1  ;;  %v11910_v3 = vld [vmem:[#allocation102_spill] sm:$0xff] }
 0x3ea   : > { %v2880_v32 = vpop.f32.mrb[38].mxu0 }
 0x3eb   : > { %v7179_v28 = vadd.f32 %v9785_v48, %v2880_v32  ;;  %v2882_v8 = vpop.f32.mrb[39].mxu0  ;;  %6542 = vmatmul.mubr.f32.gmra.mrb[156].mxu0 %v11907_v10  ;;  %v4761_v32 = vld [vmem:[#allocation11 + $0xc8] sm:$0xff] }
 0x3ec   : > { %6544 = vmatprep.mubr.f32.mxu0 %v11908_v23  ;;  %v11913_v23 = vld [vmem:[#allocation105_spill] sm:$0xff] }
 0x3ed   : > { %v9886_v16 = vadd.f32 %v7179_v28, %v9685_v7  ;;  %v4760_v7 = vld [vmem:[#allocation11 + $0xc0] sm:$0xff] }
 0x3ee   : > { %v2885_v61 = vpop.f32.mrb[40].mxu0  ;;  %v6933_v31 = vpack.c.bf16 %v4761_v32, %v4760_v7  ;;  %v11917_v32 = vld [vmem:[#allocation52_spill] sm:$0xff] }
 0x3ef   : > { %v7181_v1 = vadd.f32 %v9785_v48, %v2885_v61  ;;  %v2887_v53 = vpop.f32.mrb[41].mxu0  ;;  %6545 = vmatmul.mubr.f32.gmra.mrb[158].mxu0 %v11909_v20  ;;  %v11914_v61 = vld [vmem:[#allocation106_spill] sm:$0xff] }
 0x3f0   : > { %6547 = vmatprep.mubr.f32.mxu0 %v11910_v3  ;;  %6934 = vmatpush1.bf16.msra.mxu1 %v6933_v31  ;;  %v11918_v31 = vld [vmem:[#allocation34_spill] sm:$0xff] }
 0x3f1   : > { %v9893_v58 = vadd.f32 %v7181_v1, %v9690_v17  ;;  %6935 = vmatprep.subr.bf16.mxu1 %v11752_v29 }
 0x3f2   : > { %v2890_v34 = vpop.f32.mrb[42].mxu0 }
 0x3f3   : > { %v7183_v38 = vadd.f32 %v9785_v48, %v2890_v34  ;;  %v2892_v41 = vpop.f32.mrb[43].mxu0  ;;  %6548 = vmatmul.mubr.f32.gmra.mrb[160].mxu0 %v11911_v0  ;;  %v11916_v34 = vld [vmem:[#allocation33_spill] sm:$0xff] }
 0x3f4   : > { %6550 = vmatprep.mubr.f32.mxu0 %v11912_v21  ;;  %v4762_v21 = vld [vmem:[#allocation11 + $0xd0] sm:$0xff] }
 0x3f5   : > { %v9899_v28 = vadd.f32 %v7183_v38, %v9694_v59  ;;  %v11915_v59 = vld [vmem:[#allocation49_spill] sm:$0xff] }
 0x3f6   : > { %v2895_v8 = vpop.f32.mrb[44].mxu0 }
 0x3f7   : > { %v7185_v10 = vadd.f32 %v9785_v48, %v2895_v8  ;;  %v2897_v17 = vpop.f32.mrb[45].mxu0  ;;  %6551 = vmatmul.mubr.f32.gmra.mrb[162].mxu0 %v11913_v23 }
 0x3f8   : > { %6553 = vmatprep.mubr.f32.mxu0 %v11914_v61  ;;  %v11919_v61 = vld [vmem:[#allocation56_spill] sm:$0xff] }
 0x3f9   : > { %v9906_v1 = vadd.f32 %v7185_v10, %v9698_v9  ;;  %v4763_v9 = vld [vmem:[#allocation11 + $0xd8] sm:$0xff] }
 0x3fa   : > { %v2900_v53 = vpop.f32.mrb[46].mxu0  ;;  %v6936_v8 = vpack.c.bf16 %v4763_v9, %v4762_v21 }
 0x3fb   : > { %v7187_v20 = vadd.f32 %v9785_v48, %v2900_v53  ;;  %v2902_v3 = vpop.f32.mrb[47].mxu0  ;;  %6554 = vmatmul.mubr.f32.gmra.mrb[164].mxu0 %v11915_v59  ;;  %v11920_v53 = vld [vmem:[#allocation35_spill] sm:$0xff] }
 0x3fc   : > { %6556 = vmatprep.mubr.f32.mxu0 %v11916_v34  ;;  %6937 = vmatpush1.bf16.msra.mxu1 %v6936_v8  ;;  %v4764_v8 = vld [vmem:[#allocation11 + $0xe0] sm:$0xff] }
 0x3fd   : > { %v9912_v38 = vadd.f32 %v7187_v20, %v9703_v40  ;;  %6938 = vmatprep.subr.bf16.mxu1 %v11752_v29  ;;  %v11921_v20 = vld [vmem:[#allocation71_spill] sm:$0xff] }
 0x3fe   : > { %v2905_v41 = vpop.f32.mrb[48].mxu0 }
 0x3ff   : > { %v7189_v0 = vadd.f32 %v9785_v48, %v2905_v41  ;;  %v2907_v7 = vpop.f32.mrb[49].mxu0  ;;  %6557 = vmatmul.mubr.f32.gmra.mrb[166].mxu0 %v11917_v32  ;;  %v11922_v41 = vld [vmem:[#allocation57_spill] sm:$0xff] }
 0x400   : > { %6559 = vmatprep.mubr.f32.mxu0 %v11918_v31  ;;  %v11924_v31 = vld [vmem:[#allocation36_spill] sm:$0xff] }
 0x401   : > { %v9918_v10 = vadd.f32 %v7189_v0, %v9707_v26  ;;  %v11923_v0 = vld [vmem:[#allocation54_spill] sm:$0xff] }
 0x402   : > { %v2910_v17 = vpop.f32.mrb[50].mxu0 }
 0x403   : > { %v7191_v23 = vadd.f32 %v9785_v48, %v2910_v17  ;;  %v2912_v40 = vpop.f32.mrb[51].mxu0  ;;  %6560 = vmatmul.mubr.f32.gmra.mrb[168].mxu0 %v11919_v61  ;;  %v4765_v17 = vld [vmem:[#allocation11 + $0xe8] sm:$0xff] }
 0x404   : > { %6562 = vmatprep.mubr.f32.mxu0 %v11920_v53  ;;  %v6939_v40 = vpack.c.bf16 %v4765_v17, %v4764_v8 }
 0x405   : > { %v9925_v3 = vadd.f32 %v7191_v23, %v11921_v20  ;;  %v11925_v23 = vld [vmem:[#allocation59_spill] sm:$0xff]  ;;  %v9940_v20 = vld [vmem:[%s8396_s13 + $0x260] sm:$0xff] }
 0x406   : > { %v2915_v59 = vpop.f32.mrb[52].mxu0  ;;  %6940 = vmatpush1.bf16.msra.mxu1 %v6939_v40 }
 0x407   : > { %v7193_v34 = vadd.f32 %v9785_v48, %v2915_v59  ;;  %v2917_v26 = vpop.f32.mrb[53].mxu0  ;;  %6563 = vmatmul.mubr.f32.gmra.mrb[170].mxu0 %v11922_v41  ;;  %v985_v41 = vrot.slane %v9940_v20, 1  ;;  %6941 = vmatprep.subr.bf16.mxu1 %v11752_v29 }
 0x408   : > { %6565 = vmatprep.mubr.f32.mxu0 %v11923_v0  ;;  %v11927_v26 = vld [vmem:[#allocation37_spill] sm:$0xff] }
 0x409   : > { %v9931_v7 = vadd.f32 %v7193_v34, %v9716_v25  ;;  %v9943_v25 = vld [vmem:[%s8396_s13 + $0x268] sm:$0xff] }
 0x40a   : > { %v2920_v32 = vpop.f32.mrb[54].mxu0  ;;  %11926 = vst [vmem:[#allocation78_spill] sm:$0xff] %v9943_v25  ;;  %v986_v0 = vrot.slane %v9943_v25, 1 }
 0x40b   : > { %v7195_v21 = vadd.f32 %v9785_v48, %v2920_v32  ;;  %v2922_v9 = vpop.f32.mrb[55].mxu0  ;;  %6566 = vmatmul.mubr.f32.gmra.mrb[172].mxu0 %v11924_v31  ;;  %v442_v31 = vld [vmem:[%s8396_s13 + $0x270] sm:$0xff] }
 0x40c   : > { %6568 = vmatprep.mubr.f32.mxu0 %v11925_v23  ;;  %v11930_v23 = vld [vmem:[#allocation38_spill] sm:$0xff]  ;;  %v988_v40 = vrot.slane %v442_v31, 1 }
 0x40d   : > { %v9937_v61 = vadd.f32 %v7195_v21, %v9722_v52  ;;  %v11928_v52 = vld [vmem:[#allocation63_spill] sm:$0xff]  ;;  %v987_v21 = vsel %vm678_vm0, %v985_v41, %v986_v0 }
 0x40e   : > { %v2925_v53 = vpop.f32.mrb[56].mxu0  ;;  %3373 = vmatprep.mubr.f32.mxu1 %v987_v21  ;;  %v4767_v41 = vld [vmem:[#allocation11 + $0xf8] sm:$0xff] }
 0x40f   : > { %v7197_v59 = vadd.f32 %v9785_v48, %v2925_v53  ;;  %v2927_v34 = vpop.f32.mrb[57].mxu0  ;;  %6569 = vmatmul.mubr.f32.gmra.mrb[174].mxu0 %v11927_v26  ;;  %3374 = vmatmul.mubr.f32.gmra.mrb[86].mxu1 %v9940_v20  ;;  %v11931_v53 = vld [vmem:[#allocation64_spill] sm:$0xff]  ;;  %v4766_v26 = vld [vmem:[#allocation11 + $0xf0] sm:$0xff] }
 0x410   : > { %6571 = vmatprep.mubr.f32.mxu0 %v11928_v52  ;;  %v443_v52 = vld [vmem:[%s8396_s13 + $0x278] sm:$0x3] }
 0x411   : > { %v9952_v32 = vadd.f32 %v7197_v59, %v9730_v45  ;;  %v989_v45 = vsel %vm678_vm0, %v986_v0, %v988_v40 }
 0x412   : > { %v2930_v9 = vpop.f32.mrb[58].mxu0  ;;  %3378 = vmatprep.mubr.f32.mxu1 %v989_v45 }
 0x413   : > { %11929 = vst [vmem:[#allocation75_spill] sm:$0xff] %v9952_v32  ;;  %v7199_v8 = vadd.f32 %v9785_v48, %v2930_v9  ;;  %v2932_v17 = vpop.f32.mrb[59].mxu0  ;;  %6572 = vmatmul.mubr.f32.gmra.mrb[176].mxu0 %v11930_v23  ;;  %v6942_v23 = vpack.c.bf16 %v4767_v41, %v4766_v26  ;;  %3379 = vmatmul.mubr.f32.gmra.mrb[88].mxu1 %v9943_v25  ;;  %v990_v32 = vrot.slane %v443_v52, 1  ;;  %v11934_v26 = vld [vmem:[#allocation70_spill] sm:$0xff] }
 0x414   : > { %6574 = vmatprep.mubr.f32.mxu0 %v11931_v53  ;;  %v11932_v17 = vld [vmem:[#allocation61_spill] sm:$0xff]  ;;  %v11933_v53 = vld [vmem:[#allocation39_spill] sm:$0xff] }
 0x415   : > { %v9961_v34 = vadd.f32 %v7199_v8, %v9739_v36  ;;  %6943 = vmatpush1.bf16.msra.mxu1 %v6942_v23  ;;  %v991_v0 = vsel %vm678_vm0, %v988_v40, %v990_v32 }
 0x416   : > { %v2935_v59 = vpop.f32.mrb[60].mxu0  ;;  %3383 = vmatprep.mubr.f32.mxu1 %v991_v0  ;;  %6944 = vmatprep.subr.bf16.mxu1 %v11752_v29  ;;  %v11938_v0 = vld [vmem:[#allocation77_spill] sm:$0xff] }
 0x417   : > { %v7201_v21 = vadd.f32 %v9785_v48, %v2935_v59  ;;  %v2937_v9 = vpop.f32.mrb[61].mxu0  ;;  %6575 = vmatmul.mubr.f32.gmra.mrb[178].mxu0 %v11932_v17  ;;  %3384 = vmatmul.mubr.f32.gmra.mrb[90].mxu1 %v442_v31  ;;  %v11540_v31 = vrot.slane %v9943_v25, 2 }
 0x418   : > { %6577 = vmatprep.mubr.f32.mxu0 %v11933_v53  ;;  %v11936_v9 = vld [vmem:[#allocation68_spill] sm:$0xff] }
 0x419   : > { %v9970_v36 = vadd.f32 %v7201_v21, %v9746_v2  ;;  %v11541_v2 = vmov 0.0  }
 0x41a   : > { %v2940_v8 = vpop.f32.mrb[62].mxu0  ;;  %v9981_v52 = vrot.slane %v11541_v2, 1 }
 0x41b   : > { %v7203_v45 = vadd.f32 %v9785_v48, %v2940_v8  ;;  %v2942_v59 = vpop.f32.mrb[63].mxu0  ;;  %6578 = vmatmul.mubr.f32.gmra.mrb[180].mxu0 %v11895_v50  ;;  %v1348_v50 = vrot.slane %v9940_v20, 2  ;;  %v4768_v8 = vld [vmem:[#allocation11 + $0x100] sm:$0xff] }
 0x41c   : > { %6580 = vmatprep.mubr.f32.mxu0 %v11934_v26  ;;  %11935 = vst [vmem:[#allocation80_spill] sm:$0xff] %v9981_v52  ;;  %4983 = vmatprep.mubr.f32.mxu1 %v9981_v52 }
 0x41d   : > { %v9978_v41 = vadd.f32 %v7203_v45, %v9751_v19  ;;  %4984 = vmatmul.mubr.f32.vlgmr.msra.gmra.mrb[92].mxu1 %v11541_v2  ;;  %v1350_v20 = vsel %vm1049_vm1, %v1348_v50, %v11540_v31  ;;  %v4769_v45 = vld [vmem:[#allocation11 + $0x108] sm:$0xff]  ;;  %v4798_v31 = vld [vmem:[#allocation11 + $0x1f0] sm:$0xff] }
 0x41e   : > { %v2945_v32 = vpop.f32.mrb[64].mxu0  ;;  %4988 = vmatprep.mubr.f32.mxu1 %v9981_v52  ;;  %v6945_v59 = vpack.c.bf16 %v4769_v45, %v4768_v8 }
 0x41f   : > { %v7205_v40 = vadd.f32 %v9785_v48, %v2945_v32  ;;  %v2947_v21 = vpop.f32.mrb[65].mxu0  ;;  %6581 = vmatmul.mubr.f32.gmra.mrb[182].mxu0 %v9486_v47  ;;  %v11937_v47 = vld [vmem:[#allocation73_spill] sm:$0xff] }
 0x420   : > { %6583 = vmatprep.mubr.f32.mxu0 %v11936_v9  ;;  %6946 = vmatpush1.bf16.msra.mxu1 %v6945_v59  ;;  %v4772_v59 = vld [vmem:[#allocation11 + $0x120] sm:$0xff] }
 0x421   : > { %v9991_v19 = vadd.f32 %v7205_v40, %v9755_v33  ;;  %4989 = vmatmul.mubr.f32.gmra.mrb[94].mxu1 %v11541_v2  ;;  %6947 = vmatprep.subr.bf16.mxu1 %v11752_v29  ;;  %v4799_v2 = vld [vmem:[#allocation11 + $0x1f8] sm:$0xff] }
 0x422   : > { %v2950_v17 = vpop.f32.mrb[66].mxu0 }
 0x423   : > { %v7207_v23 = vadd.f32 %v9785_v48, %v2950_v17  ;;  %v2952_v53 = vpop.f32.mrb[67].mxu0  ;;  %6584 = vmatmul.mubr.f32.gmra.mrb[184].mxu0 %v11937_v47 }
 0x424   : > { %6586 = vmatprep.mubr.f32.mxu0 %v11938_v0 }
 0x425   : > { %v10002_v33 = vadd.f32 %v7207_v23, %v9760_v13  ;;  %v4770_v13 = vld [vmem:[#allocation11 + $0x110] sm:$0xff]  ;;  %v4771_v23 = vld [vmem:[#allocation11 + $0x118] sm:$0xff] }
 0x426   : > { %v2955_v26 = vpop.f32.mrb[68].mxu0  ;;  %v6948_v0 = vpack.c.bf16 %v4771_v23, %v4770_v13 }
 0x427   : > { %v7209_v32 = vadd.f32 %v9785_v48, %v2955_v26  ;;  %v2957_v40 = vpop.f32.mrb[69].mxu0  ;;  %6587 = vmatmul.mubr.f32.gmra.mrb[186].mxu0 %v1350_v20  ;;  %v4773_v26 = vld [vmem:[#allocation11 + $0x128] sm:$0xff] }
 0x428   : > { %6949 = vmatpush1.bf16.msra.mxu1 %v6948_v0  ;;  %v6951_v40 = vpack.c.bf16 %v4773_v26, %v4772_v59 }
 0x429   : > { %v10007_v21 = vadd.f32 %v7209_v32, %v9765_v55  ;;  %6950 = vmatprep.subr.bf16.mxu1 %v11752_v29 }
 0x42a   : > { %v2960_v9 = vpop.f32.mrb[70].mxu0 }
 0x42b   : > { %v7211_v50 = vadd.f32 %v9785_v48, %v2960_v9  ;;  %v2962_v17 = vpop.f32.mrb[71].mxu0 }
 0x42c   : > { %6952 = vmatpush1.bf16.msra.mxu1 %v6951_v40 }
 0x42d   : > { %v10011_v53 = vadd.f32 %v7211_v50, %v9769_v49  ;;  %6953 = vmatprep.subr.bf16.mxu1 %v11752_v29 }
 0x42e   : > { %v2965_v47 = vpop.f32.mrb[72].mxu0 }
 0x42f   : > { %v7213_v8 = vadd.f32 %v9785_v48, %v2965_v47  ;;  %v2967_v20 = vpop.f32.mrb[73].mxu0 }
 0x430   : > { %v4775_v20 = vld [vmem:[#allocation11 + $0x138] sm:$0xff] }
 0x431   : > { %v10015_v45 = vadd.f32 %v7213_v8, %v9773_v15  ;;  %v4774_v8 = vld [vmem:[#allocation11 + $0x130] sm:$0xff] }
 0x432   : > { %v2970_v55 = vpop.f32.mrb[74].mxu0 }
 0x433   : > { %v7215_v32 = vadd.f32 %v9785_v48, %v2970_v55  ;;  %v2972_v49 = vpop.f32.mrb[75].mxu0 }
 0x435   : > { %v10020_v9 = vadd.f32 %v7215_v32, %v9778_v22  ;;  %v6954_v22 = vpack.c.bf16 %v4775_v20, %v4774_v8 }
 0x436   : > { %v2975_v50 = vpop.f32.mrb[76].mxu0 }
 0x437   : > { %v7217_v17 = vadd.f32 %v9785_v48, %v2975_v50  ;;  %v2977_v15 = vpop.f32.mrb[77].mxu0  ;;  %6955 = vmatpush1.bf16.msra.mxu1 %v6954_v22  ;;  %v4778_v22 = vld [vmem:[#allocation11 + $0x150] sm:$0xff] }
 0x438   : > { %6956 = vmatprep.subr.bf16.mxu1 %v11752_v29  ;;  %v4777_v15 = vld [vmem:[#allocation11 + $0x148] sm:$0xff] }
 0x439   : > { %v10025_v13 = vadd.f32 %v7217_v17, %v9782_v44 }
 0x43a   : > { %v2980_v23 = vpop.f32.mrb[78].mxu0 }
 0x43b   : > { %v7219_v47 = vadd.f32 %v9785_v48, %v2980_v23  ;;  %v2982_v0 = vpop.f32.mrb[79].mxu0 }
 0x43d   : > { %v10029_v55 = vadd.f32 %v7219_v47, %v9788_v12  ;;  %v4776_v12 = vld [vmem:[#allocation11 + $0x140] sm:$0xff] }
 0x43e   : > { %v2985_v59 = vpop.f32.mrb[80].mxu0  ;;  %v6957_v47 = vpack.c.bf16 %v4777_v15, %v4776_v12 }
 0x43f   : > { %v7221_v26 = vadd.f32 %v9785_v48, %v2985_v59  ;;  %v2987_v32 = vpop.f32.mrb[81].mxu0  ;;  %v4779_v59 = vld [vmem:[#allocation11 + $0x158] sm:$0xff] }
 0x440   : > { %6958 = vmatpush1.bf16.msra.mxu1 %v6957_v47  ;;  %v6960_v32 = vpack.c.bf16 %v4779_v59, %v4778_v22 }
 0x441   : > { %v10034_v44 = vadd.f32 %v7221_v26, %v9797_v54  ;;  %6959 = vmatprep.subr.bf16.mxu1 %v11752_v29 }
 0x442   : > { %v2990_v49 = vpop.f32.mrb[82].mxu0 }
 0x443   : > { %v7223_v40 = vadd.f32 %v9785_v48, %v2990_v49  ;;  %v2992_v50 = vpop.f32.mrb[83].mxu0 }
 0x444   : > { %6961 = vmatpush1.bf16.msra.mxu1 %v6960_v32 }
 0x445   : > { %v10038_v17 = vadd.f32 %v7223_v40, %v9805_v62  ;;  %6962 = vmatprep.subr.bf16.mxu1 %v11752_v29 }
 0x446   : > { %v2995_v23 = vpop.f32.mrb[84].mxu0 }
 0x447   : > { %v7225_v0 = vadd.f32 %v9785_v48, %v2995_v23  ;;  %v2997_v8 = vpop.f32.mrb[85].mxu0 }
 0x448   : > { %v4781_v8 = vld [vmem:[#allocation11 + $0x168] sm:$0xff] }
 0x449   : > { %v10042_v20 = vadd.f32 %v7225_v0, %v9813_v6  ;;  %v4780_v0 = vld [vmem:[#allocation11 + $0x160] sm:$0xff] }
 0x44a   : > { %v3000_v54 = vpop.f32.mrb[86].mxu0 }
 0x44b   : > { %v7227_v26 = vadd.f32 %v9785_v48, %v3000_v54  ;;  %v3002_v62 = vpop.f32.mrb[87].mxu0 }
 0x44d   : > { %v10047_v49 = vadd.f32 %v7227_v26, %v9822_v56  ;;  %v6963_v56 = vpack.c.bf16 %v4781_v8, %v4780_v0 }
 0x44e   : > { %v3005_v40 = vpop.f32.mrb[88].mxu0 }
 0x44f   : > { %v7229_v50 = vadd.f32 %v9785_v48, %v3005_v40  ;;  %v3007_v6 = vpop.f32.mrb[89].mxu0  ;;  %6964 = vmatpush1.bf16.msra.mxu1 %v6963_v56  ;;  %v4784_v56 = vld [vmem:[#allocation11 + $0x180] sm:$0xff] }
 0x450   : > { %6965 = vmatprep.subr.bf16.mxu1 %v11752_v29  ;;  %v4783_v6 = vld [vmem:[#allocation11 + $0x178] sm:$0xff] }
 0x451   : > { %v10052_v12 = vadd.f32 %v7229_v50, %v9830_v30 }
 0x452   : > { %v3010_v15 = vpop.f32.mrb[90].mxu0 }
 0x453   : > { %v7231_v23 = vadd.f32 %v9785_v48, %v3010_v15  ;;  %v3012_v47 = vpop.f32.mrb[91].mxu0 }
 0x455   : > { %v10056_v54 = vadd.f32 %v7231_v23, %v9838_v35  ;;  %v4782_v35 = vld [vmem:[#allocation11 + $0x170] sm:$0xff] }
 0x456   : > { %v3015_v22 = vpop.f32.mrb[92].mxu0  ;;  %v6966_v23 = vpack.c.bf16 %v4783_v6, %v4782_v35 }
 0x457   : > { %v7233_v59 = vadd.f32 %v9785_v48, %v3015_v22  ;;  %v3017_v26 = vpop.f32.mrb[93].mxu0  ;;  %v4785_v22 = vld [vmem:[#allocation11 + $0x188] sm:$0xff] }
 0x458   : > { %6967 = vmatpush1.bf16.msra.mxu1 %v6966_v23  ;;  %v6969_v26 = vpack.c.bf16 %v4785_v22, %v4784_v56  ;;  %v4786_v23 = vld [vmem:[#allocation11 + $0x190] sm:$0xff] }
 0x459   : > { %v10061_v30 = vadd.f32 %v7233_v59, %v9847_v4  ;;  %6968 = vmatprep.subr.bf16.mxu1 %v11752_v29 }
 0x45a   : > { %v3020_v62 = vpop.f32.mrb[94].mxu0 }
 0x45b   : > { %v7235_v32 = vadd.f32 %v9785_v48, %v3020_v62  ;;  %v3022_v40 = vpop.f32.mrb[95].mxu0 }
 0x45c   : > { %6970 = vmatpush1.bf16.msra.mxu1 %v6969_v26 }
 0x45d   : > { %v10065_v50 = vadd.f32 %v7235_v32, %v9855_v46  ;;  %6971 = vmatprep.subr.bf16.mxu1 %v11752_v29 }
 0x45e   : > { %v3025_v15 = vpop.f32.mrb[96].mxu0 }
 0x45f   : > { %v7237_v47 = vadd.f32 %v9785_v48, %v3025_v15  ;;  %v3027_v0 = vpop.f32.mrb[97].mxu0 }
 0x461   : > { %v10069_v8 = vadd.f32 %v7237_v47, %v9863_v39  ;;  %v4787_v47 = vld [vmem:[#allocation11 + $0x198] sm:$0xff] }
 0x462   : > { %v3030_v4 = vpop.f32.mrb[98].mxu0  ;;  %v6972_v0 = vpack.c.bf16 %v4787_v47, %v4786_v23 }
 0x463   : > { %v7239_v59 = vadd.f32 %v9785_v48, %v3030_v4  ;;  %v3032_v46 = vpop.f32.mrb[99].mxu0 }
 0x464   : > { %6973 = vmatpush1.bf16.msra.mxu1 %v6972_v0  ;;  %v4789_v46 = vld [vmem:[#allocation11 + $0x1a8] sm:$0xff]  ;;  %v4792_v0 = vld [vmem:[#allocation11 + $0x1c0] sm:$0xff] }
 0x465   : > { %v10074_v62 = vadd.f32 %v7239_v59, %v9872_v5  ;;  %6974 = vmatprep.subr.bf16.mxu1 %v11752_v29  ;;  %v4788_v59 = vld [vmem:[#allocation11 + $0x1a0] sm:$0xff] }
 0x466   : > { %v3035_v32 = vpop.f32.mrb[100].mxu0 }
 0x467   : > { %v7241_v40 = vadd.f32 %v9785_v48, %v3035_v32  ;;  %v3037_v39 = vpop.f32.mrb[101].mxu0  ;;  %v6975_v32 = vpack.c.bf16 %v4789_v46, %v4788_v59  ;;  %v4794_v46 = vld [vmem:[#allocation11 + $0x1d0] sm:$0xff] }
 0x469   : > { %v10079_v35 = vadd.f32 %v7241_v40, %v9880_v43  ;;  %6976 = vmatpush1.bf16.msra.mxu1 %v6975_v32 }
 0x46a   : > { %v3040_v6 = vpop.f32.mrb[126].mxu0  ;;  %6977 = vmatprep.subr.bf16.mxu1 %v11752_v29 }
 0x46b   : > { %v3042_v15 = vpop.f32.mrb[127].mxu0  ;;  %v4790_v6 = vld [vmem:[#allocation11 + $0x1b0] sm:$0xff] }
 0x46c   : > { %v4791_v15 = vld [vmem:[#allocation11 + $0x1b8] sm:$0xff] }
 0x46d   : > { %v6978_v23 = vpack.c.bf16 %v4791_v15, %v4790_v6  ;;  %v4796_v15 = vld [vmem:[#allocation11 + $0x1e0] sm:$0xff] }
 0x46e   : > { %v3045_v4 = vpop.f32.mrb[128].mxu0 }
 0x46f   : > { %v3047_v56 = vpop.f32.mrb[129].mxu0  ;;  %6979 = vmatpush1.bf16.msra.mxu1 %v6978_v23  ;;  %v4797_v23 = vld [vmem:[#allocation11 + $0x1e8] sm:$0xff] }
 0x470   : > { %6980 = vmatprep.subr.bf16.mxu1 %v11752_v29  ;;  %v4793_v56 = vld [vmem:[#allocation11 + $0x1c8] sm:$0xff] }
 0x472   : > { %v3050_v5 = vpop.f32.mrb[130].mxu0 }
 0x473   : > { %v3052_v22 = vpop.f32.mrb[131].mxu0  ;;  %v6981_v5 = vpack.c.bf16 %v4793_v56, %v4792_v0 }
 0x475   : > { %6982 = vmatpush1.bf16.msra.mxu1 %v6981_v5  ;;  %v3778_v5 = vlaneseq }
 0x476   : > { %v3120_v26 = vpop.f32.mrb[132].mxu0  ;;  %6983 = vmatprep.subr.bf16.mxu1 %v11752_v29 }
 0x477   : > { %v3122_v39 = vpop.f32.mrb[133].mxu0  ;;  %v4795_v26 = vld [vmem:[#allocation11 + $0x1d8] sm:$0xff] }
 0x478   : > { %v6984_v39 = vpack.c.bf16 %v4795_v26, %v4794_v46  ;;  %v10087_v26 = vshrl.u32 %v3778_v5, 7 }
 0x47a   : > { %v3125_v43 = vpop.f32.mrb[134].mxu0  ;;  %6985 = vmatpush1.bf16.msra.mxu1 %v6984_v39  ;;  %v6990_v39 = vpack.c.bf16 %v4799_v2, %v4798_v31  ;;  %v10091_v52 = vadd.s32 16, %v10087_v26  ;;  %vm3782_vm2 = vcmp.ge.s32.totalorder %v10087_v26, 1 }
 0x47b   : > { %v3127_v40 = vpop.f32.mrb[135].mxu0  ;;  %6986 = vmatprep.subr.bf16.mxu1 %v11752_v29 }
 0x47c   : > { %11939 = vst [vmem:[#allocation84_spill] sm:$0xff] %v10091_v52  ;;  %vm3793_vm3 = vcmp.le.s32.totalorder %v10091_v52, 16  ;;  %v11992_v52 = vmov 0.0  }
 0x47e   : > { %v3130_v47 = vpop.f32.mrb[136].mxu0 }
 0x47f   : > { %v3132_v4 = vpop.f32.mrb[137].mxu0 }
 0x480   : > { %v6987_v4 = vpack.c.bf16 %v4797_v23, %v4796_v15 }
 0x482   : > { %6988 = vmatpush1.bf16.msra.mxu1 %v6987_v4 }
 0x483   : > { %6989 = vmatprep.subr.bf16.mxu1 %v11752_v29 }
 0x486   : > { %v3140_v22 = vpop.f32.mrb[8].mxu0  ;;  %6991 = vmatpush1.bf16.msra.mxu1 %v6990_v39 }
 0x487   : > { %v3142_v59 = vpop.f32.mrb[9].mxu0  ;;  %6992 = vmatprep.subr.bf16.mxu1 %v11752_v29  ;;  %v7153_v4 = vadd.f32 %v9785_v48, %v3140_v22 }
 0x48a   : > { %v3145_v32 = vpop.f32.mrb[10].mxu0 }
 0x48b   : > { %v3147_v43 = vpop.f32.mrb[11].mxu0  ;;  %v7154_v15 = vadd.f32 %v9785_v48, %v3145_v32 }
 0x48e   : > { %v3150_v40 = vpop.f32.mrb[12].mxu0 }
 0x48f   : > { %v3152_v6 = vpop.f32.mrb[13].mxu0 }
 0x492   : > { %v3155_v47 = vpop.f32.mrb[14].mxu0 }
 0x493   : > { %v3157_v0 = vpop.f32.mrb[15].mxu0  ;;  %v7156_v5 = vadd.f32 %v9785_v48, %v3155_v47 }
 0x496   : > { %v6513_v56 = vpop.f32.mrb[138].mxu0 }
 0x497   : > { %v3455_v59 = vpop.f32.mrb[139].mxu0 }
 0x49a   : > { %v6516_v46 = vpop.f32.mrb[6].mxu0 }
 0x49b   : > { %v7152_v43 = vadd.f32 %v6516_v46, %v9785_v48  ;;  %v3465_v6 = vpop.f32.mrb[7].mxu0  ;;  %v7155_v46 = vadd.f32 %v9785_v48, %v3150_v40 }
 0x49d   : > { %v10094_v23 = vmax.f32 %v7152_v43, 0.0 }
 0x49e   : > { %v6519_v0 = vpop.f32.mrb[140].mxu0 }
 0x49f   : > { %v3481_v56 = vadd.f32 %v7154_v15, %v6519_v0  ;;  %v3475_v2 = vpop.f32.mrb[141].mxu0  ;;  %v10104_v32 = vsel %vm3782_vm2, %v10094_v23, 0.0 }
 0x4a0   : > { %v3476_v31 = vadd.f32 %v7153_v4, %v3475_v2  ;;  %v4003_v0 = vrot.slane %v10104_v32, 1 }
 0x4a1   : > { %v3729_v59 = vmax.f32 %v3481_v56, 0.0 }
 0x4a2   : > { %v10107_v39 = vmax.f32 %v3476_v31, 0.0  ;;  %v6522_v22 = vpop.f32.mrb[142].mxu0 }
 0x4a3   : > { %v10111_v43 = vsel %vm3793_vm3, %v3729_v59, 0.0  ;;  %v3491_v6 = vadd.f32 %v7156_v5, %v6522_v22  ;;  %v3485_v15 = vpop.f32.mrb[143].mxu0 }
 0x4a4   : > { %v4006_v4 = vrot.slane %v10111_v43, 1  ;;  %v3486_v47 = vadd.f32 %v7155_v46, %v3485_v15  ;;  %v4004_v2 = vrot.slane %v10107_v39, 1 }
 0x4a5   : > { %v10116_v25 = vmax.f32 %v3491_v6, 0.0 }
 0x4a6   : > { %v10118_v56 = vmax.f32 %v3486_v47, 0.0  ;;  %v6525_v48 = vpop.f32.mrb[144].mxu0  ;;  %v10121_v40 = vsel %vm678_vm0, %v4003_v0, %v4004_v2  ;;  %v10130_v46 = vsel %vm678_vm0, %v4004_v2, %v4006_v4 }
 0x4a7   : > { %11940 = vst [vmem:[#allocation85_spill] sm:$0xff] %v10121_v40  ;;  %v3501_v31 = vadd.f32 %v9803_v11, %v6525_v48  ;;  %v3495_v59 = vpop.f32.mrb[145].mxu0  ;;  %4993 = vmatprep.mubr.f32.mxu1 %v10121_v40  ;;  %11941 = vst [vmem:[#allocation82_spill] sm:$0xff] %v10130_v46  ;;  %v4009_v6 = vrot.slane %v10116_v25, 1 }
 0x4a8   : > { %v3496_v5 = vadd.f32 %v9795_v27, %v3495_v59  ;;  %6315 = vmatmul.mubr.msk.f32.gmra.mrb[96].mxu1 %vm3782_vm2, %v10094_v23  ;;  %v10135_v22 = vsel %vm3782_vm2, %v10118_v56, 0.0 }
 0x4a9   : > { %4998 = vmatprep.mubr.f32.mxu1 %v10130_v46  ;;  %v4008_v11 = vrot.slane %v10135_v22, 1  ;;  %v10140_v47 = vmax.f32 %v3501_v31, 0.0 }
 0x4aa   : > { %v3732_v15 = vmax.f32 %v3496_v5, 0.0  ;;  %v6528_v27 = vpop.f32.mrb[146].mxu0 }
 0x4ab   : > { %11942 = vst [vmem:[#allocation87_spill] sm:$0xff] %v10140_v47  ;;  %v3511_v0 = vadd.f32 %v9820_v42, %v6528_v27  ;;  %v3505_v48 = vpop.f32.mrb[147].mxu0  ;;  %v10144_v4 = vsel %vm678_vm0, %v4008_v11, %v4009_v6 }
 0x4ac   : > { %11943 = vst [vmem:[#allocation89_spill] sm:$0xff] %v10144_v4  ;;  %v10148_v2 = vsel %vm3793_vm3, %v3732_v15, 0.0  ;;  %v3506_v59 = vadd.f32 %v9811_v63, %v3505_v48  ;;  %4999 = vmatmul.mubr.f32.gmra.mrb[98].mxu1 %v10107_v39  ;;  %v10163_v63 = vsel %vm3782_vm2, %v10140_v47, 0.0 }
 0x4ad   : > { %v4011_v46 = vrot.slane %v10148_v2, 1  ;;  %v3735_v5 = vmax.f32 %v3511_v0, 0.0  ;;  %5003 = vmatprep.mubr.f32.mxu1 %v10144_v4  ;;  %11945 = vst [vmem:[#allocation22_spill] sm:$0xff] %v10163_v63  ;;  %v4013_v48 = vrot.slane %v10163_v63, 1 }
 0x4ae   : > { %v10154_v31 = vmax.f32 %v3506_v59, 0.0  ;;  %v6531_v42 = vpop.f32.mrb[148].mxu0 }
 0x4af   : > { %v3521_v27 = vadd.f32 %v9836_v51, %v6531_v42  ;;  %v3515_v11 = vpop.f32.mrb[149].mxu0  ;;  %v10158_v40 = vsel %vm678_vm0, %v4009_v6, %v4011_v46  ;;  %v10172_v51 = vsel %vm3793_vm3, %v3735_v5, 0.0 }
 0x4b0   : > { %11944 = vst [vmem:[#allocation55_spill] sm:$0xff] %v10158_v40  ;;  %v3516_v15 = vadd.f32 %v9828_v24, %v3515_v11  ;;  %6316 = vmatmul.mubr.msk.f32.gmra.mrb[100].mxu1 %vm3782_vm2, %v10118_v56  ;;  %v4014_v0 = vrot.slane %v10154_v31, 1  ;;  %11946 = vst [vmem:[#allocation58_spill] sm:$0xff] %v10172_v51  ;;  %v4016_v42 = vrot.slane %v10172_v51, 1 }
 0x4b1   : > { %5008 = vmatprep.mubr.f32.mxu1 %v10158_v40 }
 0x4b2   : > { %v10175_v46 = vmax.f32 %v3516_v15, 0.0  ;;  %v6534_v6 = vpop.f32.mrb[150].mxu0  ;;  %v10183_v4 = vsel %vm678_vm0, %v4013_v48, %v4014_v0  ;;  %v10191_v15 = vmax.f32 %v3521_v27, 0.0  ;;  %v10199_v48 = vsel %vm678_vm0, %v4014_v0, %v4016_v42 }
 0x4b3   : > { %v3531_v59 = vadd.f32 %v9853_v18, %v6534_v6  ;;  %v3525_v24 = vpop.f32.mrb[151].mxu0  ;;  %11948 = vst [vmem:[#allocation60_spill] sm:$0xff] %v10183_v4  ;;  %11950 = vst [vmem:[#allocation62_spill] sm:$0xff] %v10199_v48 }
 0x4b4   : > { %11947 = vst [vmem:[#allocation23_spill] sm:$0xff] %v10175_v46  ;;  %v3526_v11 = vadd.f32 %v9845_v60, %v3525_v24  ;;  %5009 = vmatmul.mubr.f32.gmra.mrb[102].mxu1 %v10116_v25  ;;  %v10189_v5 = vsel %vm3782_vm2, %v10175_v46, 0.0 }
 0x4b5   : > { %5013 = vmatprep.mubr.f32.mxu1 %v10183_v4  ;;  %11949 = vst [vmem:[#allocation24_spill] sm:$0xff] %v10189_v5  ;;  %v4018_v24 = vrot.slane %v10189_v5, 1 }
 0x4b6   : > { %v3738_v18 = vmax.f32 %v3526_v11, 0.0  ;;  %v6537_v6 = vpop.f32.mrb[152].mxu0 }
 0x4b7   : > { %v3541_v40 = vadd.f32 %v9870_v57, %v6537_v6  ;;  %v3535_v51 = vpop.f32.mrb[153].mxu0  ;;  %v4019_v57 = vrot.slane %v10191_v15, 1  ;;  %v10208_v6 = vmax.f32 %v3531_v59, 0.0 }
 0x4b8   : > { %v3536_v60 = vadd.f32 %v9861_v14, %v3535_v51  ;;  %6317 = vmatmul.mubr.msk.f32.gmra.mrb[104].mxu1 %vm3782_vm2, %v10140_v47  ;;  %v10204_v27 = vsel %vm3793_vm3, %v3738_v18, 0.0 }
 0x4b9   : > { %5018 = vmatprep.mubr.f32.mxu1 %v10199_v48  ;;  %11951 = vst [vmem:[#allocation25_spill] sm:$0xff] %v10208_v6  ;;  %v4021_v4 = vrot.slane %v10204_v27, 1  ;;  %v10217_v18 = vsel %vm678_vm0, %v4018_v24, %v4019_v57  ;;  %v3741_v48 = vmax.f32 %v3541_v40, 0.0 }
 0x4ba   : > { %v6540_v11 = vpop.f32.mrb[154].mxu0  ;;  %v10212_v0 = vmax.f32 %v3536_v60, 0.0  ;;  %11952 = vst [vmem:[#allocation65_spill] sm:$0xff] %v10217_v18 }
 0x4bb   : > { %v3551_v14 = vadd.f32 %v9886_v16, %v6540_v11  ;;  %v3545_v51 = vpop.f32.mrb[155].mxu0  ;;  %v10224_v16 = vsel %vm3782_vm2, %v10208_v6, 0.0 }
 0x4bc   : > { %v3546_v42 = vadd.f32 %v9878_v37, %v3545_v51  ;;  %5019 = vmatmul.mubr.f32.gmra.mrb[106].mxu1 %v10154_v31  ;;  %v10231_v37 = vsel %vm678_vm0, %v4019_v57, %v4021_v4  ;;  %v4024_v40 = vrot.slane %v10212_v0, 1 }
 0x4bd   : > { %5023 = vmatprep.mubr.f32.mxu1 %v10217_v18  ;;  %11953 = vst [vmem:[#allocation26_spill] sm:$0xff] %v10231_v37 }
 0x4be   : > { %v6543_v5 = vpop.f32.mrb[156].mxu0 }
 0x4bf   : > { %v3561_v59 = vadd.f32 %v9899_v28, %v6543_v5  ;;  %v3555_v63 = vpop.f32.mrb[157].mxu0  ;;  %v10236_v28 = vsel %vm3793_vm3, %v3741_v48, 0.0  ;;  %v10238_v5 = vmax.f32 %v3546_v42, 0.0 }
 0x4c0   : > { %v3556_v60 = vadd.f32 %v9893_v58, %v3555_v63  ;;  %6318 = vmatmul.mubr.msk.f32.gmra.mrb[108].mxu1 %vm3782_vm2, %v10175_v46  ;;  %11954 = vst [vmem:[#allocation67_spill] sm:$0xff] %v10236_v28  ;;  %v4023_v58 = vrot.slane %v10224_v16, 1  ;;  %v4026_v51 = vrot.slane %v10236_v28, 1 }
 0x4c1   : > { %11955 = vst [vmem:[#allocation27_spill] sm:$0xff] %v10238_v5  ;;  %5028 = vmatprep.mubr.f32.mxu1 %v10231_v37  ;;  %v10253_v42 = vsel %vm3782_vm2, %v10238_v5, 0.0  ;;  %v10255_v37 = vmax.f32 %v3551_v14, 0.0 }
 0x4c2   : > { %v6546_v24 = vpop.f32.mrb[158].mxu0  ;;  %v10247_v57 = vsel %vm678_vm0, %v4023_v58, %v4024_v40  ;;  %v3744_v48 = vmax.f32 %v3556_v60, 0.0  ;;  %11957 = vst [vmem:[#allocation28_spill] sm:$0xff] %v10253_v42  ;;  %v10263_v60 = vsel %vm678_vm0, %v4024_v40, %v4026_v51  ;;  %v4028_v58 = vrot.slane %v10253_v42, 1 }
 0x4c3   : > { %v3571_v63 = vadd.f32 %v9912_v38, %v6546_v24  ;;  %v3565_v11 = vpop.f32.mrb[159].mxu0  ;;  %11956 = vst [vmem:[#allocation69_spill] sm:$0xff] %v10247_v57  ;;  %11958 = vst [vmem:[#allocation72_spill] sm:$0xff] %v10263_v60 }
 0x4c4   : > { %v3566_v4 = vadd.f32 %v9906_v1, %v3565_v11  ;;  %5029 = vmatmul.mubr.f32.gmra.mrb[110].mxu1 %v10191_v15  ;;  %v10268_v11 = vsel %vm3793_vm3, %v3744_v48, 0.0 }
 0x4c5   : > { %5033 = vmatprep.mubr.f32.mxu1 %v10247_v57  ;;  %v4031_v57 = vrot.slane %v10268_v11, 1 }
 0x4c6   : > { %v6549_v38 = vpop.f32.mrb[160].mxu0  ;;  %v10276_v40 = vmax.f32 %v3566_v4, 0.0  ;;  %v11961_v4 = vld [vmem:[#allocation75_spill] sm:$0xff] }
 0x4c7   : > { %v3581_v24 = vadd.f32 %v9925_v3, %v6549_v38  ;;  %v3575_v18 = vpop.f32.mrb[161].mxu0  ;;  %v4029_v3 = vrot.slane %v10255_v37, 1  ;;  %v10272_v38 = vmax.f32 %v3561_v59, 0.0 }
 0x4c8   : > { %v3576_v1 = vadd.f32 %v9918_v10, %v3575_v18  ;;  %6319 = vmatmul.mubr.msk.f32.gmra.mrb[112].mxu1 %vm3782_vm2, %v10208_v6 }
 0x4c9   : > { %5038 = vmatprep.mubr.f32.mxu1 %v10263_v60  ;;  %11959 = vst [vmem:[#allocation29_spill] sm:$0xff] %v10272_v38  ;;  %v10281_v48 = vsel %vm678_vm0, %v4028_v58, %v4029_v3  ;;  %v3747_v60 = vmax.f32 %v3571_v63, 0.0  ;;  %v4034_v63 = vrot.slane %v10276_v40, 1 }
 0x4ca   : > { %v6552_v14 = vpop.f32.mrb[162].mxu0  ;;  %11960 = vst [vmem:[#allocation74_spill] sm:$0xff] %v10281_v48 }
 0x4cb   : > { %v3591_v10 = vadd.f32 %v9937_v61, %v6552_v14  ;;  %v3585_v18 = vpop.f32.mrb[163].mxu0  ;;  %v10288_v61 = vsel %vm3782_vm2, %v10272_v38, 0.0 }
 0x4cc   : > { %v3586_v51 = vadd.f32 %v9931_v7, %v3585_v18  ;;  %5039 = vmatmul.mubr.f32.gmra.mrb[114].mxu1 %v10212_v0  ;;  %v10295_v7 = vsel %vm678_vm0, %v4029_v3, %v4031_v57 }
 0x4cd   : > { %5043 = vmatprep.mubr.f32.mxu1 %v10281_v48  ;;  %11962 = vst [vmem:[#allocation30_spill] sm:$0xff] %v10295_v7 }
 0x4ce   : > { %v6555_v42 = vpop.f32.mrb[164].mxu0 }
 0x4cf   : > { %v3601_v59 = vadd.f32 %v9961_v34, %v6555_v42  ;;  %v3595_v28 = vpop.f32.mrb[165].mxu0  ;;  %v10300_v34 = vsel %vm3793_vm3, %v3747_v60, 0.0  ;;  %v10302_v42 = vmax.f32 %v3576_v1, 0.0  ;;  %v3750_v60 = vmax.f32 %v3586_v51, 0.0 }
 0x4d0   : > { %v3596_v14 = vadd.f32 %v11961_v4, %v3595_v28  ;;  %6320 = vmatmul.mubr.msk.f32.gmra.mrb[116].mxu1 %vm3782_vm2, %v10238_v5  ;;  %11963 = vst [vmem:[#allocation76_spill] sm:$0xff] %v10300_v34  ;;  %v4033_v28 = vrot.slane %v10288_v61, 1  ;;  %v4036_v48 = vrot.slane %v10300_v34, 1 }
 0x4d1   : > { %5048 = vmatprep.mubr.f32.mxu1 %v10295_v7  ;;  %v10317_v1 = vsel %vm3782_vm2, %v10302_v42, 0.0  ;;  %v10319_v7 = vmax.f32 %v3581_v24, 0.0 }
 0x4d2   : > { %v6558_v58 = vpop.f32.mrb[166].mxu0  ;;  %v10311_v3 = vsel %vm678_vm0, %v4033_v28, %v4034_v63  ;;  %11965 = vst [vmem:[#allocation79_spill] sm:$0xff] %v10317_v1  ;;  %v10327_v51 = vsel %vm678_vm0, %v4034_v63, %v4036_v48  ;;  %v4038_v28 = vrot.slane %v10317_v1, 1  ;;  %v10342_v63 = vmax.f32 %v3596_v14, 0.0 }
 0x4d3   : > { %v3611_v18 = vadd.f32 %v9978_v41, %v6558_v58  ;;  %v3605_v4 = vpop.f32.mrb[167].mxu0  ;;  %11964 = vst [vmem:[#allocation31_spill] sm:$0xff] %v10311_v3  ;;  %11966 = vst [vmem:[#allocation32_spill] sm:$0xff] %v10327_v51 }
 0x4d4   : > { %v3606_v57 = vadd.f32 %v9970_v36, %v3605_v4  ;;  %5049 = vmatmul.mubr.f32.gmra.mrb[118].mxu1 %v10255_v37  ;;  %v10332_v4 = vsel %vm3793_vm3, %v3750_v60, 0.0 }
 0x4d5   : > { %5053 = vmatprep.mubr.f32.mxu1 %v10311_v3  ;;  %v4041_v48 = vrot.slane %v10332_v4, 1 }
 0x4d6   : > { %v6561_v41 = vpop.f32.mrb[168].mxu0 }
 0x4d7   : > { %v3621_v58 = vadd.f32 %v10002_v33, %v6561_v41  ;;  %v3615_v34 = vpop.f32.mrb[169].mxu0  ;;  %v4039_v33 = vrot.slane %v10319_v7, 1  ;;  %v10336_v41 = vmax.f32 %v3591_v10, 0.0 }
 0x4d8   : > { %v3616_v36 = vadd.f32 %v9991_v19, %v3615_v34  ;;  %6321 = vmatmul.mubr.msk.f32.gmra.mrb[120].mxu1 %vm3782_vm2, %v10272_v38 }
 0x4d9   : > { %5058 = vmatprep.mubr.f32.mxu1 %v10327_v51  ;;  %v10347_v60 = vsel %vm678_vm0, %v4038_v28, %v4039_v33  ;;  %v3753_v51 = vmax.f32 %v3601_v59, 0.0  ;;  %v10356_v14 = vsel %vm3782_vm2, %v10336_v41, 0.0  ;;  %v10363_v59 = vsel %vm678_vm0, %v4039_v33, %v4041_v48 }
 0x4da   : > { %v6564_v24 = vpop.f32.mrb[170].mxu0  ;;  %11967 = vst [vmem:[#allocation81_spill] sm:$0xff] %v10347_v60  ;;  %11968 = vst [vmem:[#allocation21_spill] sm:$0xff] %v10363_v59  ;;  %v4044_v28 = vrot.slane %v10342_v63, 1 }
 0x4db   : > { %v10339_v19 = vadd.f32 %v10011_v53, %v6564_v24  ;;  %v3625_v34 = vpop.f32.mrb[171].mxu0  ;;  %v10370_v24 = vmax.f32 %v3606_v57, 0.0  ;;  %v3756_v57 = vmax.f32 %v3616_v36, 0.0 }
 0x4dc   : > { %v3626_v3 = vadd.f32 %v10007_v21, %v3625_v34  ;;  %5059 = vmatmul.mubr.f32.gmra.mrb[122].mxu1 %v10276_v40 }
 0x4dd   : > { %5063 = vmatprep.mubr.f32.mxu1 %v10347_v60 }
 0x4de   : > { %v6567_v10 = vpop.f32.mrb[172].mxu0 }
 0x4df   : > { %v10351_v1 = vadd.f32 %v10020_v9, %v6567_v10  ;;  %v3635_v53 = vpop.f32.mrb[173].mxu0  ;;  %v10368_v9 = vsel %vm3793_vm3, %v3753_v51, 0.0 }
 0x4e0   : > { %v3636_v21 = vadd.f32 %v10015_v45, %v3635_v53  ;;  %6322 = vmatmul.mubr.msk.f32.gmra.mrb[124].mxu1 %vm3782_vm2, %v10302_v42  ;;  %11969 = vst [vmem:[#allocation83_spill] sm:$0xff] %v10368_v9  ;;  %v4043_v45 = vrot.slane %v10356_v14, 1  ;;  %v4046_v33 = vrot.slane %v10368_v9, 1 }
 0x4e1   : > { %5068 = vmatprep.mubr.f32.mxu1 %v10363_v59  ;;  %v10389_v59 = vsel %vm3782_vm2, %v10370_v24, 0.0 }
 0x4e2   : > { %v6570_v34 = vpop.f32.mrb[174].mxu0  ;;  %v10383_v51 = vsel %vm678_vm0, %v4043_v45, %v4044_v28  ;;  %11971 = vst [vmem:[#allocation88_spill] sm:$0xff] %v10389_v59  ;;  %v3375_v60 = vpop.f32.mrb[86].mxu1  ;;  %v10401_v36 = vsel %vm678_vm0, %v4044_v28, %v4046_v33 }
 0x4e3   : > { %v10375_v10 = vadd.f32 %v10029_v55, %v6570_v34  ;;  %v3645_v53 = vpop.f32.mrb[175].mxu0  ;;  %11970 = vst [vmem:[#allocation86_spill] sm:$0xff] %v10383_v51  ;;  %v10391_v55 = vmax.f32 %v3611_v18, 0.0  ;;  %v3377_v9 = vpop.f32.mrb[87].mxu1  ;;  %11972 = vst [vmem:[#allocation90_spill] sm:$0xff] %v10401_v36  ;;  %v10406_v18 = vsel %vm3793_vm3, %v3756_v57, 0.0 }
 0x4e4   : > { %v10379_v48 = vadd.f32 %v10025_v13, %v3645_v53  ;;  %5069 = vmatmul.mubr.f32.gmra.mrb[126].mxu1 %v10319_v7  ;;  %v4051_v33 = vrot.slane %v10406_v18, 1 }
 0x4e5   : > { %5073 = vmatprep.mubr.f32.mxu1 %v10383_v51  ;;  %v4048_v51 = vrot.slane %v10389_v59, 1  ;;  %v4049_v60 = vrot.slane %v10391_v55, 1  ;;  %v10416_v59 = vmax.f32 %v3626_v3, 0.0 }
 0x4e6   : > { %v6573_v34 = vpop.f32.mrb[176].mxu0  ;;  %v3380_v9 = vpop.f32.mrb[88].mxu1 }
 0x4e7   : > { %v10394_v13 = vadd.f32 %v10038_v17, %v6573_v34  ;;  %v3655_v53 = vpop.f32.mrb[177].mxu0  ;;  %v3382_v28 = vpop.f32.mrb[89].mxu1  ;;  %v3759_v9 = vmax.f32 %v10339_v19, 0.0  ;;  %v10438_v19 = vsel %vm678_vm0, %v4049_v60, %v4051_v33 }
 0x4e8   : > { %v3656_v45 = vadd.f32 %v10034_v44, %v3655_v53  ;;  %6323 = vmatmul.mubr.msk.f32.gmra.mrb[128].mxu1 %vm3782_vm2, %v10336_v41  ;;  %v10410_v44 = vmax.f32 %v3621_v58, 0.0  ;;  %11974 = vst [vmem:[#allocation40_spill] sm:$0xff] %v10438_v19 }
 0x4e9   : > { %5078 = vmatprep.mubr.f32.mxu1 %v10401_v36  ;;  %v10421_v36 = vsel %vm678_vm0, %v4048_v51, %v4049_v60  ;;  %v4054_v51 = vrot.slane %v10416_v59, 1 }
 0x4ea   : > { %v6576_v17 = vpop.f32.mrb[178].mxu0  ;;  %11973 = vst [vmem:[#allocation91_spill] sm:$0xff] %v10421_v36  ;;  %v10431_v3 = vsel %vm3782_vm2, %v10410_v44, 0.0 }
 0x4eb   : > { %v10413_v34 = vadd.f32 %v10047_v49, %v6576_v17  ;;  %v3665_v53 = vpop.f32.mrb[179].mxu0  ;;  %v3385_v49 = vpop.f32.mrb[90].mxu1 }
 0x4ec   : > { %v3666_v57 = vadd.f32 %v10042_v20, %v3665_v53  ;;  %5079 = vmatmul.mubr.f32.gmra.mrb[130].mxu1 %v10342_v63  ;;  %v3387_v20 = vpop.f32.mrb[91].mxu1 }
 0x4ed   : > { %5083 = vmatprep.mubr.f32.mxu1 %v10421_v36 }
 0x4ee   : > { %v6579_v58 = vpop.f32.mrb[180].mxu0 }
 0x4ef   : > { %v10426_v17 = vadd.f32 %v10056_v54, %v6579_v58  ;;  %v3675_v28 = vpop.f32.mrb[181].mxu0  ;;  %v10443_v54 = vsel %vm3793_vm3, %v3759_v9, 0.0  ;;  %v10445_v58 = vmax.f32 %v3636_v21, 0.0  ;;  %v3762_v21 = vmax.f32 %v10379_v48, 0.0 }
 0x4f0   : > { %v3676_v53 = vadd.f32 %v10052_v12, %v3675_v28  ;;  %6324 = vmatmul.mubr.msk.f32.gmra.mrb[132].mxu1 %vm3782_vm2, %v10370_v24  ;;  %v4053_v12 = vrot.slane %v10431_v3, 1  ;;  %v4056_v60 = vrot.slane %v10443_v54, 1 }
 0x4f1   : > { %5088 = vmatprep.mubr.f32.mxu1 %v10438_v19  ;;  %v10463_v19 = vsel %vm3782_vm2, %v10445_v58, 0.0 }
 0x4f2   : > { %v6582_v49 = vpop.f32.mrb[182].mxu0  ;;  %v10456_v9 = vsel %vm678_vm0, %v4053_v12, %v4054_v51  ;;  %v10478_v48 = vsel %vm678_vm0, %v4054_v51, %v4056_v60 }
 0x4f3   : > { %v10450_v28 = vadd.f32 %v10065_v50, %v6582_v49  ;;  %v3685_v20 = vpop.f32.mrb[183].mxu0  ;;  %11975 = vst [vmem:[#allocation41_spill] sm:$0xff] %v10456_v9  ;;  %v10466_v50 = vmax.f32 %v10351_v1, 0.0  ;;  %11977 = vst [vmem:[#allocation43_spill] sm:$0xff] %v10478_v48  ;;  %v10483_v1 = vsel %vm3793_vm3, %v3762_v21, 0.0  ;;  %v3765_v21 = vmax.f32 %v10394_v13, 0.0 }
 0x4f4   : > { %v3686_v33 = vadd.f32 %v10061_v30, %v3685_v20  ;;  %5089 = vmatmul.mubr.f32.gmra.mrb[134].mxu1 %v10391_v55  ;;  %v4061_v36 = vrot.slane %v10483_v1, 1  ;;  %v10518_v13 = vmax.f32 %v3666_v57, 0.0  ;;  %v10534_v57 = vmax.f32 %v10413_v34, 0.0 }
 0x4f5   : > { %5093 = vmatprep.mubr.f32.mxu1 %v10456_v9  ;;  %v4058_v9 = vrot.slane %v10463_v19, 1  ;;  %v10550_v34 = vmax.f32 %v10426_v17, 0.0 }
 0x4f6   : > { %v6585_v49 = vpop.f32.mrb[184].mxu0  ;;  %11982 = vst [vmem:[#allocation48_spill] sm:$0xff] %v10518_v13  ;;  %11984 = vst [vmem:[#allocation51_spill] sm:$0xff] %v10534_v57 }
 0x4f7   : > { %v10469_v30 = vadd.f32 %v10074_v62, %v6585_v49  ;;  %v3695_v20 = vpop.f32.mrb[185].mxu0  ;;  %v4059_v49 = vrot.slane %v10466_v50, 1  ;;  %11986 = vst [vmem:[#allocation66_spill] sm:$0xff] %v10550_v34 }
 0x4f8   : > { %v10472_v12 = vadd.f32 %v10069_v8, %v3695_v20  ;;  %6325 = vmatmul.mubr.msk.f32.gmra.mrb[136].mxu1 %vm3782_vm2, %v10410_v44  ;;  %v10488_v8 = vmax.f32 %v10375_v10, 0.0 }
 0x4f9   : > { %11976 = vst [vmem:[#allocation42_spill] sm:$0xff] %v10469_v30  ;;  %5098 = vmatprep.mubr.f32.mxu1 %v10478_v48  ;;  %v10491_v30 = vmax.f32 %v3656_v45, 0.0  ;;  %v10498_v60 = vsel %vm678_vm0, %v4058_v9, %v4059_v49  ;;  %v10516_v9 = vsel %vm3793_vm3, %v3765_v21, 0.0  ;;  %v4803_v48 = vld [vmem:[#allocation11 + $0x218] sm:$0xff] }
 0x4fa   : > { %v6588_v62 = vpop.f32.mrb[186].mxu0  ;;  %11980 = vst [vmem:[#allocation46_spill] sm:$0xff] %v10498_v60  ;;  %v10505_v10 = vsel %vm3782_vm2, %v10488_v8, 0.0 }
 0x4fb   : > { %v3705_v20 = vpop.f32.mrb[187].mxu0  ;;  %11978 = vst [vmem:[#allocation44_spill] sm:$0xff] %v10491_v30  ;;  %v4064_v45 = vrot.slane %v10491_v30, 1  ;;  %v4063_v62 = vrot.slane %v10505_v10, 1 }
 0x4fc   : > { %v10494_v51 = vadd.f32 %v10079_v35, %v3705_v20  ;;  %5099 = vmatmul.mubr.f32.gmra.mrb[138].mxu1 %v10416_v59  ;;  %v10511_v35 = vsel %vm678_vm0, %v4059_v49, %v4061_v36  ;;  %v4066_v20 = vrot.slane %v10516_v9, 1  ;;  %v3768_v36 = vmax.f32 %v3676_v53, 0.0 }
 0x4fd   : > { %5103 = vmatprep.mubr.f32.mxu1 %v10498_v60  ;;  %11981 = vst [vmem:[#allocation47_spill] sm:$0xff] %v10511_v35  ;;  %v10531_v49 = vsel %vm3782_vm2, %v10518_v13, 0.0  ;;  %v10553_v60 = vmax.f32 %v3686_v33, 0.0 }
 0x4fe   : > { %11979 = vst [vmem:[#allocation45_spill] sm:$0xff] %v10494_v51  ;;  %v10525_v51 = vsel %vm678_vm0, %v4063_v62, %v4064_v45  ;;  %v10540_v21 = vsel %vm678_vm0, %v4064_v45, %v4066_v20  ;;  %v4068_v62 = vrot.slane %v10531_v49, 1  ;;  %v10545_v53 = vsel %vm3793_vm3, %v3768_v36, 0.0 }
 0x4ff   : > { %11983 = vst [vmem:[#allocation50_spill] sm:$0xff] %v10525_v51  ;;  %11985 = vst [vmem:[#allocation53_spill] sm:$0xff] %v10540_v21  ;;  %v3771_v20 = vmax.f32 %v10450_v28, 0.0  ;;  %v10564_v36 = vsel %vm3782_vm2, %v10550_v34, 0.0  ;;  %v4074_v33 = vrot.slane %v10553_v60, 1 }
 0x500   : > { %6326 = vmatmul.mubr.msk.f32.gmra.mrb[140].mxu1 %vm3782_vm2, %v10445_v58  ;;  %11987 = vst [vmem:[#allocation92_spill] sm:$0xff] %v10553_v60  ;;  %v4073_v28 = vrot.slane %v10564_v36, 1 }
 0x501   : > { %5108 = vmatprep.mubr.f32.mxu1 %v10511_v35  ;;  %v4071_v35 = vrot.slane %v10545_v53, 1 }
 0x504   : > { %5109 = vmatmul.mubr.f32.gmra.mrb[142].mxu1 %v10466_v50 }
 0x505   : > { %5113 = vmatprep.mubr.f32.mxu1 %v10525_v51  ;;  %v4069_v51 = vrot.slane %v10534_v57, 1 }
 0x507   : > { %v10557_v45 = vsel %vm678_vm0, %v4068_v62, %v4069_v51  ;;  %v10570_v17 = vsel %vm678_vm0, %v4069_v51, %v4071_v35  ;;  %v10575_v62 = vsel %vm3793_vm3, %v3771_v20, 0.0  ;;  %v4800_v35 = vld [vmem:[#allocation11 + $0x200] sm:$0xff]  ;;  %v4801_v20 = vld [vmem:[#allocation11 + $0x208] sm:$0xff] }
 0x508   : > { %6327 = vmatmul.mubr.msk.f32.gmra.mrb[144].mxu1 %vm3782_vm2, %v10488_v8  ;;  %11988 = vst [vmem:[#allocation93_spill] sm:$0xff] %v10557_v45  ;;  %11989 = vst [vmem:[#allocation94_spill] sm:$0xff] %v10570_v17 }
 0x509   : > { %5118 = vmatprep.mubr.f32.mxu1 %v10540_v21  ;;  %v10582_v21 = vsel %vm678_vm0, %v4073_v28, %v4074_v33  ;;  %v6993_v28 = vpack.c.bf16 %v4801_v20, %v4800_v35  ;;  %v4806_v20 = vld [vmem:[#allocation11 + $0x230] sm:$0xff] }
 0x50a   : > { %11990 = vst [vmem:[#allocation95_spill] sm:$0xff] %v10582_v21 }
 0x50c   : > { %5119 = vmatmul.mubr.f32.gmra.mrb[146].mxu1 %v10491_v30 }
 0x50d   : > { %5123 = vmatprep.mubr.f32.mxu1 %v10557_v45  ;;  %v4076_v45 = vrot.slane %v10575_v62, 1 }
 0x50f   : > { %v10589_v51 = vsel %vm678_vm0, %v4074_v33, %v4076_v45  ;;  %v4804_v33 = vld [vmem:[#allocation11 + $0x220] sm:$0xff] }
 0x510   : > { %6328 = vmatmul.mubr.msk.f32.gmra.mrb[148].mxu1 %vm3782_vm2, %v10518_v13  ;;  %11991 = vst [vmem:[#allocation96_spill] sm:$0xff] %v10589_v51 }
 0x511   : > { %5128 = vmatprep.mubr.f32.mxu1 %v10570_v17  ;;  %v10594_v17 = vrot.slane %v11992_v52, 2  ;;  %v4232_v52 = vrot.slane %v10107_v39, 2 }
 0x513   : > { %11993 = vst [vmem:[#allocation97_spill] sm:$0xff] %v10594_v17 }
 0x514   : > { %5129 = vmatmul.mubr.f32.gmra.mrb[150].mxu1 %v10534_v57 }
 0x515   : > { %5133 = vmatprep.mubr.f32.mxu1 %v10582_v21  ;;  %v4802_v21 = vld [vmem:[#allocation11 + $0x210] sm:$0xff] }
 0x516   : > { %v6996_v45 = vpack.c.bf16 %v4803_v48, %v4802_v21  ;;  %v4807_v48 = vld [vmem:[#allocation11 + $0x238] sm:$0xff]  ;;  %v4234_v21 = vrot.slane %v10111_v43, 2  ;;  %v4237_v43 = vrot.slane %v10116_v25, 2 }
 0x518   : > { %6329 = vmatmul.mubr.msk.f32.gmra.mrb[152].mxu1 %vm3782_vm2, %v10550_v34 }
 0x519   : > { %5138 = vmatprep.mubr.f32.mxu1 %v10589_v51  ;;  %v4805_v51 = vld [vmem:[#allocation11 + $0x228] sm:$0xff] }
 0x51a   : > { %v6999_v35 = vpack.c.bf16 %v4805_v51, %v4804_v33  ;;  %v10617_v51 = vsel %vm1049_vm1, %v4232_v52, %v4234_v21  ;;  %v4236_v33 = vrot.slane %v10135_v22, 2  ;;  %v4812_v21 = vld [vmem:[#allocation11 + $0x260] sm:$0xff] }
 0x51c   : > { %5139 = vmatmul.mubr.f32.gmra.mrb[154].mxu1 %v10553_v60 }
 0x51d   : > { %6330 = vmatprep.mubr.msk.f32.mxu1 %vm3782_vm2, %v10094_v23  ;;  %v4231_v23 = vrot.slane %v10104_v32, 2  ;;  %v4808_v32 = vld [vmem:[#allocation11 + $0x240] sm:$0xff] }
 0x520   : > { %5209 = vmatmul.mubr.f32.vlgmr.msra.gmra.mrb[92].mxu1 %v10594_v17 }
 0x521   : > { %5213 = vmatprep.mubr.f32.mxu1 %v10107_v39  ;;  %6994 = vmatpush1.bf16.msra.mxu1 %v6993_v28  ;;  %v10611_v28 = vsel %vm1049_vm1, %v4231_v23, %v4232_v52  ;;  %v7002_v39 = vpack.c.bf16 %v4807_v48, %v4806_v20  ;;  %v4811_v20 = vld [vmem:[#allocation11 + $0x258] sm:$0xff]  ;;  %v4239_v48 = vrot.slane %v10148_v2, 2  ;;  %v10628_v52 = vsel %vm1049_vm1, %v4236_v33, %v4237_v43  ;;  %v11995_v2 = vld [vmem:[#allocation22_spill] sm:$0xff] }
 0x522   : > { %6995 = vmatprep.subr.bf16.mxu1 %v11752_v29  ;;  %v4241_v33 = vrot.slane %v11995_v2, 2  ;;  %v4816_v2 = vld [vmem:[#allocation11 + $0x280] sm:$0xff] }
 0x524   : > { %5214 = vmatmul.mubr.f32.gmra.mrb[94].mxu1 %v10594_v17  ;;  %v11996_v17 = vld [vmem:[#allocation58_spill] sm:$0xff] }
 0x525   : > { %6331 = vmatprep.mubr.msk.f32.mxu1 %vm3782_vm2, %v10118_v56  ;;  %6997 = vmatpush1.bf16.msra.mxu1 %v6996_v45  ;;  %v4809_v45 = vld [vmem:[#allocation11 + $0x248] sm:$0xff] }
 0x526   : > { %6998 = vmatprep.subr.bf16.mxu1 %v11752_v29  ;;  %v7005_v23 = vpack.c.bf16 %v4809_v45, %v4808_v32  ;;  %v10634_v32 = vsel %vm1049_vm1, %v4237_v43, %v4239_v48  ;;  %v4242_v45 = vrot.slane %v10154_v31, 2 }
 0x527   : > { %11994 = vst [vmem:[#allocation98_spill] sm:$0xff] %v10634_v32 }
 0x528   : > { %5219 = vmatmul.mubr.f32.gmra.mrb[96].mxu1 %v10611_v28  ;;  %v10645_v43 = vsel %vm1049_vm1, %v4241_v33, %v4242_v45 }
 0x529   : > { %5223 = vmatprep.mubr.f32.mxu1 %v10116_v25  ;;  %7000 = vmatpush1.bf16.msra.mxu1 %v6999_v35  ;;  %v4810_v35 = vld [vmem:[#allocation11 + $0x250] sm:$0xff]  ;;  %11997 = vst [vmem:[#allocation99_spill] sm:$0xff] %v10645_v43 }
 0x52a   : > { %7001 = vmatprep.subr.bf16.mxu1 %v11752_v29  ;;  %v7008_v22 = vpack.c.bf16 %v4811_v20, %v4810_v35  ;;  %v4814_v35 = vld [vmem:[#allocation11 + $0x270] sm:$0xff]  ;;  %v4815_v20 = vld [vmem:[#allocation11 + $0x278] sm:$0xff] }
 0x52b   : > { %v7014_v48 = vpack.c.bf16 %v4815_v20, %v4814_v35  ;;  %v4819_v35 = vld [vmem:[#allocation11 + $0x298] sm:$0xff]  ;;  %v4249_v20 = vrot.slane %v10204_v27, 2 }
 0x52c   : > { %5224 = vmatmul.mubr.f32.gmra.mrb[98].mxu1 %v10617_v51 }
 0x52d   : > { %6332 = vmatprep.mubr.msk.f32.mxu1 %vm3782_vm2, %v10140_v47  ;;  %7003 = vmatpush1.bf16.msra.mxu1 %v7002_v39  ;;  %v4813_v39 = vld [vmem:[#allocation11 + $0x268] sm:$0xff]  ;;  %v4244_v47 = vrot.slane %v11996_v17, 2  ;;  %v4247_v17 = vrot.slane %v10191_v15, 2 }
 0x52e   : > { %7004 = vmatprep.subr.bf16.mxu1 %v11752_v29 }
 0x530   : > { %5229 = vmatmul.mubr.f32.gmra.mrb[100].mxu1 %v10628_v52 }
 0x531   : > { %5233 = vmatprep.mubr.f32.mxu1 %v10154_v31  ;;  %7006 = vmatpush1.bf16.msra.mxu1 %v7005_v23  ;;  %v7011_v23 = vpack.c.bf16 %v4813_v39, %v4812_v21  ;;  %v10651_v21 = vsel %vm1049_vm1, %v4242_v45, %v4244_v47  ;;  %v11999_v39 = vld [vmem:[#allocation24_spill] sm:$0xff] }
 0x532   : > { %7007 = vmatprep.subr.bf16.mxu1 %v11752_v29  ;;  %11998 = vst [vmem:[#allocation100_spill] sm:$0xff] %v10651_v21 }
 0x534   : > { %5234 = vmatmul.mubr.f32.gmra.mrb[102].mxu1 %v10634_v32 }
 0x535   : > { %6333 = vmatprep.mubr.msk.f32.mxu1 %vm3782_vm2, %v10175_v46  ;;  %7009 = vmatpush1.bf16.msra.mxu1 %v7008_v22  ;;  %v4817_v22 = vld [vmem:[#allocation11 + $0x288] sm:$0xff]  ;;  %v4246_v46 = vrot.slane %v11999_v39, 2  ;;  %v4820_v39 = vld [vmem:[#allocation11 + $0x2a0] sm:$0xff] }
 0x536   : > { %7010 = vmatprep.subr.bf16.mxu1 %v11752_v29  ;;  %v7017_v33 = vpack.c.bf16 %v4817_v22, %v4816_v2  ;;  %v10668_v2 = vsel %vm1049_vm1, %v4247_v17, %v4249_v20  ;;  %v4252_v22 = vrot.slane %v10212_v0, 2 }
 0x537   : > { %v10662_v47 = vsel %vm1049_vm1, %v4246_v46, %v4247_v17  ;;  %12001 = vst [vmem:[#allocation102_spill] sm:$0xff] %v10668_v2  ;;  %v4251_v46 = vrot.slane %v10224_v16, 2  ;;  %v4824_v16 = vld [vmem:[#allocation11 + $0x2c0] sm:$0xff] }
 0x538   : > { %5239 = vmatmul.mubr.f32.gmra.mrb[104].mxu1 %v10645_v43  ;;  %12000 = vst [vmem:[#allocation101_spill] sm:$0xff] %v10662_v47 }
 0x539   : > { %5243 = vmatprep.mubr.f32.mxu1 %v10191_v15  ;;  %7012 = vmatpush1.bf16.msra.mxu1 %v7011_v23  ;;  %v4818_v23 = vld [vmem:[#allocation11 + $0x290] sm:$0xff]  ;;  %v10679_v17 = vsel %vm1049_vm1, %v4251_v46, %v4252_v22  ;;  %v4257_v46 = vrot.slane %v10255_v37, 2  ;;  %v12079_v26 = vld [vmem:[#allocation100_spill] sm:$0xff] }
 0x53a   : > { %7013 = vmatprep.subr.bf16.mxu1 %v11752_v29  ;;  %v7020_v45 = vpack.c.bf16 %v4819_v35, %v4818_v23  ;;  %v4823_v23 = vld [vmem:[#allocation11 + $0x2b8] sm:$0xff]  ;;  %12003 = vst [vmem:[#allocation103_spill] sm:$0xff] %v10679_v17 }
 0x53b   : > { %v12002_v35 = vld [vmem:[#allocation67_spill] sm:$0xff] }
 0x53c   : > { %5244 = vmatmul.mubr.f32.gmra.mrb[106].mxu1 %v10651_v21 }
 0x53d   : > { %6334 = vmatprep.mubr.msk.f32.mxu1 %vm3782_vm2, %v10208_v6  ;;  %7015 = vmatpush1.bf16.msra.mxu1 %v7014_v48  ;;  %v4821_v48 = vld [vmem:[#allocation11 + $0x2a8] sm:$0xff]  ;;  %v4254_v6 = vrot.slane %v12002_v35, 2  ;;  %v4259_v35 = vrot.slane %v10268_v11, 2 }
 0x53e   : > { %7016 = vmatprep.subr.bf16.mxu1 %v11752_v29  ;;  %v7023_v27 = vpack.c.bf16 %v4821_v48, %v4820_v39  ;;  %v12005_v48 = vld [vmem:[#allocation28_spill] sm:$0xff] }
 0x53f   : > { %v10685_v39 = vsel %vm1049_vm1, %v4252_v22, %v4254_v6 }
 0x540   : > { %5249 = vmatmul.mubr.f32.gmra.mrb[108].mxu1 %v10662_v47  ;;  %12004 = vst [vmem:[#allocation104_spill] sm:$0xff] %v10685_v39 }
 0x541   : > { %5253 = vmatprep.mubr.f32.mxu1 %v10212_v0  ;;  %7018 = vmatpush1.bf16.msra.mxu1 %v7017_v33  ;;  %v4822_v33 = vld [vmem:[#allocation11 + $0x2b0] sm:$0xff] }
 0x542   : > { %7019 = vmatprep.subr.bf16.mxu1 %v11752_v29  ;;  %v7026_v20 = vpack.c.bf16 %v4823_v23, %v4822_v33  ;;  %v4826_v33 = vld [vmem:[#allocation11 + $0x2d0] sm:$0xff]  ;;  %v4827_v23 = vld [vmem:[#allocation11 + $0x2d8] sm:$0xff] }
 0x543   : > { %v7032_v22 = vpack.c.bf16 %v4827_v23, %v4826_v33  ;;  %v4831_v33 = vld [vmem:[#allocation11 + $0x2f8] sm:$0xff] }
 0x544   : > { %5254 = vmatmul.mubr.f32.gmra.mrb[110].mxu1 %v10668_v2  ;;  %v12008_v23 = vld [vmem:[#allocation76_spill] sm:$0xff] }
 0x545   : > { %6335 = vmatprep.mubr.msk.f32.mxu1 %vm3782_vm2, %v10238_v5  ;;  %7021 = vmatpush1.bf16.msra.mxu1 %v7020_v45  ;;  %v4825_v45 = vld [vmem:[#allocation11 + $0x2c8] sm:$0xff]  ;;  %v4256_v5 = vrot.slane %v12005_v48, 2  ;;  %v4828_v48 = vld [vmem:[#allocation11 + $0x2e0] sm:$0xff] }
 0x546   : > { %7022 = vmatprep.subr.bf16.mxu1 %v11752_v29 }
 0x547   : > { %v10696_v6 = vsel %vm1049_vm1, %v4256_v5, %v4257_v46  ;;  %v4261_v5 = vrot.slane %v10288_v61, 2 }
 0x548   : > { %5259 = vmatmul.mubr.f32.gmra.mrb[112].mxu1 %v10679_v17  ;;  %12006 = vst [vmem:[#allocation105_spill] sm:$0xff] %v10696_v6 }
 0x549   : > { %5263 = vmatprep.mubr.f32.mxu1 %v10255_v37  ;;  %7024 = vmatpush1.bf16.msra.mxu1 %v7023_v27  ;;  %v7029_v27 = vpack.c.bf16 %v4825_v45, %v4824_v16  ;;  %v10702_v16 = vsel %vm1049_vm1, %v4257_v46, %v4259_v35  ;;  %v4262_v45 = vrot.slane %v10276_v40, 2 }
 0x54a   : > { %7025 = vmatprep.subr.bf16.mxu1 %v11752_v29  ;;  %12007 = vst [vmem:[#allocation106_spill] sm:$0xff] %v10702_v16 }
 0x54b   : > { %v10713_v46 = vsel %vm1049_vm1, %v4261_v5, %v4262_v45  ;;  %v4269_v5 = vrot.slane %v10332_v4, 2  ;;  %v4271_v4 = vrot.slane %v10356_v14, 2  ;;  %v4277_v14 = vrot.slane %v10391_v55, 2 }
 0x54c   : > { %5264 = vmatmul.mubr.f32.gmra.mrb[114].mxu1 %v10685_v39  ;;  %12009 = vst [vmem:[#allocation49_spill] sm:$0xff] %v10713_v46 }
 0x54d   : > { %6336 = vmatprep.mubr.msk.f32.mxu1 %vm3782_vm2, %v10272_v38  ;;  %7027 = vmatpush1.bf16.msra.mxu1 %v7026_v20  ;;  %v4829_v20 = vld [vmem:[#allocation11 + $0x2e8] sm:$0xff]  ;;  %v4264_v38 = vrot.slane %v12008_v23, 2 }
 0x54e   : > { %7028 = vmatprep.subr.bf16.mxu1 %v11752_v29  ;;  %v7035_v11 = vpack.c.bf16 %v4829_v20, %v4828_v48  ;;  %v4267_v20 = vrot.slane %v10319_v7, 2 }
 0x54f   : > { %v10719_v61 = vsel %vm1049_vm1, %v4262_v45, %v4264_v38  ;;  %v4272_v45 = vrot.slane %v10342_v63, 2 }
 0x550   : > { %5269 = vmatmul.mubr.f32.gmra.mrb[116].mxu1 %v10696_v6  ;;  %12010 = vst [vmem:[#allocation33_spill] sm:$0xff] %v10719_v61  ;;  %v10735_v38 = vsel %vm1049_vm1, %v4267_v20, %v4269_v5 }
 0x551   : > { %5273 = vmatprep.mubr.f32.mxu1 %v10276_v40  ;;  %7030 = vmatpush1.bf16.msra.mxu1 %v7029_v27  ;;  %v4830_v27 = vld [vmem:[#allocation11 + $0x2f0] sm:$0xff]  ;;  %12013 = vst [vmem:[#allocation34_spill] sm:$0xff] %v10735_v38  ;;  %v10745_v23 = vsel %vm1049_vm1, %v4271_v4, %v4272_v45  ;;  %v4282_v4 = vrot.slane %v10416_v59, 2 }
 0x552   : > { %7031 = vmatprep.subr.bf16.mxu1 %v11752_v29  ;;  %v7038_v35 = vpack.c.bf16 %v4831_v33, %v4830_v27  ;;  %v12014_v27 = vld [vmem:[#allocation83_spill] sm:$0xff]  ;;  %12015 = vst [vmem:[#allocation56_spill] sm:$0xff] %v10745_v23 }
 0x553   : > { %v4274_v33 = vrot.slane %v12014_v27, 2  ;;  %v4284_v27 = vrot.slane %v10443_v54, 2  ;;  %v4289_v54 = vrot.slane %v10483_v1, 2  ;;  %v4291_v1 = vrot.slane %v10505_v10, 2 }
 0x554   : > { %5274 = vmatmul.mubr.f32.gmra.mrb[118].mxu1 %v10702_v16  ;;  %v4297_v10 = vrot.slane %v10534_v57, 2 }
 0x555   : > { %6337 = vmatprep.mubr.msk.f32.mxu1 %vm3782_vm2, %v10302_v42  ;;  %7033 = vmatpush1.bf16.msra.mxu1 %v7032_v22  ;;  %v12011_v22 = vld [vmem:[#allocation79_spill] sm:$0xff] }
 0x556   : > { %7034 = vmatprep.subr.bf16.mxu1 %v11752_v29  ;;  %v4266_v48 = vrot.slane %v12011_v22, 2  ;;  %v12017_v22 = vld [vmem:[#allocation88_spill] sm:$0xff] }
 0x558   : > { %5279 = vmatmul.mubr.f32.gmra.mrb[120].mxu1 %v10713_v46 }
 0x559   : > { %5283 = vmatprep.mubr.f32.mxu1 %v10319_v7  ;;  %7036 = vmatpush1.bf16.msra.mxu1 %v7035_v11  ;;  %v10730_v11 = vsel %vm1049_vm1, %v4266_v48, %v4267_v20  ;;  %v4276_v48 = vrot.slane %v12017_v22, 2  ;;  %v4279_v20 = vrot.slane %v10406_v18, 2  ;;  %v4281_v18 = vrot.slane %v10431_v3, 2 }
 0x55a   : > { %7037 = vmatprep.subr.bf16.mxu1 %v11752_v29  ;;  %12012 = vst [vmem:[#allocation52_spill] sm:$0xff] %v10730_v11  ;;  %v10780_v22 = vsel %vm1049_vm1, %v4282_v4, %v4284_v27  ;;  %v4287_v3 = vrot.slane %v10466_v50, 2 }
 0x55b   : > { %v10760_v5 = vsel %vm1049_vm1, %v4276_v48, %v4277_v14  ;;  %12021 = vst [vmem:[#allocation36_spill] sm:$0xff] %v10780_v22  ;;  %v4286_v48 = vrot.slane %v10463_v19, 2  ;;  %v4292_v19 = vrot.slane %v10491_v30, 2 }
 0x55c   : > { %5284 = vmatmul.mubr.f32.gmra.mrb[122].mxu1 %v10719_v61  ;;  %12018 = vst [vmem:[#allocation71_spill] sm:$0xff] %v10760_v5 }
 0x55d   : > { %6338 = vmatprep.mubr.msk.f32.mxu1 %vm3782_vm2, %v10336_v41  ;;  %7039 = vmatpush1.bf16.msra.mxu1 %v7038_v35  ;;  %v10750_v35 = vsel %vm1049_vm1, %v4272_v45, %v4274_v33  ;;  %v10765_v45 = vsel %vm1049_vm1, %v4277_v14, %v4279_v20  ;;  %v10775_v33 = vsel %vm1049_vm1, %v4281_v18, %v4282_v4  ;;  %v4294_v4 = vrot.slane %v10516_v9, 2 }
 0x55e   : > { %7040 = vmatprep.subr.bf16.mxu1 %v11752_v29  ;;  %12016 = vst [vmem:[#allocation35_spill] sm:$0xff] %v10750_v35  ;;  %12019 = vst [vmem:[#allocation57_spill] sm:$0xff] %v10765_v45  ;;  %v10790_v14 = vsel %vm1049_vm1, %v4286_v48, %v4287_v3  ;;  %v10795_v20 = vsel %vm1049_vm1, %v4287_v3, %v4289_v54  ;;  %v10805_v18 = vsel %vm1049_vm1, %v4291_v1, %v4292_v19 }
 0x55f   : > { %12020 = vst [vmem:[#allocation54_spill] sm:$0xff] %v10775_v33  ;;  %12022 = vst [vmem:[#allocation59_spill] sm:$0xff] %v10790_v14  ;;  %v10810_v27 = vsel %vm1049_vm1, %v4292_v19, %v4294_v4  ;;  %v4296_v48 = vrot.slane %v10531_v49, 2  ;;  %v4299_v9 = vrot.slane %v10545_v53, 2  ;;  %v10825_v54 = vmax.f32 %v10472_v12, 0.0  ;;  %v12028_v4 = vld [vmem:[#allocation42_spill] sm:$0xff] }
 0x560   : > { %5289 = vmatmul.mubr.f32.gmra.mrb[124].mxu1 %v10730_v11  ;;  %12023 = vst [vmem:[#allocation37_spill] sm:$0xff] %v10795_v20  ;;  %12024 = vst [vmem:[#allocation63_spill] sm:$0xff] %v10805_v18  ;;  %v4302_v19 = vrot.slane %v10553_v60, 2  ;;  %v4301_v53 = vrot.slane %v10564_v36, 2  ;;  %v4304_v1 = vrot.slane %v10575_v62, 2  ;;  %v4834_v62 = vld [vmem:[#allocation11 + $0x310] sm:$0xff] }
 0x561   : > { %5293 = vmatprep.mubr.f32.mxu1 %v10342_v63  ;;  %12025 = vst [vmem:[#allocation38_spill] sm:$0xff] %v10810_v27  ;;  %v10820_v3 = vsel %vm1049_vm1, %v4296_v48, %v4297_v10  ;;  %v10828_v49 = vsel %vm1049_vm1, %v4297_v10, %v4299_v9  ;;  %v10838_v48 = vmax.f32 %v12028_v4, 0.0  ;;  %v4832_v10 = vld [vmem:[#allocation11 + $0x300] sm:$0xff]  ;;  %v4833_v9 = vld [vmem:[#allocation11 + $0x308] sm:$0xff]  ;;  %v4835_v4 = vld [vmem:[#allocation11 + $0x318] sm:$0xff] }
 0x562   : > { %12026 = vst [vmem:[#allocation64_spill] sm:$0xff] %v10820_v3  ;;  %12027 = vst [vmem:[#allocation61_spill] sm:$0xff] %v10828_v49  ;;  %v10841_v12 = vsel %vm1049_vm1, %v4301_v53, %v4302_v19  ;;  %v7041_v36 = vpack.c.bf16 %v4833_v9, %v4832_v10  ;;  %v7044_v53 = vpack.c.bf16 %v4835_v4, %v4834_v62  ;;  %v12032_v10 = vld [vmem:[#allocation89_spill] sm:$0xff]  ;;  %v12034_v62 = vld [vmem:[#allocation60_spill] sm:$0xff] }
 0x563   : > { %12029 = vst [vmem:[#allocation39_spill] sm:$0xff] %v10841_v12  ;;  %v4841_v9 = vld [vmem:[#allocation11 + $0x348] sm:$0xff] }
 0x564   : > { %5294 = vmatmul.mubr.f32.gmra.mrb[126].mxu1 %v10735_v38 }
 0x565   : > { %6339 = vmatprep.mubr.msk.f32.mxu1 %vm3782_vm2, %v10370_v24 }
 0x568   : > { %5299 = vmatmul.mubr.f32.gmra.mrb[128].mxu1 %v10745_v23 }
 0x569   : > { %5303 = vmatprep.mubr.f32.mxu1 %v10391_v55 }
 0x56c   : > { %5304 = vmatmul.mubr.f32.gmra.mrb[130].mxu1 %v10750_v35 }
 0x56d   : > { %6340 = vmatprep.mubr.msk.f32.mxu1 %vm3782_vm2, %v10410_v44 }
 0x570   : > { %5309 = vmatmul.mubr.f32.gmra.mrb[132].mxu1 %v10760_v5 }
 0x571   : > { %5313 = vmatprep.mubr.f32.mxu1 %v10416_v59 }
 0x574   : > { %5314 = vmatmul.mubr.f32.gmra.mrb[134].mxu1 %v10765_v45 }
 0x575   : > { %6341 = vmatprep.mubr.msk.f32.mxu1 %vm3782_vm2, %v10445_v58 }
 0x578   : > { %5319 = vmatmul.mubr.f32.gmra.mrb[136].mxu1 %v10775_v33 }
 0x579   : > { %5323 = vmatprep.mubr.f32.mxu1 %v10466_v50 }
 0x57c   : > { %5324 = vmatmul.mubr.f32.gmra.mrb[138].mxu1 %v10780_v22 }
 0x57d   : > { %6342 = vmatprep.mubr.msk.f32.mxu1 %vm3782_vm2, %v10488_v8 }
 0x580   : > { %5329 = vmatmul.mubr.f32.gmra.mrb[140].mxu1 %v10790_v14 }
 0x581   : > { %5333 = vmatprep.mubr.f32.mxu1 %v10491_v30  ;;  %v12031_v30 = vld [vmem:[#allocation82_spill] sm:$0xff] }
 0x584   : > { %5334 = vmatmul.mubr.f32.gmra.mrb[142].mxu1 %v10795_v20 }
 0x585   : > { %6343 = vmatprep.mubr.msk.f32.mxu1 %vm3782_vm2, %v10518_v13  ;;  %v4837_v13 = vld [vmem:[#allocation11 + $0x328] sm:$0xff] }
 0x588   : > { %5339 = vmatmul.mubr.f32.gmra.mrb[144].mxu1 %v10805_v18 }
 0x589   : > { %5343 = vmatprep.mubr.f32.mxu1 %v10534_v57  ;;  %v4836_v57 = vld [vmem:[#allocation11 + $0x320] sm:$0xff] }
 0x58c   : > { %5344 = vmatmul.mubr.f32.gmra.mrb[146].mxu1 %v10810_v27 }
 0x58d   : > { %6344 = vmatprep.mubr.msk.f32.mxu1 %vm3782_vm2, %v10550_v34  ;;  %v12030_v34 = vld [vmem:[#allocation85_spill] sm:$0xff] }
 0x590   : > { %5349 = vmatmul.mubr.f32.gmra.mrb[148].mxu1 %v10820_v3 }
 0x591   : > { %5353 = vmatprep.mubr.f32.mxu1 %v10553_v60  ;;  %v10846_v60 = vsel %vm1049_vm1, %v4302_v19, %v4304_v1  ;;  %v7047_v19 = vpack.c.bf16 %v4837_v13, %v4836_v57  ;;  %v4839_v1 = vld [vmem:[#allocation11 + $0x338] sm:$0xff]  ;;  %v4842_v13 = vld [vmem:[#allocation11 + $0x350] sm:$0xff] }
 0x592   : > { %v4843_v57 = vld [vmem:[#allocation11 + $0x358] sm:$0xff] }
 0x593   : > { %v7056_v4 = vpack.c.bf16 %v4843_v57, %v4842_v13  ;;  %v4848_v13 = vld [vmem:[#allocation11 + $0x380] sm:$0xff]  ;;  %v4849_v57 = vld [vmem:[#allocation11 + $0x388] sm:$0xff] }
 0x594   : > { %5354 = vmatmul.mubr.f32.gmra.mrb[150].mxu1 %v10828_v49 }
 0x595   : > { %6345 = vmatprep.mubr.msk.f32.mxu1 %vm3782_vm2, %v10825_v54 }
 0x598   : > { %5359 = vmatmul.mubr.f32.gmra.mrb[152].mxu1 %v10841_v12 }
 0x599   : > { %5363 = vmatprep.mubr.f32.mxu1 %v10838_v48 }
 0x59c   : > { %5364 = vmatmul.mubr.f32.gmra.mrb[154].mxu1 %v10846_v60 }
 0x59d   : > { %5433 = vmatprep.mubr.f32.mxu1 %v10611_v28  ;;  %v4838_v28 = vld [vmem:[#allocation11 + $0x330] sm:$0xff] }
 0x5a0   : > { %5434 = vmatmul.mubr.f32.vlgmr.msra.gmra.mrb[92].mxu1 %v12030_v34  ;;  %v7050_v34 = vpack.c.bf16 %v4839_v1, %v4838_v28  ;;  %v12035_v28 = vld [vmem:[#allocation62_spill] sm:$0xff] }
 0x5a1   : > { %5438 = vmatprep.mubr.f32.mxu1 %v10617_v51  ;;  %7042 = vmatpush1.bf16.msra.mxu1 %v7041_v36  ;;  %v4840_v51 = vld [vmem:[#allocation11 + $0x340] sm:$0xff]  ;;  %v12033_v36 = vld [vmem:[#allocation55_spill] sm:$0xff] }
 0x5a2   : > { %7043 = vmatprep.subr.bf16.mxu1 %v11752_v29 }
 0x5a4   : > { %5439 = vmatmul.mubr.f32.gmra.mrb[94].mxu1 %v12031_v30  ;;  %v7053_v30 = vpack.c.bf16 %v4841_v9, %v4840_v51  ;;  %v4847_v51 = vld [vmem:[#allocation11 + $0x378] sm:$0xff]  ;;  %v12036_v9 = vld [vmem:[#allocation65_spill] sm:$0xff] }
 0x5a5   : > { %5443 = vmatprep.mubr.f32.mxu1 %v10628_v52  ;;  %7045 = vmatpush1.bf16.msra.mxu1 %v7044_v53  ;;  %v4844_v53 = vld [vmem:[#allocation11 + $0x360] sm:$0xff] }
 0x5a6   : > { %7046 = vmatprep.subr.bf16.mxu1 %v11752_v29 }
 0x5a8   : > { %5444 = vmatmul.mubr.f32.gmra.mrb[96].mxu1 %v12032_v10 }
 0x5a9   : > { %5448 = vmatprep.mubr.f32.mxu1 %v10634_v32  ;;  %7048 = vmatpush1.bf16.msra.mxu1 %v7047_v19  ;;  %v4845_v19 = vld [vmem:[#allocation11 + $0x368] sm:$0xff] }
 0x5aa   : > { %7049 = vmatprep.subr.bf16.mxu1 %v11752_v29  ;;  %v7059_v1 = vpack.c.bf16 %v4845_v19, %v4844_v53  ;;  %v4850_v53 = vld [vmem:[#allocation11 + $0x390] sm:$0xff]  ;;  %v4851_v19 = vld [vmem:[#allocation11 + $0x398] sm:$0xff]  ;;  %v12044_v32 = vld [vmem:[#allocation81_spill] sm:$0xff] }
 0x5ac   : > { %5449 = vmatmul.mubr.f32.gmra.mrb[98].mxu1 %v12033_v36 }
 0x5ad   : > { %5453 = vmatprep.mubr.f32.mxu1 %v10645_v43  ;;  %7051 = vmatpush1.bf16.msra.mxu1 %v7050_v34  ;;  %v4846_v34 = vld [vmem:[#allocation11 + $0x370] sm:$0xff]  ;;  %v4865_v43 = vld [vmem:[#allocation11 + $0x408] sm:$0xff] }
 0x5ae   : > { %7052 = vmatprep.subr.bf16.mxu1 %v11752_v29 }
 0x5b0   : > { %5454 = vmatmul.mubr.f32.gmra.mrb[100].mxu1 %v12034_v62 }
 0x5b1   : > { %5458 = vmatprep.mubr.f32.mxu1 %v10651_v21  ;;  %7054 = vmatpush1.bf16.msra.mxu1 %v7053_v30  ;;  %v7062_v30 = vpack.c.bf16 %v4847_v51, %v4846_v34  ;;  %v12037_v21 = vld [vmem:[#allocation26_spill] sm:$0xff]  ;;  %v4852_v34 = vld [vmem:[#allocation11 + $0x3a0] sm:$0xff] }
 0x5b2   : > { %7055 = vmatprep.subr.bf16.mxu1 %v11752_v29  ;;  %v4853_v51 = vld [vmem:[#allocation11 + $0x3a8] sm:$0xff] }
 0x5b4   : > { %5459 = vmatmul.mubr.f32.gmra.mrb[102].mxu1 %v12035_v28 }
 0x5b5   : > { %5463 = vmatprep.mubr.f32.mxu1 %v10662_v47  ;;  %7057 = vmatpush1.bf16.msra.mxu1 %v7056_v4  ;;  %v7065_v4 = vpack.c.bf16 %v4849_v57, %v4848_v13  ;;  %v12038_v47 = vld [vmem:[#allocation69_spill] sm:$0xff]  ;;  %v4854_v13 = vld [vmem:[#allocation11 + $0x3b0] sm:$0xff]  ;;  %v4855_v57 = vld [vmem:[#allocation11 + $0x3b8] sm:$0xff] }
 0x5b6   : > { %7058 = vmatprep.subr.bf16.mxu1 %v11752_v29 }
 0x5b8   : > { %5464 = vmatmul.mubr.f32.gmra.mrb[104].mxu1 %v12036_v9 }
 0x5b9   : > { %5468 = vmatprep.mubr.f32.mxu1 %v10668_v2  ;;  %7060 = vmatpush1.bf16.msra.mxu1 %v7059_v1  ;;  %v7068_v1 = vpack.c.bf16 %v4851_v19, %v4850_v53  ;;  %v12039_v2 = vld [vmem:[#allocation72_spill] sm:$0xff]  ;;  %v4857_v19 = vld [vmem:[#allocation11 + $0x3c8] sm:$0xff] }
 0x5ba   : > { %7061 = vmatprep.subr.bf16.mxu1 %v11752_v29  ;;  %v4856_v53 = vld [vmem:[#allocation11 + $0x3c0] sm:$0xff] }
 0x5bc   : > { %5469 = vmatmul.mubr.f32.gmra.mrb[106].mxu1 %v12037_v21 }
 0x5bd   : > { %5473 = vmatprep.mubr.f32.mxu1 %v10679_v17  ;;  %7063 = vmatpush1.bf16.msra.mxu1 %v7062_v30  ;;  %v7071_v30 = vpack.c.bf16 %v4853_v51, %v4852_v34  ;;  %v12040_v17 = vld [vmem:[#allocation74_spill] sm:$0xff]  ;;  %v4859_v51 = vld [vmem:[#allocation11 + $0x3d8] sm:$0xff] }
 0x5be   : > { %7064 = vmatprep.subr.bf16.mxu1 %v11752_v29  ;;  %v4858_v34 = vld [vmem:[#allocation11 + $0x3d0] sm:$0xff] }
 0x5c0   : > { %5474 = vmatmul.mubr.f32.gmra.mrb[108].mxu1 %v12038_v47 }
 0x5c1   : > { %5478 = vmatprep.mubr.f32.mxu1 %v10685_v39  ;;  %7066 = vmatpush1.bf16.msra.mxu1 %v7065_v4  ;;  %v7074_v4 = vpack.c.bf16 %v4855_v57, %v4854_v13  ;;  %v12041_v39 = vld [vmem:[#allocation30_spill] sm:$0xff]  ;;  %v4860_v13 = vld [vmem:[#allocation11 + $0x3e0] sm:$0xff] }
 0x5c2   : > { %7067 = vmatprep.subr.bf16.mxu1 %v11752_v29  ;;  %v4861_v57 = vld [vmem:[#allocation11 + $0x3e8] sm:$0xff] }
 0x5c4   : > { %5479 = vmatmul.mubr.f32.gmra.mrb[110].mxu1 %v12039_v2 }
 0x5c5   : > { %5483 = vmatprep.mubr.f32.mxu1 %v10696_v6  ;;  %7069 = vmatpush1.bf16.msra.mxu1 %v7068_v1  ;;  %v7077_v1 = vpack.c.bf16 %v4857_v19, %v4856_v53  ;;  %v12042_v6 = vld [vmem:[#allocation31_spill] sm:$0xff] }
 0x5c6   : > { %7070 = vmatprep.subr.bf16.mxu1 %v11752_v29  ;;  %v4862_v53 = vld [vmem:[#allocation11 + $0x3f0] sm:$0xff]  ;;  %v4863_v19 = vld [vmem:[#allocation11 + $0x3f8] sm:$0xff] }
 0x5c8   : > { %5484 = vmatmul.mubr.f32.gmra.mrb[112].mxu1 %v12040_v17 }
 0x5c9   : > { %5488 = vmatprep.mubr.f32.mxu1 %v10702_v16  ;;  %7072 = vmatpush1.bf16.msra.mxu1 %v7071_v30  ;;  %v7080_v30 = vpack.c.bf16 %v4859_v51, %v4858_v34  ;;  %v12043_v16 = vld [vmem:[#allocation32_spill] sm:$0xff]  ;;  %v12045_v51 = vld [vmem:[#allocation21_spill] sm:$0xff] }
 0x5ca   : > { %7073 = vmatprep.subr.bf16.mxu1 %v11752_v29 }
 0x5cc   : > { %5489 = vmatmul.mubr.f32.gmra.mrb[114].mxu1 %v12041_v39 }
 0x5cd   : > { %5493 = vmatprep.mubr.f32.mxu1 %v10713_v46  ;;  %7075 = vmatpush1.bf16.msra.mxu1 %v7074_v4  ;;  %v7083_v4 = vpack.c.bf16 %v4861_v57, %v4860_v13  ;;  %v4864_v46 = vld [vmem:[#allocation11 + $0x400] sm:$0xff]  ;;  %v12047_v13 = vld [vmem:[#allocation90_spill] sm:$0xff]  ;;  %v12048_v57 = vld [vmem:[#allocation91_spill] sm:$0xff] }
 0x5ce   : > { %7076 = vmatprep.subr.bf16.mxu1 %v11752_v29  ;;  %v7088_v34 = vpack.c.bf16 %v4865_v43, %v4864_v46  ;;  %v12050_v43 = vld [vmem:[#allocation41_spill] sm:$0xff]  ;;  %v12051_v46 = vld [vmem:[#allocation43_spill] sm:$0xff] }
 0x5d0   : > { %5494 = vmatmul.mubr.f32.gmra.mrb[116].mxu1 %v12042_v6 }
 0x5d1   : > { %5498 = vmatprep.mubr.f32.mxu1 %v10719_v61  ;;  %7078 = vmatpush1.bf16.msra.mxu1 %v7077_v1  ;;  %v7086_v1 = vpack.c.bf16 %v4863_v19, %v4862_v53  ;;  %v12053_v53 = vld [vmem:[#allocation47_spill] sm:$0xff]  ;;  %v12054_v19 = vld [vmem:[#allocation50_spill] sm:$0xff] }
 0x5d2   : > { %7079 = vmatprep.subr.bf16.mxu1 %v11752_v29 }
 0x5d4   : > { %5499 = vmatmul.mubr.f32.gmra.mrb[118].mxu1 %v12043_v16 }
 0x5d5   : > { %5503 = vmatprep.mubr.f32.mxu1 %v10730_v11  ;;  %7081 = vmatpush1.bf16.msra.mxu1 %v7080_v30  ;;  %v12046_v30 = vld [vmem:[#allocation86_spill] sm:$0xff] }
 0x5d6   : > { %7082 = vmatprep.subr.bf16.mxu1 %v11752_v29 }
 0x5d8   : > { %5504 = vmatmul.mubr.f32.gmra.mrb[120].mxu1 %v12044_v32 }
 0x5d9   : > { %5508 = vmatprep.mubr.f32.mxu1 %v10735_v38  ;;  %7084 = vmatpush1.bf16.msra.mxu1 %v7083_v4  ;;  %v12052_v4 = vld [vmem:[#allocation46_spill] sm:$0xff]  ;;  %v12061_v38 = vld [vmem:[#allocation96_spill] sm:$0xff] }
 0x5da   : > { %7085 = vmatprep.subr.bf16.mxu1 %v11752_v29  ;;  %v12049_v29 = vld [vmem:[#allocation40_spill] sm:$0xff] }
 0x5dc   : > { %5509 = vmatmul.mubr.f32.gmra.mrb[122].mxu1 %v12045_v51 }
 0x5dd   : > { %5513 = vmatprep.mubr.f32.mxu1 %v10745_v23  ;;  %7087 = vmatpush1.bf16.msra.mxu1 %v7086_v1  ;;  %v12055_v1 = vld [vmem:[#allocation53_spill] sm:$0xff] }
 0x5de   : > { %7089 = vmatprep.subr.bf16.mxu1 %v7088_v34 }
 0x5e0   : > { %5514 = vmatmul.mubr.f32.gmra.mrb[124].mxu1 %v12046_v30 }
 0x5e1   : > { %5518 = vmatprep.mubr.f32.mxu1 %v10750_v35 }
 0x5e4   : > { %5519 = vmatmul.mubr.f32.gmra.mrb[126].mxu1 %v12047_v13 }
 0x5e5   : > { %5523 = vmatprep.mubr.f32.mxu1 %v10760_v5 }
 0x5e8   : > { %5524 = vmatmul.mubr.f32.gmra.mrb[128].mxu1 %v12048_v57 }
 0x5e9   : > { %5528 = vmatprep.mubr.f32.mxu1 %v10765_v45  ;;  %v12059_v45 = vld [vmem:[#allocation95_spill] sm:$0xff] }
 0x5ec   : > { %5529 = vmatmul.mubr.f32.gmra.mrb[130].mxu1 %v12049_v29 }
 0x5ed   : > { %5533 = vmatprep.mubr.f32.mxu1 %v10775_v33  ;;  %v12058_v33 = vld [vmem:[#allocation45_spill] sm:$0xff] }
 0x5f0   : > { %5534 = vmatmul.mubr.f32.gmra.mrb[132].mxu1 %v12050_v43 }
 0x5f1   : > { %5538 = vmatprep.mubr.f32.mxu1 %v10780_v22  ;;  %v12056_v22 = vld [vmem:[#allocation93_spill] sm:$0xff] }
 0x5f4   : > { %5539 = vmatmul.mubr.f32.gmra.mrb[134].mxu1 %v12051_v46 }
 0x5f5   : > { %5543 = vmatprep.mubr.f32.mxu1 %v10790_v14  ;;  %v12057_v14 = vld [vmem:[#allocation94_spill] sm:$0xff] }
 0x5f8   : > { %5544 = vmatmul.mubr.f32.gmra.mrb[136].mxu1 %v12052_v4 }
 0x5f9   : > { %5548 = vmatprep.mubr.f32.mxu1 %v10795_v20  ;;  %v3848_v20 = vsel %vm3782_vm2, %v10825_v54, 0.0 }
 0x5fa   : > { %v4145_v35 = vrot.slane %v3848_v20, 1 }
 0x5fc   : > { %5549 = vmatmul.mubr.f32.gmra.mrb[138].mxu1 %v12053_v53 }
 0x5fd   : > { %5553 = vmatprep.mubr.f32.mxu1 %v10805_v18  ;;  %v3774_v18 = vmax.f32 %v12058_v33, 0.0  ;;  %v4146_v33 = vrot.slane %v10838_v48, 1 }
 0x5ff   : > { %v10937_v61 = vsel %vm678_vm0, %v4145_v35, %v4146_v33  ;;  %v4869_v35 = vld [vmem:[#allocation11 + $0x428] sm:$0xff] }
 0x600   : > { %5554 = vmatmul.mubr.f32.gmra.mrb[140].mxu1 %v12054_v19 }
 0x601   : > { %5558 = vmatprep.mubr.f32.mxu1 %v10810_v27  ;;  %v4370_v27 = vrot.slane %v3848_v20, 2 }
 0x604   : > { %5559 = vmatmul.mubr.f32.gmra.mrb[142].mxu1 %v12055_v1 }
 0x605   : > { %5563 = vmatprep.mubr.f32.mxu1 %v10820_v3  ;;  %v3850_v3 = vsel %vm3793_vm3, %v3774_v18, 0.0  ;;  %v4866_v18 = vld [vmem:[#allocation11 + $0x410] sm:$0xff] }
 0x606   : > { %v4373_v23 = vrot.slane %v3850_v3, 2 }
 0x608   : > { %5564 = vmatmul.mubr.f32.gmra.mrb[144].mxu1 %v12056_v22 }
 0x609   : > { %5568 = vmatprep.mubr.f32.mxu1 %v10828_v49  ;;  %v4371_v49 = vrot.slane %v10838_v48, 2 }
 0x60b   : > { %v10932_v11 = vsel %vm1049_vm1, %v4370_v27, %v4371_v49  ;;  %v10941_v5 = vsel %vm1049_vm1, %v4371_v49, %v4373_v23  ;;  %v4867_v27 = vld [vmem:[#allocation11 + $0x418] sm:$0xff]  ;;  %v4870_v49 = vld [vmem:[#allocation11 + $0x430] sm:$0xff] }
 0x60c   : > { %5569 = vmatmul.mubr.f32.gmra.mrb[146].mxu1 %v12057_v14  ;;  %12062 = vst [vmem:[#allocation70_spill] sm:$0xff] %v10932_v11 }
 0x60d   : > { %5573 = vmatprep.mubr.f32.mxu1 %v10841_v12  ;;  %v4148_v12 = vrot.slane %v3850_v3, 1  ;;  %v7092_v3 = vpack.c.bf16 %v4867_v27, %v4866_v18  ;;  %v4873_v18 = vld [vmem:[#allocation11 + $0x448] sm:$0xff]  ;;  %v12063_v27 = vld [vmem:[#allocation87_spill] sm:$0xff] }
 0x60f   : > { %v10945_v20 = vsel %vm678_vm0, %v4146_v33, %v4148_v12  ;;  %v4871_v12 = vld [vmem:[#allocation11 + $0x438] sm:$0xff]  ;;  %v4872_v33 = vld [vmem:[#allocation11 + $0x440] sm:$0xff] }
 0x610   : > { %5574 = vmatmul.mubr.f32.gmra.mrb[148].mxu1 %v12059_v45 }
 0x611   : > { %5578 = vmatprep.mubr.f32.mxu1 %v10846_v60 }
 0x614   : > { %5579 = vmatmul.mubr.f32.gmra.mrb[150].mxu1 %v12061_v38 }
 0x615   : > { %5583 = vmatprep.mubr.f32.mxu1 %v10932_v11  ;;  %v4868_v11 = vld [vmem:[#allocation11 + $0x420] sm:$0xff] }
 0x616   : > { %v7096_v23 = vpack.c.bf16 %v4869_v35, %v4868_v11  ;;  %v4874_v11 = vld [vmem:[#allocation11 + $0x450] sm:$0xff] }
 0x617   : > { %v4878_v35 = vld [vmem:[#allocation11 + $0x470] sm:$0xff] }
 0x618   : > { %5584 = vmatmul.mubr.f32.gmra.mrb[152].mxu1 %v10937_v61 }
 0x619   : > { %5588 = vmatprep.mubr.f32.mxu1 %v10941_v5 }
 0x61c   : > { %5589 = vmatmul.mubr.f32.gmra.mrb[154].mxu1 %v10945_v20 }
 0x61d   : > { %5658 = vmatprep.mubr.f32.mxu1 %v12032_v10  ;;  %v7100_v10 = vpack.c.bf16 %v4871_v12, %v4870_v49  ;;  %v12104_v49 = vld [vmem:[#allocation97_spill] sm:$0xff] }
 0x620   : > { %6346 = vmatmul.mubr.msk.f32.vlgmr.msra.gmra.mrb[92].mxu1 %vm3782_vm2, %v10118_v56  ;;  %v7104_v56 = vpack.c.bf16 %v4873_v18, %v4872_v33 }
 0x621   : > { %5663 = vmatprep.mubr.f32.mxu1 %v12033_v36  ;;  %7091 = vmatpush3.bf16.msra.mxu1 %v7088_v34  ;;  %v4875_v36 = vld [vmem:[#allocation11 + $0x458] sm:$0xff]  ;;  %v4877_v34 = vld [vmem:[#allocation11 + $0x468] sm:$0xff] }
 0x622   : > { %7093 = vmatprep.subr.bf16.mxu1 %v7092_v3 }
 0x624   : > { %5664 = vmatmul.mubr.f32.gmra.mrb[94].mxu1 %v10116_v25  ;;  %v7108_v25 = vpack.c.bf16 %v4875_v36, %v4874_v11 }
 0x625   : > { %5668 = vmatprep.mubr.f32.mxu1 %v12034_v62  ;;  %7095 = vmatpush3.bf16.msra.mxu1 %v7092_v3  ;;  %v4876_v62 = vld [vmem:[#allocation11 + $0x460] sm:$0xff]  ;;  %v12064_v3 = vld [vmem:[#allocation23_spill] sm:$0xff] }
 0x626   : > { %7097 = vmatprep.subr.bf16.mxu1 %v7096_v23 }
 0x628   : > { %6347 = vmatmul.mubr.msk.f32.gmra.mrb[96].mxu1 %vm3782_vm2, %v12063_v27 }
 0x629   : > { %5673 = vmatprep.mubr.f32.mxu1 %v12035_v28  ;;  %7099 = vmatpush3.bf16.msra.mxu1 %v7096_v23  ;;  %v7112_v28 = vpack.c.bf16 %v4877_v34, %v4876_v62  ;;  %v4879_v23 = vld [vmem:[#allocation11 + $0x478] sm:$0xff] }
 0x62a   : > { %7101 = vmatprep.subr.bf16.mxu1 %v7100_v10 }
 0x62c   : > { %5674 = vmatmul.mubr.f32.gmra.mrb[98].mxu1 %v10154_v31  ;;  %v7116_v31 = vpack.c.bf16 %v4879_v23, %v4878_v35 }
 0x62d   : > { %5678 = vmatprep.mubr.f32.mxu1 %v12036_v9  ;;  %7103 = vmatpush3.bf16.msra.mxu1 %v7100_v10  ;;  %v12065_v9 = vld [vmem:[#allocation25_spill] sm:$0xff] }
 0x62e   : > { %7105 = vmatprep.subr.bf16.mxu1 %v7104_v56 }
 0x630   : > { %6348 = vmatmul.mubr.msk.f32.gmra.mrb[100].mxu1 %vm3782_vm2, %v12064_v3 }
 0x631   : > { %5683 = vmatprep.mubr.f32.mxu1 %v12037_v21  ;;  %7107 = vmatpush3.bf16.msra.mxu1 %v7104_v56  ;;  %v12066_v21 = vld [vmem:[#allocation27_spill] sm:$0xff] }
 0x632   : > { %7109 = vmatprep.subr.bf16.mxu1 %v7108_v25 }
 0x634   : > { %5684 = vmatmul.mubr.f32.gmra.mrb[102].mxu1 %v10191_v15  ;;  %v12067_v15 = vld [vmem:[#allocation29_spill] sm:$0xff] }
 0x635   : > { %5688 = vmatprep.mubr.f32.mxu1 %v12038_v47  ;;  %7111 = vmatpush3.bf16.msra.mxu1 %v7108_v25 }
 0x636   : > { %7113 = vmatprep.subr.bf16.mxu1 %v7112_v28 }
 0x638   : > { %6349 = vmatmul.mubr.msk.f32.gmra.mrb[104].mxu1 %vm3782_vm2, %v12065_v9 }
 0x639   : > { %5693 = vmatprep.mubr.f32.mxu1 %v12039_v2  ;;  %7115 = vmatpush3.bf16.msra.mxu1 %v7112_v28 }
 0x63a   : > { %7117 = vmatprep.subr.bf16.mxu1 %v7116_v31 }
 0x63c   : > { %5694 = vmatmul.mubr.f32.gmra.mrb[106].mxu1 %v10212_v0  ;;  %v7821_v0 = vld [vmem:[%s8396_s13 + $0x270] sm:$0xff] }
 0x63d   : > { %5698 = vmatprep.mubr.f32.mxu1 %v12040_v17  ;;  %7119 = vmatpush3.bf16.msra.mxu1 %v7116_v31  ;;  %v12080_v17 = vld [vmem:[#allocation101_spill] sm:$0xff] }
 0x640   : > { %6350 = vmatmul.mubr.msk.f32.gmra.mrb[108].mxu1 %vm3782_vm2, %v12066_v21 }
 0x641   : > { %5703 = vmatprep.mubr.f32.mxu1 %v12041_v39  ;;  %v12081_v39 = vld [vmem:[#allocation102_spill] sm:$0xff] }
 0x644   : > { %5704 = vmatmul.mubr.f32.gmra.mrb[110].mxu1 %v10255_v37  ;;  %v1351_v37 = vrot.slane %v7821_v0, 2 }
 0x645   : > { %5708 = vmatprep.mubr.f32.mxu1 %v12042_v6  ;;  %v12082_v6 = vld [vmem:[#allocation103_spill] sm:$0xff] }
 0x648   : > { %6351 = vmatmul.mubr.msk.f32.gmra.mrb[112].mxu1 %vm3782_vm2, %v12067_v15 }
 0x649   : > { %5713 = vmatprep.mubr.f32.mxu1 %v12043_v16  ;;  %v12083_v16 = vld [vmem:[#allocation104_spill] sm:$0xff] }
 0x64c   : > { %5714 = vmatmul.mubr.f32.gmra.mrb[114].mxu1 %v10276_v40  ;;  %v7822_v40 = vld [vmem:[%s8396_s13 + $0x278] sm:$0x3] }
 0x64d   : > { %5718 = vmatprep.mubr.f32.mxu1 %v12044_v32  ;;  %v1353_v32 = vrot.slane %v7822_v40, 2 }
 0x64f   : > { %v1354_v2 = vsel %vm1049_vm1, %v1351_v37, %v1353_v32 }
 0x650   : > { %6352 = vmatmul.mubr.msk.f32.gmra.mrb[116].mxu1 %vm3782_vm2, %v10302_v42  ;;  %v12068_v42 = vld [vmem:[#allocation78_spill] sm:$0xff] }
 0x651   : > { %5723 = vmatprep.mubr.f32.mxu1 %v12045_v51  ;;  %v12069_v47 = vrot.slane %v12068_v42, 2  ;;  %v12092_v51 = vld [vmem:[#allocation71_spill] sm:$0xff] }
 0x654   : > { %5724 = vmatmul.mubr.f32.gmra.mrb[118].mxu1 %v10319_v7  ;;  %v1352_v7 = vsel %vm1049_vm1, %v12069_v47, %v1351_v37 }
 0x655   : > { %5728 = vmatprep.mubr.f32.mxu1 %v12046_v30  ;;  %6589 = vmatprep.mubr.f32.mxu0 %v1352_v7  ;;  %v12093_v30 = vld [vmem:[#allocation57_spill] sm:$0xff] }
 0x656   : > { %6590 = vmatmul.mubr.f32.gmra.mrb[188].mxu0 %v1354_v2 }
 0x658   : > { %6353 = vmatmul.mubr.msk.f32.gmra.mrb[120].mxu1 %vm3782_vm2, %v10336_v41  ;;  %v12070_v41 = vld [vmem:[#allocation44_spill] sm:$0xff] }
 0x659   : > { %5733 = vmatprep.mubr.f32.mxu1 %v12047_v13  ;;  %v12094_v13 = vld [vmem:[#allocation54_spill] sm:$0xff] }
 0x65c   : > { %5734 = vmatmul.mubr.f32.gmra.mrb[122].mxu1 %v10342_v63  ;;  %v12071_v63 = vld [vmem:[#allocation48_spill] sm:$0xff] }
 0x65d   : > { %5738 = vmatprep.mubr.f32.mxu1 %v12048_v57  ;;  %v12095_v57 = vld [vmem:[#allocation36_spill] sm:$0xff] }
 0x660   : > { %6354 = vmatmul.mubr.msk.f32.gmra.mrb[124].mxu1 %vm3782_vm2, %v10370_v24  ;;  %v12073_v24 = vld [vmem:[#allocation66_spill] sm:$0xff] }
 0x661   : > { %5743 = vmatprep.mubr.f32.mxu1 %v12049_v29  ;;  %v12096_v29 = vld [vmem:[#allocation59_spill] sm:$0xff] }
 0x664   : > { %5744 = vmatmul.mubr.f32.gmra.mrb[126].mxu1 %v10391_v55  ;;  %v12074_v55 = vld [vmem:[#allocation92_spill] sm:$0xff] }
 0x665   : > { %5748 = vmatprep.mubr.f32.mxu1 %v12050_v43  ;;  %v12097_v43 = vld [vmem:[#allocation37_spill] sm:$0xff] }
 0x668   : > { %6355 = vmatmul.mubr.msk.f32.gmra.mrb[128].mxu1 %vm3782_vm2, %v10410_v44  ;;  %v12075_v44 = vld [vmem:[#allocation80_spill] sm:$0xff] }
 0x669   : > { %5753 = vmatprep.mubr.f32.mxu1 %v12051_v46  ;;  %v12098_v46 = vld [vmem:[#allocation63_spill] sm:$0xff] }
 0x66c   : > { %5754 = vmatmul.mubr.f32.gmra.mrb[130].mxu1 %v10416_v59  ;;  %v12072_v59 = vld [vmem:[#allocation51_spill] sm:$0xff] }
 0x66d   : > { %5758 = vmatprep.mubr.f32.mxu1 %v12052_v4  ;;  %v12099_v4 = vld [vmem:[#allocation38_spill] sm:$0xff] }
 0x670   : > { %6356 = vmatmul.mubr.msk.f32.gmra.mrb[132].mxu1 %vm3782_vm2, %v10445_v58  ;;  %v12076_v58 = vmov 0.0  }
 0x671   : > { %5763 = vmatprep.mubr.f32.mxu1 %v12053_v53  ;;  %v12100_v53 = vld [vmem:[#allocation64_spill] sm:$0xff] }
 0x674   : > { %5764 = vmatmul.mubr.f32.gmra.mrb[134].mxu1 %v10466_v50  ;;  %v12077_v50 = vld [vmem:[#allocation98_spill] sm:$0xff] }
 0x675   : > { %5768 = vmatprep.mubr.f32.mxu1 %v12054_v19  ;;  %v12101_v19 = vld [vmem:[#allocation61_spill] sm:$0xff] }
 0x678   : > { %6357 = vmatmul.mubr.msk.f32.gmra.mrb[136].mxu1 %vm3782_vm2, %v10488_v8  ;;  %v12078_v8 = vld [vmem:[#allocation99_spill] sm:$0xff] }
 0x679   : > { %5773 = vmatprep.mubr.f32.mxu1 %v12055_v1  ;;  %v12102_v1 = vld [vmem:[#allocation39_spill] sm:$0xff] }
 0x67c   : > { %5774 = vmatmul.mubr.f32.gmra.mrb[138].mxu1 %v12070_v41 }
 0x67d   : > { %5778 = vmatprep.mubr.f32.mxu1 %v12056_v22  ;;  %v12088_v22 = vld [vmem:[#allocation52_spill] sm:$0xff] }
 0x680   : > { %6358 = vmatmul.mubr.msk.f32.gmra.mrb[140].mxu1 %vm3782_vm2, %v12071_v63 }
 0x681   : > { %5783 = vmatprep.mubr.f32.mxu1 %v12057_v14  ;;  %v12089_v14 = vld [vmem:[#allocation34_spill] sm:$0xff] }
 0x684   : > { %5784 = vmatmul.mubr.f32.gmra.mrb[142].mxu1 %v12072_v59 }
 0x685   : > { %5788 = vmatprep.mubr.f32.mxu1 %v12059_v45  ;;  %v12086_v45 = vld [vmem:[#allocation49_spill] sm:$0xff] }
 0x688   : > { %6359 = vmatmul.mubr.msk.f32.gmra.mrb[144].mxu1 %vm3782_vm2, %v12073_v24 }
 0x689   : > { %5793 = vmatprep.mubr.f32.mxu1 %v12061_v38  ;;  %v12085_v38 = vld [vmem:[#allocation106_spill] sm:$0xff] }
 0x68c   : > { %5794 = vmatmul.mubr.f32.gmra.mrb[146].mxu1 %v12074_v55 }
 0x68d   : > { %5798 = vmatprep.mubr.f32.mxu1 %v10937_v61  ;;  %v12084_v61 = vld [vmem:[#allocation105_spill] sm:$0xff] }
 0x690   : > { %6360 = vmatmul.mubr.msk.f32.gmra.mrb[148].mxu1 %vm3782_vm2, %v10825_v54  ;;  %v12090_v54 = vld [vmem:[#allocation56_spill] sm:$0xff] }
 0x691   : > { %5803 = vmatprep.mubr.f32.mxu1 %v10945_v20  ;;  %v12103_v20 = vld [vmem:[#allocation70_spill] sm:$0xff] }
 0x694   : > { %5804 = vmatmul.mubr.f32.gmra.mrb[150].mxu1 %v10838_v48  ;;  %v12091_v48 = vld [vmem:[#allocation35_spill] sm:$0xff] }
 0x695   : > { %5808 = vmatprep.mubr.f32.mxu1 %v12075_v44 }
 0x698   : > { %5809 = vmatmul.mubr.f32.gmra.mrb[152].mxu1 %v12076_v58 }
 0x699   : > { %5813 = vmatprep.mubr.f32.mxu1 %v12075_v44 }
 0x69c   : > { %5814 = vmatmul.mubr.f32.gmra.mrb[154].mxu1 %v12076_v58 }
 0x69d   : > { %6624 = vmatprep.mubr.f32.mxu1 %v10628_v52  ;;  %v12087_v52 = vld [vmem:[#allocation33_spill] sm:$0xff] }
 0x6a0   : > { %6625 = vmatmul.mubr.f32.vlgmr.msra.gmra.mrb[156].mxu1 %v12077_v50 }
 0x6a1   : > { %6627 = vmatprep.mubr.f32.mxu1 %v12078_v8 }
 0x6a4   : > { %6628 = vmatmul.mubr.f32.gmra.mrb[158].mxu1 %v12079_v26 }
 0x6a5   : > { %6630 = vmatprep.mubr.f32.mxu1 %v12080_v17 }
 0x6a8   : > { %6631 = vmatmul.mubr.f32.gmra.mrb[160].mxu1 %v12081_v39 }
 0x6a9   : > { %6633 = vmatprep.mubr.f32.mxu1 %v12082_v6 }
 0x6ac   : > { %6634 = vmatmul.mubr.f32.gmra.mrb[162].mxu1 %v12083_v16 }
 0x6ad   : > { %6636 = vmatprep.mubr.f32.mxu1 %v12084_v61 }
 0x6b0   : > { %6637 = vmatmul.mubr.f32.gmra.mrb[164].mxu1 %v12085_v38 }
 0x6b1   : > { %6639 = vmatprep.mubr.f32.mxu1 %v12086_v45 }
 0x6b4   : > { %6640 = vmatmul.mubr.f32.gmra.mrb[166].mxu1 %v12087_v52 }
 0x6b5   : > { %6642 = vmatprep.mubr.f32.mxu1 %v12088_v22 }
 0x6b8   : > { %6643 = vmatmul.mubr.f32.gmra.mrb[168].mxu1 %v12089_v14 }
 0x6b9   : > { %6645 = vmatprep.mubr.f32.mxu1 %v12090_v54 }
 0x6bc   : > { %6646 = vmatmul.mubr.f32.gmra.mrb[170].mxu1 %v12091_v48 }
 0x6bd   : > { %6648 = vmatprep.mubr.f32.mxu1 %v12092_v51 }
 0x6c0   : > { %6649 = vmatmul.mubr.f32.gmra.mrb[172].mxu1 %v12093_v30 }
 0x6c1   : > { %6651 = vmatprep.mubr.f32.mxu1 %v12094_v13 }
 0x6c4   : > { %6652 = vmatmul.mubr.f32.gmra.mrb[174].mxu1 %v12095_v57 }
 0x6c5   : > { %6654 = vmatprep.mubr.f32.mxu1 %v12096_v29 }
 0x6c8   : > { %6655 = vmatmul.mubr.f32.gmra.mrb[176].mxu1 %v12097_v43 }
 0x6c9   : > { %6657 = vmatprep.mubr.f32.mxu1 %v12098_v46 }
 0x6cc   : > { %6658 = vmatmul.mubr.f32.gmra.mrb[178].mxu1 %v12099_v4 }
 0x6cd   : > { %6660 = vmatprep.mubr.f32.mxu1 %v12100_v53 }
 0x6d0   : > { %6661 = vmatmul.mubr.f32.gmra.mrb[180].mxu1 %v12101_v19 }
 0x6d1   : > { %6663 = vmatprep.mubr.f32.mxu1 %v12102_v1 }
 0x6d4   : > { %6664 = vmatmul.mubr.f32.gmra.mrb[182].mxu1 %v10846_v60 }
 0x6d5   : > { %6666 = vmatprep.mubr.f32.mxu1 %v12103_v20 }
 0x6d8   : > { %6667 = vmatmul.mubr.f32.gmra.mrb[184].mxu1 %v10941_v5 }
 0x6d9   : > { %6669 = vmatprep.mubr.f32.mxu1 %v12104_v49 }
 0x6dc   : > { %6670 = vmatmul.mubr.f32.gmra.mrb[186].mxu1 %v12104_v49 }
 0x6f3   : > { %v11080_v12 = vpop.f32.mrb[92].mxu1 }
 0x6f4   : > { %v5662_v10 = vpop.f32.mrb[93].mxu1 }
 0x6f7   : > { %v11082_v33 = vpop.f32.mrb[94].mxu1 }
 0x6f8   : > { %v5667_v18 = vpop.f32.mrb[95].mxu1 }
 0x6f9   : > { %v11144_v18 = vld [vmem:[#allocation12] ss:$0 sm:$0xff] }
 0x6fb   : > { %v11084_v27 = vpop.f32.mrb[96].mxu1 }
 0x6fc   : > { %v5672_v56 = vpop.f32.mrb[97].mxu1 }
 0x6ff   : > { %v11086_v11 = vpop.f32.mrb[98].mxu1 }
 0x700   : > { %v5677_v60 = vpop.f32.mrb[99].mxu1 }
 0x701   : > { %v7244_v60 = vadd.f32 %v11144_v18, %v11082_v33  ;;  %v4883_v33 = vld [vmem:[%s8406_s7 + $0x18] sm:$0xff] }
 0x703   : > { %v11088_v36 = vpop.f32.mrb[100].mxu1 }
 0x704   : > { %v5682_v25 = vpop.f32.mrb[101].mxu1 }
 0x705   : > { %v7243_v25 = vadd.f32 %v11144_v18, %v11080_v12 }
 0x707   : > { %v11090_v5 = vpop.f32.mrb[102].mxu1 }
 0x708   : > { %v5687_v62 = vpop.f32.mrb[103].mxu1 }
 0x709   : > { %v4881_v62 = vld [vmem:[%s8406_s7 + $0x8] sm:$0xff] }
 0x70b   : > { %v11092_v34 = vpop.f32.mrb[104].mxu1 }
 0x70c   : > { %v5692_v3 = vpop.f32.mrb[105].mxu1 }
 0x70f   : > { %v11094_v28 = vpop.f32.mrb[106].mxu1 }
 0x710   : > { %v5697_v35 = vpop.f32.mrb[107].mxu1 }
 0x713   : > { %v11096_v23 = vpop.f32.mrb[108].mxu1 }
 0x714   : > { %v5702_v31 = vpop.f32.mrb[109].mxu1 }
 0x715   : > { %v4880_v31 = vld [vmem:[%s8406_s7] sm:$0xff] }
 0x717   : > { %v11098_v9 = vpop.f32.mrb[110].mxu1 }
 0x718   : > { %v5707_v21 = vpop.f32.mrb[111].mxu1 }
 0x71b   : > { %v11100_v15 = vpop.f32.mrb[112].mxu1 }
 0x71c   : > { %v5712_v0 = vpop.f32.mrb[113].mxu1 }
 0x71f   : > { %v11102_v37 = vpop.f32.mrb[114].mxu1 }
 0x720   : > { %v5717_v40 = vpop.f32.mrb[115].mxu1 }
 0x721   : > { %v7246_v40 = vadd.f32 %v11144_v18, %v11086_v11  ;;  %v7247_v11 = vadd.f32 %v11144_v18, %v11088_v36  ;;  %v7249_v36 = vadd.f32 %v11144_v18, %v11092_v34  ;;  %v7251_v34 = vadd.f32 %v11144_v18, %v11096_v23 }
 0x722   : > { %v7253_v23 = vadd.f32 %v11144_v18, %v11100_v15 }
 0x723   : > { %v11104_v32 = vpop.f32.mrb[116].mxu1 }
 0x724   : > { %v5722_v42 = vpop.f32.mrb[117].mxu1  ;;  %v7255_v15 = vadd.f32 %v11144_v18, %v11104_v32 }
 0x727   : > { %v11106_v47 = vpop.f32.mrb[118].mxu1 }
 0x728   : > { %v5727_v7 = vpop.f32.mrb[119].mxu1 }
 0x729   : > { %v6591_v55 = vpop.f32.mrb[188].mxu0  ;;  %v7245_v7 = vadd.f32 %v11144_v18, %v11084_v27 }
 0x72a   : > { %v3715_v58 = vpop.f32.mrb[189].mxu0 }
 0x72b   : > { %v11108_v2 = vpop.f32.mrb[120].mxu1 }
 0x72c   : > { %v5732_v41 = vpop.f32.mrb[121].mxu1  ;;  %v7257_v32 = vadd.f32 %v11144_v18, %v11108_v2 }
 0x72f   : > { %v11110_v63 = vpop.f32.mrb[122].mxu1 }
 0x730   : > { %v5737_v59 = vpop.f32.mrb[123].mxu1 }
 0x733   : > { %v11112_v24 = vpop.f32.mrb[124].mxu1 }
 0x734   : > { %v5742_v44 = vpop.f32.mrb[125].mxu1  ;;  %v7259_v2 = vadd.f32 %v11144_v18, %v11112_v24 }
 0x735   : > { %v4882_v44 = vld [vmem:[%s8406_s7 + $0x10] sm:$0xff] }
 0x737   : > { %v11114_v50 = vpop.f32.mrb[126].mxu1 }
 0x738   : > { %v5747_v8 = vpop.f32.mrb[127].mxu1 }
 0x73b   : > { %v11116_v26 = vpop.f32.mrb[128].mxu1 }
 0x73c   : > { %v5752_v17 = vpop.f32.mrb[129].mxu1  ;;  %v7261_v24 = vadd.f32 %v11144_v18, %v11116_v26 }
 0x73f   : > { %v11118_v39 = vpop.f32.mrb[130].mxu1 }
 0x740   : > { %v5757_v6 = vpop.f32.mrb[131].mxu1 }
 0x741   : > { %v7248_v6 = vadd.f32 %v11144_v18, %v11090_v5 }
 0x743   : > { %v11120_v16 = vpop.f32.mrb[132].mxu1 }
 0x744   : > { %v5762_v61 = vpop.f32.mrb[133].mxu1  ;;  %v7263_v26 = vadd.f32 %v11144_v18, %v11120_v16 }
 0x747   : > { %v11122_v38 = vpop.f32.mrb[134].mxu1 }
 0x748   : > { %v5767_v45 = vpop.f32.mrb[135].mxu1 }
 0x749   : > { %v4885_v45 = vld [vmem:[%s8406_s7 + $0x28] sm:$0xff] }
 0x74b   : > { %v11124_v52 = vpop.f32.mrb[136].mxu1 }
 0x74c   : > { %v5772_v22 = vpop.f32.mrb[137].mxu1  ;;  %v7265_v16 = vadd.f32 %v11144_v18, %v11124_v52 }
 0x74f   : > { %v11126_v14 = vpop.f32.mrb[138].mxu1 }
 0x750   : > { %v5777_v54 = vpop.f32.mrb[139].mxu1 }
 0x753   : > { %v11128_v48 = vpop.f32.mrb[140].mxu1 }
 0x754   : > { %v5782_v51 = vpop.f32.mrb[141].mxu1  ;;  %v7267_v52 = vadd.f32 %v11144_v18, %v11128_v48 }
 0x755   : > { %v4884_v51 = vld [vmem:[%s8406_s7 + $0x20] sm:$0xff] }
 0x757   : > { %v11130_v30 = vpop.f32.mrb[142].mxu1 }
 0x758   : > { %v5787_v13 = vpop.f32.mrb[143].mxu1 }
 0x75b   : > { %v11132_v57 = vpop.f32.mrb[144].mxu1 }
 0x75c   : > { %v5792_v29 = vpop.f32.mrb[145].mxu1  ;;  %v7269_v48 = vadd.f32 %v11144_v18, %v11132_v57 }
 0x75f   : > { %v11134_v43 = vpop.f32.mrb[146].mxu1 }
 0x760   : > { %v5797_v46 = vpop.f32.mrb[147].mxu1 }
 0x763   : > { %v11136_v4 = vpop.f32.mrb[148].mxu1 }
 0x764   : > { %v5802_v53 = vpop.f32.mrb[149].mxu1  ;;  %v7271_v57 = vadd.f32 %v11144_v18, %v11136_v4 }
 0x765   : > { %v7250_v53 = vadd.f32 %v11144_v18, %v11094_v28  ;;  %v7252_v28 = vadd.f32 %v11144_v18, %v11098_v9  ;;  %v7254_v9 = vadd.f32 %v11144_v18, %v11102_v37  ;;  %v7256_v37 = vadd.f32 %v11144_v18, %v11106_v47 }
 0x766   : > { %v7258_v47 = vadd.f32 %v11144_v18, %v11110_v63  ;;  %v7260_v63 = vadd.f32 %v11144_v18, %v11114_v50  ;;  %v7262_v50 = vadd.f32 %v11144_v18, %v11118_v39  ;;  %v7264_v39 = vadd.f32 %v11144_v18, %v11122_v38 }
 0x767   : > { %v11138_v19 = vpop.f32.mrb[150].mxu1  ;;  %v7266_v38 = vadd.f32 %v11144_v18, %v11126_v14  ;;  %v7268_v14 = vadd.f32 %v11144_v18, %v11130_v30  ;;  %v7270_v30 = vadd.f32 %v11144_v18, %v11134_v43 }
 0x768   : > { %v5807_v1 = vpop.f32.mrb[151].mxu1  ;;  %v7272_v43 = vadd.f32 %v11144_v18, %v11138_v19 }
 0x76b   : > { %v11140_v20 = vpop.f32.mrb[152].mxu1 }
 0x76c   : > { %v5812_v49 = vpop.f32.mrb[153].mxu1 }
 0x76f   : > { %v11142_v10 = vpop.f32.mrb[154].mxu1 }
 0x770   : > { %v5817_v56 = vpop.f32.mrb[155].mxu1  ;;  %v7274_v19 = vadd.f32 %v11144_v18, %v11142_v10 }
 0x771   : > { %v4887_v56 = vld [vmem:[%s8406_s7 + $0x38] sm:$0xff] }
 0x773   : > { %v6626_v3 = vpop.f32.mrb[156].mxu1 }
 0x774   : > { %v5891_v35 = vadd.f32 %v7244_v60, %v6626_v3  ;;  %v5885_v21 = vpop.f32.mrb[157].mxu1  ;;  %v4886_v3 = vld [vmem:[%s8406_s7 + $0x30] sm:$0xff] }
 0x775   : > { %v5886_v0 = vadd.f32 %v7243_v25, %v5885_v21 }
 0x776   : > { %v6045_v42 = vadd.f32 %v5891_v35, %v4881_v62 }
 0x777   : > { %v6044_v41 = vadd.f32 %v5886_v0, %v4880_v31  ;;  %v6629_v59 = vpop.f32.mrb[158].mxu1 }
 0x778   : > { %v6077_v55 = vmax.f32 %v6045_v42, 0.0  ;;  %v5901_v12 = vadd.f32 %v7246_v40, %v6629_v59  ;;  %v5895_v58 = vpop.f32.mrb[159].mxu1  ;;  %v4889_v42 = vld [vmem:[%s8406_s7 + $0x48] sm:$0xff]  ;;  %v4888_v59 = vld [vmem:[%s8406_s7 + $0x40] sm:$0xff] }
 0x779   : > { %v6076_v8 = vmax.f32 %v6044_v41, 0.0  ;;  %v5896_v17 = vadd.f32 %v7245_v7, %v5895_v58 }
 0x77a   : > { %6109 = vst [vmem:[%s11162_s27 + $0x8] sm:$0xff] %v6077_v55  ;;  %v6047_v27 = vadd.f32 %v5901_v12, %v4883_v33 }
 0x77b   : > { %6108 = vst [vmem:[%s11162_s27] sm:$0xff] %v6076_v8  ;;  %v6046_v61 = vadd.f32 %v5896_v17, %v4882_v44  ;;  %v6632_v22 = vpop.f32.mrb[160].mxu1  ;;  %v4891_v17 = vld [vmem:[%s8406_s7 + $0x58] sm:$0xff] }
 0x77c   : > { %v6079_v54 = vmax.f32 %v6047_v27, 0.0  ;;  %v5911_v5 = vadd.f32 %v7248_v6, %v6632_v22  ;;  %v5905_v13 = vpop.f32.mrb[161].mxu1 }
 0x77d   : > { %v6078_v29 = vmax.f32 %v6046_v61, 0.0  ;;  %v5906_v46 = vadd.f32 %v7247_v11, %v5905_v13  ;;  %v4890_v61 = vld [vmem:[%s8406_s7 + $0x50] sm:$0xff]  ;;  %v4893_v13 = vld [vmem:[%s8406_s7 + $0x68] sm:$0xff] }
 0x77e   : > { %6111 = vst [vmem:[%s11162_s27 + $0x18] sm:$0xff] %v6079_v54  ;;  %v6049_v1 = vadd.f32 %v5911_v5, %v4885_v45 }
 0x77f   : > { %6110 = vst [vmem:[%s11162_s27 + $0x10] sm:$0xff] %v6078_v29  ;;  %v6048_v49 = vadd.f32 %v5906_v46, %v4884_v51  ;;  %v6635_v60 = vpop.f32.mrb[162].mxu1 }
 0x780   : > { %v6081_v25 = vmax.f32 %v6049_v1, 0.0  ;;  %v5921_v62 = vadd.f32 %v7250_v53, %v6635_v60  ;;  %v5915_v35 = vpop.f32.mrb[163].mxu1  ;;  %v4892_v1 = vld [vmem:[%s8406_s7 + $0x60] sm:$0xff] }
 0x781   : > { %v6080_v31 = vmax.f32 %v6048_v49, 0.0  ;;  %v5916_v21 = vadd.f32 %v7249_v36, %v5915_v35 }
 0x782   : > { %6113 = vst [vmem:[%s11162_s27 + $0x28] sm:$0xff] %v6081_v25  ;;  %v6051_v0 = vadd.f32 %v5921_v62, %v4887_v56  ;;  %v4895_v62 = vld [vmem:[%s8406_s7 + $0x78] sm:$0xff] }
 0x783   : > { %6112 = vst [vmem:[%s11162_s27 + $0x20] sm:$0xff] %v6080_v31  ;;  %v6050_v40 = vadd.f32 %v5916_v21, %v4886_v3  ;;  %v6638_v7 = vpop.f32.mrb[164].mxu1  ;;  %v4894_v21 = vld [vmem:[%s8406_s7 + $0x70] sm:$0xff] }
 0x784   : > { %v6083_v41 = vmax.f32 %v6051_v0, 0.0  ;;  %v5931_v33 = vadd.f32 %v7252_v28, %v6638_v7  ;;  %v5925_v55 = vpop.f32.mrb[165].mxu1  ;;  %v4897_v7 = vld [vmem:[%s8406_s7 + $0x88] sm:$0xff] }
 0x785   : > { %v6082_v12 = vmax.f32 %v6050_v40, 0.0  ;;  %v5926_v44 = vadd.f32 %v7251_v34, %v5925_v55  ;;  %v4896_v55 = vld [vmem:[%s8406_s7 + $0x80] sm:$0xff] }
 0x786   : > { %6115 = vst [vmem:[%s11162_s27 + $0x38] sm:$0xff] %v6083_v41  ;;  %v6053_v58 = vadd.f32 %v5931_v33, %v4889_v42 }
 0x787   : > { %6114 = vst [vmem:[%s11162_s27 + $0x30] sm:$0xff] %v6082_v12  ;;  %v6052_v8 = vadd.f32 %v5926_v44, %v4888_v59  ;;  %v6641_v6 = vpop.f32.mrb[166].mxu1 }
 0x788   : > { %v6085_v27 = vmax.f32 %v6053_v58, 0.0  ;;  %v5941_v11 = vadd.f32 %v7254_v9, %v6641_v6  ;;  %v5935_v45 = vpop.f32.mrb[167].mxu1 }
 0x789   : > { %v6084_v22 = vmax.f32 %v6052_v8, 0.0  ;;  %v5936_v54 = vadd.f32 %v7253_v23, %v5935_v45  ;;  %v4899_v8 = vld [vmem:[%s8406_s7 + $0x98] sm:$0xff] }
 0x78a   : > { %6117 = vst [vmem:[%s11162_s27 + $0x48] sm:$0xff] %v6085_v27  ;;  %v6055_v5 = vadd.f32 %v5941_v11, %v4891_v17  ;;  %v4898_v11 = vld [vmem:[%s8406_s7 + $0x90] sm:$0xff] }
 0x78b   : > { %6116 = vst [vmem:[%s11162_s27 + $0x40] sm:$0xff] %v6084_v22  ;;  %v6054_v51 = vadd.f32 %v5936_v54, %v4890_v61  ;;  %v6644_v29 = vpop.f32.mrb[168].mxu1 }
 0x78c   : > { %v6087_v46 = vmax.f32 %v6055_v5, 0.0  ;;  %v5951_v53 = vadd.f32 %v7256_v37, %v6644_v29  ;;  %v5945_v36 = vpop.f32.mrb[169].mxu1  ;;  %v4901_v5 = vld [vmem:[%s8406_s7 + $0xa8] sm:$0xff]  ;;  %v4900_v29 = vld [vmem:[%s8406_s7 + $0xa0] sm:$0xff] }
 0x78d   : > { %v6086_v49 = vmax.f32 %v6054_v51, 0.0  ;;  %v5946_v56 = vadd.f32 %v7255_v15, %v5945_v36 }
 0x78e   : > { %6119 = vst [vmem:[%s11162_s27 + $0x58] sm:$0xff] %v6087_v46  ;;  %v6057_v60 = vadd.f32 %v5951_v53, %v4893_v13 }
 0x78f   : > { %6118 = vst [vmem:[%s11162_s27 + $0x50] sm:$0xff] %v6086_v49  ;;  %v6056_v25 = vadd.f32 %v5946_v56, %v4892_v1  ;;  %v6647_v3 = vpop.f32.mrb[170].mxu1  ;;  %v4903_v56 = vld [vmem:[%s8406_s7 + $0xb8] sm:$0xff] }
 0x790   : > { %v6089_v35 = vmax.f32 %v6057_v60, 0.0  ;;  %v5961_v31 = vadd.f32 %v7258_v47, %v6647_v3  ;;  %v5955_v28 = vpop.f32.mrb[171].mxu1 }
 0x791   : > { %v6088_v0 = vmax.f32 %v6056_v25, 0.0  ;;  %v5956_v34 = vadd.f32 %v7257_v32, %v5955_v28  ;;  %v4902_v25 = vld [vmem:[%s8406_s7 + $0xb0] sm:$0xff]  ;;  %v4905_v28 = vld [vmem:[%s8406_s7 + $0xc8] sm:$0xff] }
 0x792   : > { %6121 = vst [vmem:[%s11162_s27 + $0x68] sm:$0xff] %v6089_v35  ;;  %v6059_v40 = vadd.f32 %v5961_v31, %v4895_v62 }
 0x793   : > { %6120 = vst [vmem:[%s11162_s27 + $0x60] sm:$0xff] %v6088_v0  ;;  %v6058_v42 = vadd.f32 %v5956_v34, %v4894_v21  ;;  %v6650_v41 = vpop.f32.mrb[172].mxu1 }
 0x794   : > { %v6091_v33 = vmax.f32 %v6059_v40, 0.0  ;;  %v5971_v59 = vadd.f32 %v7260_v63, %v6650_v41  ;;  %v5965_v12 = vpop.f32.mrb[173].mxu1  ;;  %v4904_v40 = vld [vmem:[%s8406_s7 + $0xc0] sm:$0xff] }
 0x795   : > { %v6090_v44 = vmax.f32 %v6058_v42, 0.0  ;;  %v5966_v9 = vadd.f32 %v7259_v2, %v5965_v12 }
 0x796   : > { %6123 = vst [vmem:[%s11162_s27 + $0x78] sm:$0xff] %v6091_v33  ;;  %v6061_v58 = vadd.f32 %v5971_v59, %v4897_v7  ;;  %v4907_v59 = vld [vmem:[%s8406_s7 + $0xd8] sm:$0xff] }
 0x797   : > { %6122 = vst [vmem:[%s11162_s27 + $0x70] sm:$0xff] %v6090_v44  ;;  %v6060_v23 = vadd.f32 %v5966_v9, %v4896_v55  ;;  %v6653_v17 = vpop.f32.mrb[174].mxu1  ;;  %v4906_v9 = vld [vmem:[%s8406_s7 + $0xd0] sm:$0xff] }
 0x798   : > { %v6093_v6 = vmax.f32 %v6061_v58, 0.0  ;;  %v5981_v27 = vadd.f32 %v7262_v50, %v6653_v17  ;;  %v5975_v61 = vpop.f32.mrb[175].mxu1  ;;  %v4909_v17 = vld [vmem:[%s8406_s7 + $0xe8] sm:$0xff] }
 0x799   : > { %v6092_v45 = vmax.f32 %v6060_v23, 0.0  ;;  %v5976_v22 = vadd.f32 %v7261_v24, %v5975_v61  ;;  %v4908_v61 = vld [vmem:[%s8406_s7 + $0xe0] sm:$0xff] }
 0x79a   : > { %6125 = vst [vmem:[%s11162_s27 + $0x88] sm:$0xff] %v6093_v6  ;;  %v6063_v54 = vadd.f32 %v5981_v27, %v4899_v8 }
 0x79b   : > { %6124 = vst [vmem:[%s11162_s27 + $0x80] sm:$0xff] %v6092_v45  ;;  %v6062_v37 = vadd.f32 %v5976_v22, %v4898_v11  ;;  %v6656_v15 = vpop.f32.mrb[176].mxu1 }
 0x79c   : > { %v6095_v51 = vmax.f32 %v6063_v54, 0.0  ;;  %v5991_v13 = vadd.f32 %v7264_v39, %v6656_v15  ;;  %v5985_v46 = vpop.f32.mrb[177].mxu1  ;;  %v7273_v54 = vadd.f32 %v11144_v18, %v11140_v20 }
 0x79d   : > { %v6094_v53 = vmax.f32 %v6062_v37, 0.0  ;;  %v5986_v1 = vadd.f32 %v7263_v26, %v5985_v46  ;;  %v4911_v37 = vld [vmem:[%s8406_s7 + $0xf8] sm:$0xff] }
 0x79e   : > { %6127 = vst [vmem:[%s11162_s27 + $0x98] sm:$0xff] %v6095_v51  ;;  %v6065_v36 = vadd.f32 %v5991_v13, %v4901_v5  ;;  %v4910_v13 = vld [vmem:[%s8406_s7 + $0xf0] sm:$0xff] }
 0x79f   : > { %6126 = vst [vmem:[%s11162_s27 + $0x90] sm:$0xff] %v6094_v53  ;;  %v6064_v49 = vadd.f32 %v5986_v1, %v4900_v29  ;;  %v6659_v47 = vpop.f32.mrb[178].mxu1 }
 0x7a0   : > { %v6097_v60 = vmax.f32 %v6065_v36, 0.0  ;;  %v6001_v32 = vadd.f32 %v7266_v38, %v6659_v47  ;;  %v5995_v62 = vpop.f32.mrb[179].mxu1 }
 0x7a1   : > { %v6096_v3 = vmax.f32 %v6064_v49, 0.0  ;;  %v5996_v35 = vadd.f32 %v7265_v16, %v5995_v62 }
 0x7a2   : > { %6129 = vst [vmem:[%s11162_s27 + $0xa8] sm:$0xff] %v6097_v60  ;;  %v6067_v31 = vadd.f32 %v6001_v32, %v4903_v56 }
 0x7a3   : > { %6128 = vst [vmem:[%s11162_s27 + $0xa0] sm:$0xff] %v6096_v3  ;;  %v6066_v21 = vadd.f32 %v5996_v35, %v4902_v25  ;;  %v6662_v0 = vpop.f32.mrb[180].mxu1 }
 0x7a4   : > { %v6099_v34 = vmax.f32 %v6067_v31, 0.0  ;;  %v6011_v63 = vadd.f32 %v7268_v14, %v6662_v0  ;;  %v6005_v2 = vpop.f32.mrb[181].mxu1 }
 0x7a5   : > { %v6098_v42 = vmax.f32 %v6066_v21, 0.0  ;;  %v6006_v7 = vadd.f32 %v7267_v52, %v6005_v2 }
 0x7a6   : > { %6131 = vst [vmem:[%s11162_s27 + $0xb8] sm:$0xff] %v6099_v34  ;;  %v6069_v41 = vadd.f32 %v6011_v63, %v4905_v28 }
 0x7a7   : > { %6130 = vst [vmem:[%s11162_s27 + $0xb0] sm:$0xff] %v6098_v42  ;;  %v6068_v33 = vadd.f32 %v6006_v7, %v4904_v40  ;;  %v6665_v55 = vpop.f32.mrb[182].mxu1 }
 0x7a8   : > { %v6101_v12 = vmax.f32 %v6069_v41, 0.0  ;;  %v6021_v44 = vadd.f32 %v7270_v30, %v6665_v55  ;;  %v6015_v50 = vpop.f32.mrb[183].mxu1 }
 0x7a9   : > { %v6100_v58 = vmax.f32 %v6068_v33, 0.0  ;;  %v6016_v24 = vadd.f32 %v7269_v48, %v6015_v50 }
 0x7aa   : > { %6133 = vst [vmem:[%s11162_s27 + $0xc8] sm:$0xff] %v6101_v12  ;;  %v6071_v23 = vadd.f32 %v6021_v44, %v4907_v59 }
 0x7ab   : > { %6132 = vst [vmem:[%s11162_s27 + $0xc0] sm:$0xff] %v6100_v58  ;;  %v6070_v8 = vadd.f32 %v6016_v24, %v4906_v9  ;;  %v6668_v6 = vpop.f32.mrb[184].mxu1 }
 0x7ac   : > { %v6103_v27 = vmax.f32 %v6071_v23, 0.0  ;;  %v6031_v11 = vadd.f32 %v7272_v43, %v6668_v6  ;;  %v6025_v45 = vpop.f32.mrb[185].mxu1 }
 0x7ad   : > { %v6102_v22 = vmax.f32 %v6070_v8, 0.0  ;;  %v6026_v39 = vadd.f32 %v7271_v57, %v6025_v45 }
 0x7ae   : > { %6135 = vst [vmem:[%s11162_s27 + $0xd8] sm:$0xff] %v6103_v27  ;;  %v6073_v4 = vadd.f32 %v6031_v11, %v4909_v17 }
 0x7af   : > { %6134 = vst [vmem:[%s11162_s27 + $0xd0] sm:$0xff] %v6102_v22  ;;  %v6072_v26 = vadd.f32 %v6026_v39, %v4908_v61  ;;  %v6671_v5 = vpop.f32.mrb[186].mxu1 }
 0x7b0   : > { %v6105_v15 = vmax.f32 %v6073_v4, 0.0  ;;  %v6041_v51 = vadd.f32 %v7274_v19, %v6671_v5  ;;  %v6035_v29 = vpop.f32.mrb[187].mxu1 }
 0x7b1   : > { %v6104_v46 = vmax.f32 %v6072_v26, 0.0  ;;  %v6036_v10 = vadd.f32 %v7273_v54, %v6035_v29 }
 0x7b2   : > { %6137 = vst [vmem:[%s11162_s27 + $0xe8] sm:$0xff] %v6105_v15  ;;  %v6075_v53 = vadd.f32 %v6041_v51, %v4911_v37 }
 0x7b3   : > { %6136 = vst [vmem:[%s11162_s27 + $0xe0] sm:$0xff] %v6104_v46  ;;  %v6074_v20 = vadd.f32 %v6036_v10, %v4910_v13 }
 0x7b4   : > { %v6107_v18 = vmax.f32 %v6075_v53, 0.0 }
 0x7b5   : > { %v6106_v1 = vmax.f32 %v6074_v20, 0.0 }
 0x7b6   : > { %6139 = vst [vmem:[%s11162_s27 + $0xf8] sm:$0xff] %v6107_v18 }
 0x7b7   : > { %6138 = vst [vmem:[%s11162_s27 + $0xf0] sm:$0xff] %v6106_v1 }
 0x7b8   : > { %8008 = shalt.err (!%p8005_p8)
}
 0x7b9   : > { %s8009_s14 = scalar_lea.hbm %s11281_s16, 4096  ;;  %s8013_s13 = scalar_lea.hbm %s11335_s6, 8192 }
 0x7ba   : > { %p8010_p11 = scmp.ne.s32.totalorder %s11281_s16, %s8009_s14  ;;  %p8014_p1 = scmp.lt.u32.totalorder %s11281_s16, %s11335_s6 }
 0x7bb   : > { %p8015_p2 = scmp.lt.u32.totalorder %s8013_s13, %s8009_s14  ;;  %p8017_p0 = scmp.lt.u32.totalorder %s8009_s14, %s11281_s16 }
 0x7bc   : > { %p8011_p7 = pnand %p8010_p11, %p8293_p10 }
 0x7bd   : > { %p8016_p13 = por %p8015_p2, %p8014_p1 }
 0x7be   : > { %p8012_p12 = pneg %p8011_p7 }
 0x7bf   : > { %p8018_p4 = por %p8017_p0, %p8016_p13 }
 0x7c1   : > { %p8019_p6 = pnand %p8018_p4, %p8012_p12 }
 0x7c3   : > { %8022 = shalt.err (!%p8019_p6)
}
 0x7c4   : > { %s8090_s29 = smov 128   ;;  %s8091_s7 = smov 8  }
 0x7c5   : > { %7694 = dma.vmem_to_hbm [thread:$0]  (%p8293_p10), %s11283_s11, 4096, %s11281_s16, %s6141_s25, %s8090_s29, %s8090_s29, %s8091_s7  }
 0x7c6 PF: > { %s6169_s27 = sand.u32 1, %s8065_s21   ;;  %p12105_p3 = scmp.ne.s32.totalorder %s11658_s28, 0 }
 0x7c7   : > { %p12106_p5 = scmp.ge.s32.totalorder %s8077_s24, 2  ;;  %s6170_s30 = scalar_lea.sflag [#allocation5], %s6169_s27 }
 0x7c9   : > { %p7717_p9 = pnand %p12106_p5, %p12105_p3 }
 0x7cb   : > { %8060 = dma.done.wait (!%p7717_p9), %s6170_s30, 4096  }
 0x7cc   : > { %8062 = vsyncadd (!%p7717_p9), %s6170_s30, 4294963200  ;;  %p24_p8 = scmp.ge.s32.totalorder %s8283_s18, 4   ;;  %s12107_s21 = smov %s8069_s22 }
 0x7cd   : > { %s12108_s22 = smov %s8073_s23  ;;  %s12109_s23 = smov %s8299_s19 }
 0x7ce   : > { %s12110_s24 = smov %s8283_s18  ;;  %26 = sbr.rel (!%p24_p8) target bundleno = 14 (0xe), region = 118 }
 0x7d5   :  { %6175 = vsyncpa [#allocation4], 1 }
 0x7d6   :  { %6177 = vsyncpa [#allocation4 + $0x1], 1 }
 0x7d7   :  { %6178 = vsyncpa [#allocation7], 1 }
 0x7d8   :  { %6180 = vsyncpa [#allocation7 + $0x1], 1 }
 0x7d9   :  { %6181 = vsyncpa [#allocation10], 1 }
 0x7da   :  { %6182 = vsyncpa [#allocation13], 1 }
 0x7db   :  { %6183 = vsyncpa [#allocation5], 1 }
 0x7dc   :  { %6185 = vsyncpa [#allocation5 + $0x1], 1 }

</bundles_post_ra>
